<compile_context>
chip_gen: v7x
topology: tpu7x:2x2x1
jax: 0.10.0
libtpu: 0.0.40
codegen_flags: <defaults>
</compile_context>

<pallas_src>
import functools

import jax
import jax.numpy as jnp
from jax.experimental import pallas as pl
from jax.experimental.pallas import tpu as pltpu

EPS_LN = 1e-5
EPS_BN = 1e-5


def _round_up(x, m):
    return ((x + m - 1) // m) * m


# --------------------------------------------------------------------------
# One-time parameter preparation (hoisted out of the per-call forward).
# Folds LayerNorm affine + eval-mode BatchNorm into the GRU input projection,
# pre-folds r/z hidden biases, transposes weights and pads 3H -> 128 lanes.
# --------------------------------------------------------------------------
def prepare_params(params):
    H = params["w_hh1"].shape[1]
    gpad = _round_up(3 * H, 128)

    def pad_lanes(a):
        a = a.astype(jnp.float32)
        return jnp.pad(a, ((0, 0), (0, gpad - a.shape[1])))

    def prep_branch(ln, bn, w_ih, w_hh, b_ih, b_hh):
        w_ln, b_ln = ln[0], ln[1]
        w_bn, b_bn, m_bn, v_bn = bn[0], bn[1], bn[2], bn[3]
        s_bn = w_bn * jax.lax.rsqrt(v_bn + EPS_BN)
        # BN_eval(LN(x)) == LN_hat(x) * g + c
        g = w_ln * s_bn
        c = b_ln * s_bn + (b_bn - m_bn * s_bn)

        wi_t = w_ih.T                                  # [E, 3H], cols = (r|z|n)
        w_in = g[:, None] * wi_t                       # fold per-feature scale
        b_in = c @ wi_t + b_ih                         # fold per-feature shift
        b_in = b_in.at[:2 * H].add(b_hh[:2 * H])       # pre-fold r/z hidden bias
        b_h = jnp.zeros((3 * H,), jnp.float32).at[2 * H:].set(b_hh[2 * H:])

        return dict(
            w_in=pad_lanes(w_in),                      # [E, gpad]
            b_in=pad_lanes(b_in.reshape(1, 3 * H)),    # [1, gpad]
            w_h=pad_lanes(w_hh.T),                     # [H, gpad]
            b_h=pad_lanes(b_h.reshape(1, 3 * H)),      # [1, gpad] (n gate only)
        )

    br1 = prep_branch(params["ln1"], params["bn1"], params["w_ih1"],
                      params["w_hh1"], params["b_ih1"], params["b_hh1"])
    br2 = prep_branch(params["ln2"], params["bn2"], params["w_ih2"],
                      params["w_hh2"], params["b_ih2"], params["b_hh2"])

    W = params["W_out"].astype(jnp.float32)
    prep = {
        "emb1": params["emb1"].astype(jnp.float32),
        "emb2": params["emb2"].astype(jnp.float32),
        "wo1": W[:, :H].T,                             # [H, V1]
        "wo2": W[:, H:].T,                             # [H, V1]
        "bo": params["b_out"].reshape(1, -1).astype(jnp.float32),
    }
    for k, v in br1.items():
        prep[k + "1"] = v
    for k, v in br2.items():
        prep[k + "2"] = v
    return prep


# --------------------------------------------------------------------------
# Single fused kernel for the whole forward pass.
# --------------------------------------------------------------------------
@functools.lru_cache(maxsize=None)
def _build_forward(B, S1, S2, V1, V2, E, H, GP):
    G = 3 * H

    def full_spec(shape):
        zeros = (0,) * len(shape)
        return pl.BlockSpec(shape, lambda i, *_: zeros)

    def kernel(ids1_ref, ids2_ref,                       # SMEM (scalar prefetch)
               emb1_ref, emb2_ref,
               win1_ref, bin1_ref, wh1_ref, bh1_ref,
               win2_ref, bin2_ref, wh2_ref, bh2_ref,
               wo1_ref, wo2_ref, bo_ref,
               o_ref,
               x1_ref, x2_ref, gi1_ref, gi2_ref):

        def embed_norm_project(ids_ref, emb_ref, win_ref, bin_ref,
                               x_ref, gi_ref, S):
            # Embedding gather from the VMEM-resident table using SMEM token
            # ids; rows are written time-major (row = t*B + b).
            for t in range(S):
                for b in range(B):
                    tok = ids_ref[b * S + t]
                    x_ref[pl.ds(t * B + b, 1), :] = emb_ref[pl.ds(tok, 1), :]
            x = x_ref[...]                                        # [S*B, E]
            # LayerNorm statistics; LN affine + BN(eval) are folded into
            # win/bin by prepare_params.
            mu = jnp.mean(x, axis=-1, keepdims=True)
            xc = x - mu
            var = jnp.mean(xc * xc, axis=-1, keepdims=True)
            xhat = xc * jax.lax.rsqrt(var + EPS_LN)
            # Input projection for ALL timesteps at once (hoisted out of the
            # recurrence); lane-dense [S*B, GP] store into the scratch.
            gi_ref[...] = (
                jnp.dot(xhat, win_ref[...], preferred_element_type=jnp.float32)
                + bin_ref[...])

        embed_norm_project(ids1_ref, emb1_ref, win1_ref, bin1_ref,
                           x1_ref, gi1_ref, S1)
        embed_norm_project(ids2_ref, emb2_ref, win2_ref, bin2_ref,
                           x2_ref, gi2_ref, S2)

        wh1 = wh1_ref[...]
        bh1 = bh1_ref[...]
        wh2 = wh2_ref[...]
        bh2 = bh2_ref[...]
        S_max = max(S1, S2)

        def gru_cell(t, h, gi_ref, wh, bh, S):
            ts = t if S == S_max else jnp.minimum(t, S - 1)
            gi = gi_ref[pl.ds(ts * B, B), :]                      # [B, GP]
            # Single wide hidden-state matmul per step; only the n gate keeps
            # a hidden bias (r/z hidden biases were folded into gi).
            gh = jnp.dot(h, wh, preferred_element_type=jnp.float32) + bh
            r = jax.nn.sigmoid(gi[:, 0:H] + gh[:, 0:H])
            z = jax.nn.sigmoid(gi[:, H:2 * H] + gh[:, H:2 * H])
            n = jnp.tanh(gi[:, 2 * H:G] + r * gh[:, 2 * H:G])
            h_new = (1.0 - z) * n + z * h
            if S < S_max:                       # freeze the shorter branch
                h_new = jnp.where(t < S, h_new, h)
            return h_new

        def body(t, carry):
            h1, h2 = carry
            return (gru_cell(t, h1, gi1_ref, wh1, bh1, S1),
                    gru_cell(t, h2, gi2_ref, wh2, bh2, S2))

        h0 = jnp.zeros((B, H), jnp.float32)
        h1, h2 = jax.lax.fori_loop(0, S_max, body, (h0, h0), unroll=True)

        # Output head: concat(h1, h2) @ W_out.T + b, as two partial matmuls
        # (no lane concatenation needed).  Dropout is identity in eval mode.
        out = jnp.dot(h1, wo1_ref[...], preferred_element_type=jnp.float32)
        out = out + jnp.dot(h2, wo2_ref[...], preferred_element_type=jnp.float32)
        o_ref[...] = (out + bo_ref[...]).astype(o_ref.dtype)

    grid_spec = pltpu.PrefetchScalarGridSpec(
        num_scalar_prefetch=2,
        grid=(1,),
        in_specs=[
            full_spec((V1, E)), full_spec((V2, E)),
            full_spec((E, GP)), full_spec((1, GP)),
            full_spec((H, GP)), full_spec((1, GP)),
            full_spec((E, GP)), full_spec((1, GP)),
            full_spec((H, GP)), full_spec((1, GP)),
            full_spec((H, V1)), full_spec((H, V1)), full_spec((1, V1)),
        ],
        out_specs=full_spec((B, V1)),
        scratch_shapes=[
            pltpu.VMEM((S1 * B, E), jnp.float32),
            pltpu.VMEM((S2 * B, E), jnp.float32),
            pltpu.VMEM((S1 * B, GP), jnp.float32),
            pltpu.VMEM((S2 * B, GP), jnp.float32),
        ],
    )
    return pl.pallas_call(
        kernel,
        out_shape=jax.ShapeDtypeStruct((B, V1), jnp.float32),
        grid_spec=grid_spec,
        compiler_params=pltpu.CompilerParams(
            dimension_semantics=("arbitrary",)),
    )


def gru_model_forward(prep, input1, input2):
    B, S1 = input1.shape
    _, S2 = input2.shape
    V1, E = prep["emb1"].shape
    V2 = prep["emb2"].shape[0]
    H = prep["w_h1"].shape[0]
    GP = prep["w_in1"].shape[1]
    fwd = _build_forward(B, S1, S2, V1, V2, E, H, GP)
    return fwd(
        input1.reshape(-1).astype(jnp.int32),
        input2.reshape(-1).astype(jnp.int32),
        prep["emb1"], prep["emb2"],
        prep["w_in1"], prep["b_in1"], prep["w_h1"], prep["b_h1"],
        prep["w_in2"], prep["b_in2"], prep["w_h2"], prep["b_h2"],
        prep["wo1"], prep["wo2"], prep["bo"])


# --------------------------------------------------------------------------
# Pure-JAX reference (eval-mode semantics) for a sanity check.
# --------------------------------------------------------------------------
def reference_forward(params, input1, input2):
    def embed_norm(ids, emb, ln, bn):
        x = emb[ids]
        mu = x.mean(-1, keepdims=True)
        var = ((x - mu) ** 2).mean(-1, keepdims=True)
        y = (x - mu) / jnp.sqrt(var + EPS_LN) * ln[0] + ln[1]
        y = (y - bn[2]) / jnp.sqrt(bn[3] + EPS_BN) * bn[0] + bn[1]
        return y

    def gru_ref(x, w_ih, w_hh, b_ih, b_hh):
        B, S, E = x.shape
        H = w_hh.shape[1]
        wir, wiz, win = jnp.split(w_ih, 3, axis=0)
        whr, whz, whn = jnp.split(w_hh, 3, axis=0)
        bir, biz, binn = jnp.split(b_ih, 3)
        bhr, bhz, bhn = jnp.split(b_hh, 3)

        def step(h, xt):
            r = jax.nn.sigmoid(xt @ wir.T + bir + h @ whr.T + bhr)
            z = jax.nn.sigmoid(xt @ wiz.T + biz + h @ whz.T + bhz)
            n = jnp.tanh(xt @ win.T + binn + r * (h @ whn.T + bhn))
            return (1.0 - z) * n + z * h, None

        h0 = jnp.zeros((B, H), jnp.float32)
        h_last, _ = jax.lax.scan(step, h0, jnp.transpose(x, (1, 0, 2)))
        return h_last

    y1 = embed_norm(input1, params["emb1"], params["ln1"], params["bn1"])
    y2 = embed_norm(input2, params["emb2"], params["ln2"], params["bn2"])
    h1 = gru_ref(y1, params["w_ih1"], params["w_hh1"], params["b_ih1"], params["b_hh1"])
    h2 = gru_ref(y2, params["w_ih2"], params["w_hh2"], params["b_ih2"], params["b_hh2"])
    cat = jnp.concatenate([h1, h2], axis=1)
    return cat @ params["W_out"].T + params["b_out"]


if __name__ == "__main__":
    # Use full-precision f32 matmuls everywhere so kernel vs. reference agree
    # to ~1e-5 despite the weight/bias re-associations done in prepare_params.
    jax.config.update("jax_default_matmul_precision", "highest")

    B, S1, S2 = 4, 8, 10
    V1, V2, E, H = 50, 40, 32, 32

    key = jax.random.PRNGKey(0)
    ks = jax.random.split(key, 24)
    s = 1.0 / jnp.sqrt(jnp.float32(H))

    def u(k, shape):
        return jax.random.uniform(k, shape, jnp.float32, -s, s)

    params = {
        "emb1": jax.random.normal(ks[0], (V1, E), jnp.float32),
        "emb2": jax.random.normal(ks[1], (V2, E), jnp.float32),
        "ln1": jnp.stack([1.0 + 0.1 * jax.random.normal(ks[2], (E,)),
                          0.1 * jax.random.normal(ks[3], (E,))]).astype(jnp.float32),
        "ln2": jnp.stack([1.0 + 0.1 * jax.random.normal(ks[4], (E,)),
                          0.1 * jax.random.normal(ks[5], (E,))]).astype(jnp.float32),
        # BN params: [weight, bias, running_mean, running_var]
        "bn1": jnp.stack([1.0 + 0.1 * jax.random.normal(ks[6], (E,)),
                          0.1 * jax.random.normal(ks[7], (E,)),
                          0.1 * jax.random.normal(ks[8], (E,)),
                          0.5 + jnp.abs(jax.random.normal(ks[9], (E,)))]).astype(jnp.float32),
        "bn2": jnp.stack([1.0 + 0.1 * jax.random.normal(ks[10], (E,)),
                          0.1 * jax.random.normal(ks[11], (E,)),
                          0.1 * jax.random.normal(ks[12], (E,)),
                          0.5 + jnp.abs(jax.random.normal(ks[13], (E,)))]).astype(jnp.float32),
        "w_ih1": u(ks[14], (3 * H, E)), "w_hh1": u(ks[15], (3 * H, H)),
        "b_ih1": u(ks[16], (3 * H,)), "b_hh1": u(ks[17], (3 * H,)),
        "w_ih2": u(ks[18], (3 * H, E)), "w_hh2": u(ks[19], (3 * H, H)),
        "b_ih2": u(ks[20], (3 * H,)), "b_hh2": u(ks[21], (3 * H,)),
        "W_out": u(ks[22], (V1, 2 * H)),
        "b_out": u(ks[23], (V1,)),
    }

    input1 = jax.random.randint(jax.random.PRNGKey(101), (B, S1), 0, V1)
    input2 = jax.random.randint(jax.random.PRNGKey(202), (B, S2), 0, V2)

    prep = prepare_params(params)               # one-time parameter folding
    out = jax.jit(gru_model_forward)(prep, input1, input2)
    out = jax.block_until_ready(out)
    assert out.shape == (B, V1), out.shape

    ref = reference_forward(params, input1, input2)
    max_err = float(jnp.max(jnp.abs(out - ref)))
    assert max_err < 2e-3, f"mismatch vs reference: {max_err}"

    print("KERNEL_OK")
</pallas_src>

<mosaic_0001>
module attributes {stable_mosaic.version = 11 : i64} {
  func.func @kernel(%arg0: i32, %arg1: memref<32xi32, #tpu.memory_space<smem>>, %arg2: memref<40xi32, #tpu.memory_space<smem>>, %arg3: memref<50x32xf32, #tpu.memory_space<vmem>>, %arg4: memref<40x32xf32, #tpu.memory_space<vmem>>, %arg5: memref<32x128xf32, #tpu.memory_space<vmem>>, %arg6: memref<1x128xf32, #tpu.memory_space<vmem>>, %arg7: memref<32x128xf32, #tpu.memory_space<vmem>>, %arg8: memref<1x128xf32, #tpu.memory_space<vmem>>, %arg9: memref<32x128xf32, #tpu.memory_space<vmem>>, %arg10: memref<1x128xf32, #tpu.memory_space<vmem>>, %arg11: memref<32x128xf32, #tpu.memory_space<vmem>>, %arg12: memref<1x128xf32, #tpu.memory_space<vmem>>, %arg13: memref<32x50xf32, #tpu.memory_space<vmem>>, %arg14: memref<32x50xf32, #tpu.memory_space<vmem>>, %arg15: memref<1x50xf32, #tpu.memory_space<vmem>>, %arg16: memref<4x50xf32, #tpu.memory_space<vmem>>, %arg17: memref<32x32xf32, #tpu.memory_space<vmem>>, %arg18: memref<40x32xf32, #tpu.memory_space<vmem>>, %arg19: memref<32x128xf32, #tpu.memory_space<vmem>>, %arg20: memref<40x128xf32, #tpu.memory_space<vmem>>) attributes {dimension_semantics = [#tpu.dimension_semantics<arbitrary>], iteration_bounds = array<i64: 1>, scalar_prefetch = 2 : i64, scratch_operands = 4 : i64, tpu.core_type = #tpu.core_type<tc>, window_params = [{pipeline_mode = #tpu.pipeline_mode<synchronous>, transform_indices = @transform_0, window_bounds = array<i64: 50, 32>}, {pipeline_mode = #tpu.pipeline_mode<synchronous>, transform_indices = @transform_1, window_bounds = array<i64: 40, 32>}, {pipeline_mode = #tpu.pipeline_mode<synchronous>, transform_indices = @transform_2, window_bounds = array<i64: 32, 128>}, {pipeline_mode = #tpu.pipeline_mode<synchronous>, transform_indices = @transform_3, window_bounds = array<i64: 1, 128>}, {pipeline_mode = #tpu.pipeline_mode<synchronous>, transform_indices = @transform_4, window_bounds = array<i64: 32, 128>}, {pipeline_mode = #tpu.pipeline_mode<synchronous>, transform_indices = @transform_5, window_bounds = array<i64: 1, 128>}, {pipeline_mode = #tpu.pipeline_mode<synchronous>, transform_indices = @transform_6, window_bounds = array<i64: 32, 128>}, {pipeline_mode = #tpu.pipeline_mode<synchronous>, transform_indices = @transform_7, window_bounds = array<i64: 1, 128>}, {pipeline_mode = #tpu.pipeline_mode<synchronous>, transform_indices = @transform_8, window_bounds = array<i64: 32, 128>}, {pipeline_mode = #tpu.pipeline_mode<synchronous>, transform_indices = @transform_9, window_bounds = array<i64: 1, 128>}, {pipeline_mode = #tpu.pipeline_mode<synchronous>, transform_indices = @transform_10, window_bounds = array<i64: 32, 50>}, {pipeline_mode = #tpu.pipeline_mode<synchronous>, transform_indices = @transform_11, window_bounds = array<i64: 32, 50>}, {pipeline_mode = #tpu.pipeline_mode<synchronous>, transform_indices = @transform_12, window_bounds = array<i64: 1, 50>}, {pipeline_mode = #tpu.pipeline_mode<synchronous>, transform_indices = @transform_13, window_bounds = array<i64: 4, 50>}]} {
    %c0 = arith.constant 0 : index
    %0 = memref.load %arg1[%c0] : memref<32xi32, #tpu.memory_space<smem>>
    %1 = arith.index_cast %0 : i32 to index
    %c0_0 = arith.constant 0 : index
    %2 = vector.load %arg3[%1, %c0_0] : memref<50x32xf32, #tpu.memory_space<vmem>>, vector<1x32xf32>
    %c0_1 = arith.constant 0 : index
    %c0_2 = arith.constant 0 : index
    %3 = vector.load %arg17[%c0_1, %c0_2] : memref<32x32xf32, #tpu.memory_space<vmem>>, vector<1x32xf32>
    tpu.vector_store %arg17[%c0_1, %c0_2], %2 {strides = array<i32>} : memref<32x32xf32, #tpu.memory_space<vmem>>, vector<1x32xf32>,
    %c8 = arith.constant 8 : index
    %4 = memref.load %arg1[%c8] : memref<32xi32, #tpu.memory_space<smem>>
    %5 = arith.index_cast %4 : i32 to index
    %c0_3 = arith.constant 0 : index
    %6 = vector.load %arg3[%5, %c0_3] : memref<50x32xf32, #tpu.memory_space<vmem>>, vector<1x32xf32>
    %c1 = arith.constant 1 : index
    %c0_4 = arith.constant 0 : index
    %7 = vector.load %arg17[%c1, %c0_4] : memref<32x32xf32, #tpu.memory_space<vmem>>, vector<1x32xf32>
    tpu.vector_store %arg17[%c1, %c0_4], %6 {strides = array<i32>} : memref<32x32xf32, #tpu.memory_space<vmem>>, vector<1x32xf32>,
    %c16 = arith.constant 16 : index
    %8 = memref.load %arg1[%c16] : memref<32xi32, #tpu.memory_space<smem>>
    %9 = arith.index_cast %8 : i32 to index
    %c0_5 = arith.constant 0 : index
    %10 = vector.load %arg3[%9, %c0_5] : memref<50x32xf32, #tpu.memory_space<vmem>>, vector<1x32xf32>
    %c2 = arith.constant 2 : index
    %c0_6 = arith.constant 0 : index
    %11 = vector.load %arg17[%c2, %c0_6] : memref<32x32xf32, #tpu.memory_space<vmem>>, vector<1x32xf32>
    tpu.vector_store %arg17[%c2, %c0_6], %10 {strides = array<i32>} : memref<32x32xf32, #tpu.memory_space<vmem>>, vector<1x32xf32>,
    %c24 = arith.constant 24 : index
    %12 = memref.load %arg1[%c24] : memref<32xi32, #tpu.memory_space<smem>>
    %13 = arith.index_cast %12 : i32 to index
    %c0_7 = arith.constant 0 : index
    %14 = vector.load %arg3[%13, %c0_7] : memref<50x32xf32, #tpu.memory_space<vmem>>, vector<1x32xf32>
    %c3 = arith.constant 3 : index
    %c0_8 = arith.constant 0 : index
    %15 = vector.load %arg17[%c3, %c0_8] : memref<32x32xf32, #tpu.memory_space<vmem>>, vector<1x32xf32>
    tpu.vector_store %arg17[%c3, %c0_8], %14 {strides = array<i32>} : memref<32x32xf32, #tpu.memory_space<vmem>>, vector<1x32xf32>,
    %c1_9 = arith.constant 1 : index
    %16 = memref.load %arg1[%c1_9] : memref<32xi32, #tpu.memory_space<smem>>
    %17 = arith.index_cast %16 : i32 to index
    %c0_10 = arith.constant 0 : index
    %18 = vector.load %arg3[%17, %c0_10] : memref<50x32xf32, #tpu.memory_space<vmem>>, vector<1x32xf32>
    %c4 = arith.constant 4 : index
    %c0_11 = arith.constant 0 : index
    %19 = vector.load %arg17[%c4, %c0_11] : memref<32x32xf32, #tpu.memory_space<vmem>>, vector<1x32xf32>
    tpu.vector_store %arg17[%c4, %c0_11], %18 {strides = array<i32>} : memref<32x32xf32, #tpu.memory_space<vmem>>, vector<1x32xf32>,
    %c9 = arith.constant 9 : index
    %20 = memref.load %arg1[%c9] : memref<32xi32, #tpu.memory_space<smem>>
    %21 = arith.index_cast %20 : i32 to index
    %c0_12 = arith.constant 0 : index
    %22 = vector.load %arg3[%21, %c0_12] : memref<50x32xf32, #tpu.memory_space<vmem>>, vector<1x32xf32>
    %c5 = arith.constant 5 : index
    %c0_13 = arith.constant 0 : index
    %23 = vector.load %arg17[%c5, %c0_13] : memref<32x32xf32, #tpu.memory_space<vmem>>, vector<1x32xf32>
    tpu.vector_store %arg17[%c5, %c0_13], %22 {strides = array<i32>} : memref<32x32xf32, #tpu.memory_space<vmem>>, vector<1x32xf32>,
    %c17 = arith.constant 17 : index
    %24 = memref.load %arg1[%c17] : memref<32xi32, #tpu.memory_space<smem>>
    %25 = arith.index_cast %24 : i32 to index
    %c0_14 = arith.constant 0 : index
    %26 = vector.load %arg3[%25, %c0_14] : memref<50x32xf32, #tpu.memory_space<vmem>>, vector<1x32xf32>
    %c6 = arith.constant 6 : index
    %c0_15 = arith.constant 0 : index
    %27 = vector.load %arg17[%c6, %c0_15] : memref<32x32xf32, #tpu.memory_space<vmem>>, vector<1x32xf32>
    tpu.vector_store %arg17[%c6, %c0_15], %26 {strides = array<i32>} : memref<32x32xf32, #tpu.memory_space<vmem>>, vector<1x32xf32>,
    %c25 = arith.constant 25 : index
    %28 = memref.load %arg1[%c25] : memref<32xi32, #tpu.memory_space<smem>>
    %29 = arith.index_cast %28 : i32 to index
    %c0_16 = arith.constant 0 : index
    %30 = vector.load %arg3[%29, %c0_16] : memref<50x32xf32, #tpu.memory_space<vmem>>, vector<1x32xf32>
    %c7 = arith.constant 7 : index
    %c0_17 = arith.constant 0 : index
    %31 = vector.load %arg17[%c7, %c0_17] : memref<32x32xf32, #tpu.memory_space<vmem>>, vector<1x32xf32>
    tpu.vector_store %arg17[%c7, %c0_17], %30 {strides = array<i32>} : memref<32x32xf32, #tpu.memory_space<vmem>>, vector<1x32xf32>,
    %c2_18 = arith.constant 2 : index
    %32 = memref.load %arg1[%c2_18] : memref<32xi32, #tpu.memory_space<smem>>
    %33 = arith.index_cast %32 : i32 to index
    %c0_19 = arith.constant 0 : index
    %34 = vector.load %arg3[%33, %c0_19] : memref<50x32xf32, #tpu.memory_space<vmem>>, vector<1x32xf32>
    %c8_20 = arith.constant 8 : index
    %c0_21 = arith.constant 0 : index
    %35 = vector.load %arg17[%c8_20, %c0_21] : memref<32x32xf32, #tpu.memory_space<vmem>>, vector<1x32xf32>
    tpu.vector_store %arg17[%c8_20, %c0_21], %34 {strides = array<i32>} : memref<32x32xf32, #tpu.memory_space<vmem>>, vector<1x32xf32>,
    %c10 = arith.constant 10 : index
    %36 = memref.load %arg1[%c10] : memref<32xi32, #tpu.memory_space<smem>>
    %37 = arith.index_cast %36 : i32 to index
    %c0_22 = arith.constant 0 : index
    %38 = vector.load %arg3[%37, %c0_22] : memref<50x32xf32, #tpu.memory_space<vmem>>, vector<1x32xf32>
    %c9_23 = arith.constant 9 : index
    %c0_24 = arith.constant 0 : index
    %39 = vector.load %arg17[%c9_23, %c0_24] : memref<32x32xf32, #tpu.memory_space<vmem>>, vector<1x32xf32>
    tpu.vector_store %arg17[%c9_23, %c0_24], %38 {strides = array<i32>} : memref<32x32xf32, #tpu.memory_space<vmem>>, vector<1x32xf32>,
    %c18 = arith.constant 18 : index
    %40 = memref.load %arg1[%c18] : memref<32xi32, #tpu.memory_space<smem>>
    %41 = arith.index_cast %40 : i32 to index
    %c0_25 = arith.constant 0 : index
    %42 = vector.load %arg3[%41, %c0_25] : memref<50x32xf32, #tpu.memory_space<vmem>>, vector<1x32xf32>
    %c10_26 = arith.constant 10 : index
    %c0_27 = arith.constant 0 : index
    %43 = vector.load %arg17[%c10_26, %c0_27] : memref<32x32xf32, #tpu.memory_space<vmem>>, vector<1x32xf32>
    tpu.vector_store %arg17[%c10_26, %c0_27], %42 {strides = array<i32>} : memref<32x32xf32, #tpu.memory_space<vmem>>, vector<1x32xf32>,
    %c26 = arith.constant 26 : index
    %44 = memref.load %arg1[%c26] : memref<32xi32, #tpu.memory_space<smem>>
    %45 = arith.index_cast %44 : i32 to index
    %c0_28 = arith.constant 0 : index
    %46 = vector.load %arg3[%45, %c0_28] : memref<50x32xf32, #tpu.memory_space<vmem>>, vector<1x32xf32>
    %c11 = arith.constant 11 : index
    %c0_29 = arith.constant 0 : index
    %47 = vector.load %arg17[%c11, %c0_29] : memref<32x32xf32, #tpu.memory_space<vmem>>, vector<1x32xf32>
    tpu.vector_store %arg17[%c11, %c0_29], %46 {strides = array<i32>} : memref<32x32xf32, #tpu.memory_space<vmem>>, vector<1x32xf32>,
    %c3_30 = arith.constant 3 : index
    %48 = memref.load %arg1[%c3_30] : memref<32xi32, #tpu.memory_space<smem>>
    %49 = arith.index_cast %48 : i32 to index
    %c0_31 = arith.constant 0 : index
    %50 = vector.load %arg3[%49, %c0_31] : memref<50x32xf32, #tpu.memory_space<vmem>>, vector<1x32xf32>
    %c12 = arith.constant 12 : index
    %c0_32 = arith.constant 0 : index
    %51 = vector.load %arg17[%c12, %c0_32] : memref<32x32xf32, #tpu.memory_space<vmem>>, vector<1x32xf32>
    tpu.vector_store %arg17[%c12, %c0_32], %50 {strides = array<i32>} : memref<32x32xf32, #tpu.memory_space<vmem>>, vector<1x32xf32>,
    %c11_33 = arith.constant 11 : index
    %52 = memref.load %arg1[%c11_33] : memref<32xi32, #tpu.memory_space<smem>>
    %53 = arith.index_cast %52 : i32 to index
    %c0_34 = arith.constant 0 : index
    %54 = vector.load %arg3[%53, %c0_34] : memref<50x32xf32, #tpu.memory_space<vmem>>, vector<1x32xf32>
    %c13 = arith.constant 13 : index
    %c0_35 = arith.constant 0 : index
    %55 = vector.load %arg17[%c13, %c0_35] : memref<32x32xf32, #tpu.memory_space<vmem>>, vector<1x32xf32>
    tpu.vector_store %arg17[%c13, %c0_35], %54 {strides = array<i32>} : memref<32x32xf32, #tpu.memory_space<vmem>>, vector<1x32xf32>,
    %c19 = arith.constant 19 : index
    %56 = memref.load %arg1[%c19] : memref<32xi32, #tpu.memory_space<smem>>
    %57 = arith.index_cast %56 : i32 to index
    %c0_36 = arith.constant 0 : index
    %58 = vector.load %arg3[%57, %c0_36] : memref<50x32xf32, #tpu.memory_space<vmem>>, vector<1x32xf32>
    %c14 = arith.constant 14 : index
    %c0_37 = arith.constant 0 : index
    %59 = vector.load %arg17[%c14, %c0_37] : memref<32x32xf32, #tpu.memory_space<vmem>>, vector<1x32xf32>
    tpu.vector_store %arg17[%c14, %c0_37], %58 {strides = array<i32>} : memref<32x32xf32, #tpu.memory_space<vmem>>, vector<1x32xf32>,
    %c27 = arith.constant 27 : index
    %60 = memref.load %arg1[%c27] : memref<32xi32, #tpu.memory_space<smem>>
    %61 = arith.index_cast %60 : i32 to index
    %c0_38 = arith.constant 0 : index
    %62 = vector.load %arg3[%61, %c0_38] : memref<50x32xf32, #tpu.memory_space<vmem>>, vector<1x32xf32>
    %c15 = arith.constant 15 : index
    %c0_39 = arith.constant 0 : index
    %63 = vector.load %arg17[%c15, %c0_39] : memref<32x32xf32, #tpu.memory_space<vmem>>, vector<1x32xf32>
    tpu.vector_store %arg17[%c15, %c0_39], %62 {strides = array<i32>} : memref<32x32xf32, #tpu.memory_space<vmem>>, vector<1x32xf32>,
    %c4_40 = arith.constant 4 : index
    %64 = memref.load %arg1[%c4_40] : memref<32xi32, #tpu.memory_space<smem>>
    %65 = arith.index_cast %64 : i32 to index
    %c0_41 = arith.constant 0 : index
    %66 = vector.load %arg3[%65, %c0_41] : memref<50x32xf32, #tpu.memory_space<vmem>>, vector<1x32xf32>
    %c16_42 = arith.constant 16 : index
    %c0_43 = arith.constant 0 : index
    %67 = vector.load %arg17[%c16_42, %c0_43] : memref<32x32xf32, #tpu.memory_space<vmem>>, vector<1x32xf32>
    tpu.vector_store %arg17[%c16_42, %c0_43], %66 {strides = array<i32>} : memref<32x32xf32, #tpu.memory_space<vmem>>, vector<1x32xf32>,
    %c12_44 = arith.constant 12 : index
    %68 = memref.load %arg1[%c12_44] : memref<32xi32, #tpu.memory_space<smem>>
    %69 = arith.index_cast %68 : i32 to index
    %c0_45 = arith.constant 0 : index
    %70 = vector.load %arg3[%69, %c0_45] : memref<50x32xf32, #tpu.memory_space<vmem>>, vector<1x32xf32>
    %c17_46 = arith.constant 17 : index
    %c0_47 = arith.constant 0 : index
    %71 = vector.load %arg17[%c17_46, %c0_47] : memref<32x32xf32, #tpu.memory_space<vmem>>, vector<1x32xf32>
    tpu.vector_store %arg17[%c17_46, %c0_47], %70 {strides = array<i32>} : memref<32x32xf32, #tpu.memory_space<vmem>>, vector<1x32xf32>,
    %c20 = arith.constant 20 : index
    %72 = memref.load %arg1[%c20] : memref<32xi32, #tpu.memory_space<smem>>
    %73 = arith.index_cast %72 : i32 to index
    %c0_48 = arith.constant 0 : index
    %74 = vector.load %arg3[%73, %c0_48] : memref<50x32xf32, #tpu.memory_space<vmem>>, vector<1x32xf32>
    %c18_49 = arith.constant 18 : index
    %c0_50 = arith.constant 0 : index
    %75 = vector.load %arg17[%c18_49, %c0_50] : memref<32x32xf32, #tpu.memory_space<vmem>>, vector<1x32xf32>
    tpu.vector_store %arg17[%c18_49, %c0_50], %74 {strides = array<i32>} : memref<32x32xf32, #tpu.memory_space<vmem>>, vector<1x32xf32>,
    %c28 = arith.constant 28 : index
    %76 = memref.load %arg1[%c28] : memref<32xi32, #tpu.memory_space<smem>>
    %77 = arith.index_cast %76 : i32 to index
    %c0_51 = arith.constant 0 : index
    %78 = vector.load %arg3[%77, %c0_51] : memref<50x32xf32, #tpu.memory_space<vmem>>, vector<1x32xf32>
    %c19_52 = arith.constant 19 : index
    %c0_53 = arith.constant 0 : index
    %79 = vector.load %arg17[%c19_52, %c0_53] : memref<32x32xf32, #tpu.memory_space<vmem>>, vector<1x32xf32>
    tpu.vector_store %arg17[%c19_52, %c0_53], %78 {strides = array<i32>} : memref<32x32xf32, #tpu.memory_space<vmem>>, vector<1x32xf32>,
    %c5_54 = arith.constant 5 : index
    %80 = memref.load %arg1[%c5_54] : memref<32xi32, #tpu.memory_space<smem>>
    %81 = arith.index_cast %80 : i32 to index
    %c0_55 = arith.constant 0 : index
    %82 = vector.load %arg3[%81, %c0_55] : memref<50x32xf32, #tpu.memory_space<vmem>>, vector<1x32xf32>
    %c20_56 = arith.constant 20 : index
    %c0_57 = arith.constant 0 : index
    %83 = vector.load %arg17[%c20_56, %c0_57] : memref<32x32xf32, #tpu.memory_space<vmem>>, vector<1x32xf32>
    tpu.vector_store %arg17[%c20_56, %c0_57], %82 {strides = array<i32>} : memref<32x32xf32, #tpu.memory_space<vmem>>, vector<1x32xf32>,
    %c13_58 = arith.constant 13 : index
    %84 = memref.load %arg1[%c13_58] : memref<32xi32, #tpu.memory_space<smem>>
    %85 = arith.index_cast %84 : i32 to index
    %c0_59 = arith.constant 0 : index
    %86 = vector.load %arg3[%85, %c0_59] : memref<50x32xf32, #tpu.memory_space<vmem>>, vector<1x32xf32>
    %c21 = arith.constant 21 : index
    %c0_60 = arith.constant 0 : index
    %87 = vector.load %arg17[%c21, %c0_60] : memref<32x32xf32, #tpu.memory_space<vmem>>, vector<1x32xf32>
    tpu.vector_store %arg17[%c21, %c0_60], %86 {strides = array<i32>} : memref<32x32xf32, #tpu.memory_space<vmem>>, vector<1x32xf32>,
    %c21_61 = arith.constant 21 : index
    %88 = memref.load %arg1[%c21_61] : memref<32xi32, #tpu.memory_space<smem>>
    %89 = arith.index_cast %88 : i32 to index
    %c0_62 = arith.constant 0 : index
    %90 = vector.load %arg3[%89, %c0_62] : memref<50x32xf32, #tpu.memory_space<vmem>>, vector<1x32xf32>
    %c22 = arith.constant 22 : index
    %c0_63 = arith.constant 0 : index
    %91 = vector.load %arg17[%c22, %c0_63] : memref<32x32xf32, #tpu.memory_space<vmem>>, vector<1x32xf32>
    tpu.vector_store %arg17[%c22, %c0_63], %90 {strides = array<i32>} : memref<32x32xf32, #tpu.memory_space<vmem>>, vector<1x32xf32>,
    %c29 = arith.constant 29 : index
    %92 = memref.load %arg1[%c29] : memref<32xi32, #tpu.memory_space<smem>>
    %93 = arith.index_cast %92 : i32 to index
    %c0_64 = arith.constant 0 : index
    %94 = vector.load %arg3[%93, %c0_64] : memref<50x32xf32, #tpu.memory_space<vmem>>, vector<1x32xf32>
    %c23 = arith.constant 23 : index
    %c0_65 = arith.constant 0 : index
    %95 = vector.load %arg17[%c23, %c0_65] : memref<32x32xf32, #tpu.memory_space<vmem>>, vector<1x32xf32>
    tpu.vector_store %arg17[%c23, %c0_65], %94 {strides = array<i32>} : memref<32x32xf32, #tpu.memory_space<vmem>>, vector<1x32xf32>,
    %c6_66 = arith.constant 6 : index
    %96 = memref.load %arg1[%c6_66] : memref<32xi32, #tpu.memory_space<smem>>
    %97 = arith.index_cast %96 : i32 to index
    %c0_67 = arith.constant 0 : index
    %98 = vector.load %arg3[%97, %c0_67] : memref<50x32xf32, #tpu.memory_space<vmem>>, vector<1x32xf32>
    %c24_68 = arith.constant 24 : index
    %c0_69 = arith.constant 0 : index
    %99 = vector.load %arg17[%c24_68, %c0_69] : memref<32x32xf32, #tpu.memory_space<vmem>>, vector<1x32xf32>
    tpu.vector_store %arg17[%c24_68, %c0_69], %98 {strides = array<i32>} : memref<32x32xf32, #tpu.memory_space<vmem>>, vector<1x32xf32>,
    %c14_70 = arith.constant 14 : index
    %100 = memref.load %arg1[%c14_70] : memref<32xi32, #tpu.memory_space<smem>>
    %101 = arith.index_cast %100 : i32 to index
    %c0_71 = arith.constant 0 : index
    %102 = vector.load %arg3[%101, %c0_71] : memref<50x32xf32, #tpu.memory_space<vmem>>, vector<1x32xf32>
    %c25_72 = arith.constant 25 : index
    %c0_73 = arith.constant 0 : index
    %103 = vector.load %arg17[%c25_72, %c0_73] : memref<32x32xf32, #tpu.memory_space<vmem>>, vector<1x32xf32>
    tpu.vector_store %arg17[%c25_72, %c0_73], %102 {strides = array<i32>} : memref<32x32xf32, #tpu.memory_space<vmem>>, vector<1x32xf32>,
    %c22_74 = arith.constant 22 : index
    %104 = memref.load %arg1[%c22_74] : memref<32xi32, #tpu.memory_space<smem>>
    %105 = arith.index_cast %104 : i32 to index
    %c0_75 = arith.constant 0 : index
    %106 = vector.load %arg3[%105, %c0_75] : memref<50x32xf32, #tpu.memory_space<vmem>>, vector<1x32xf32>
    %c26_76 = arith.constant 26 : index
    %c0_77 = arith.constant 0 : index
    %107 = vector.load %arg17[%c26_76, %c0_77] : memref<32x32xf32, #tpu.memory_space<vmem>>, vector<1x32xf32>
    tpu.vector_store %arg17[%c26_76, %c0_77], %106 {strides = array<i32>} : memref<32x32xf32, #tpu.memory_space<vmem>>, vector<1x32xf32>,
    %c30 = arith.constant 30 : index
    %108 = memref.load %arg1[%c30] : memref<32xi32, #tpu.memory_space<smem>>
    %109 = arith.index_cast %108 : i32 to index
    %c0_78 = arith.constant 0 : index
    %110 = vector.load %arg3[%109, %c0_78] : memref<50x32xf32, #tpu.memory_space<vmem>>, vector<1x32xf32>
    %c27_79 = arith.constant 27 : index
    %c0_80 = arith.constant 0 : index
    %111 = vector.load %arg17[%c27_79, %c0_80] : memref<32x32xf32, #tpu.memory_space<vmem>>, vector<1x32xf32>
    tpu.vector_store %arg17[%c27_79, %c0_80], %110 {strides = array<i32>} : memref<32x32xf32, #tpu.memory_space<vmem>>, vector<1x32xf32>,
    %c7_81 = arith.constant 7 : index
    %112 = memref.load %arg1[%c7_81] : memref<32xi32, #tpu.memory_space<smem>>
    %113 = arith.index_cast %112 : i32 to index
    %c0_82 = arith.constant 0 : index
    %114 = vector.load %arg3[%113, %c0_82] : memref<50x32xf32, #tpu.memory_space<vmem>>, vector<1x32xf32>
    %c28_83 = arith.constant 28 : index
    %c0_84 = arith.constant 0 : index
    %115 = vector.load %arg17[%c28_83, %c0_84] : memref<32x32xf32, #tpu.memory_space<vmem>>, vector<1x32xf32>
    tpu.vector_store %arg17[%c28_83, %c0_84], %114 {strides = array<i32>} : memref<32x32xf32, #tpu.memory_space<vmem>>, vector<1x32xf32>,
    %c15_85 = arith.constant 15 : index
    %116 = memref.load %arg1[%c15_85] : memref<32xi32, #tpu.memory_space<smem>>
    %117 = arith.index_cast %116 : i32 to index
    %c0_86 = arith.constant 0 : index
    %118 = vector.load %arg3[%117, %c0_86] : memref<50x32xf32, #tpu.memory_space<vmem>>, vector<1x32xf32>
    %c29_87 = arith.constant 29 : index
    %c0_88 = arith.constant 0 : index
    %119 = vector.load %arg17[%c29_87, %c0_88] : memref<32x32xf32, #tpu.memory_space<vmem>>, vector<1x32xf32>
    tpu.vector_store %arg17[%c29_87, %c0_88], %118 {strides = array<i32>} : memref<32x32xf32, #tpu.memory_space<vmem>>, vector<1x32xf32>,
    %c23_89 = arith.constant 23 : index
    %120 = memref.load %arg1[%c23_89] : memref<32xi32, #tpu.memory_space<smem>>
    %121 = arith.index_cast %120 : i32 to index
    %c0_90 = arith.constant 0 : index
    %122 = vector.load %arg3[%121, %c0_90] : memref<50x32xf32, #tpu.memory_space<vmem>>, vector<1x32xf32>
    %c30_91 = arith.constant 30 : index
    %c0_92 = arith.constant 0 : index
    %123 = vector.load %arg17[%c30_91, %c0_92] : memref<32x32xf32, #tpu.memory_space<vmem>>, vector<1x32xf32>
    tpu.vector_store %arg17[%c30_91, %c0_92], %122 {strides = array<i32>} : memref<32x32xf32, #tpu.memory_space<vmem>>, vector<1x32xf32>,
    %c31 = arith.constant 31 : index
    %124 = memref.load %arg1[%c31] : memref<32xi32, #tpu.memory_space<smem>>
    %125 = arith.index_cast %124 : i32 to index
    %c0_93 = arith.constant 0 : index
    %126 = vector.load %arg3[%125, %c0_93] : memref<50x32xf32, #tpu.memory_space<vmem>>, vector<1x32xf32>
    %c31_94 = arith.constant 31 : index
    %c0_95 = arith.constant 0 : index
    %127 = vector.load %arg17[%c31_94, %c0_95] : memref<32x32xf32, #tpu.memory_space<vmem>>, vector<1x32xf32>
    tpu.vector_store %arg17[%c31_94, %c0_95], %126 {strides = array<i32>} : memref<32x32xf32, #tpu.memory_space<vmem>>, vector<1x32xf32>,
    %c0_96 = arith.constant 0 : index
    %c0_97 = arith.constant 0 : index
    %128 = vector.load %arg17[%c0_96, %c0_97] : memref<32x32xf32, #tpu.memory_space<vmem>>, vector<32x32xf32>
    %cst = arith.constant dense<0.000000e+00> : vector<32xf32>
    %129 = vector.multi_reduction <add>, %128, %cst [1] : vector<32x32xf32> to vector<32xf32>
    %130 = vector.shape_cast %129 : vector<32xf32> to vector<32x1xf32>
    %cst_98 = arith.constant 3.200000e+01 : f32
    %131 = vector.broadcast %cst_98 : f32 to vector<32x1xf32>
    %132 = arith.divf %130, %131 : vector<32x1xf32>
    %133 = vector.broadcast %132 : vector<32x1xf32> to vector<32x32xf32>
    %134 = arith.subf %128, %133 : vector<32x32xf32>
    %135 = arith.mulf %134, %134 : vector<32x32xf32>
    %cst_99 = arith.constant dense<0.000000e+00> : vector<32xf32>
    %136 = vector.multi_reduction <add>, %135, %cst_99 [1] : vector<32x32xf32> to vector<32xf32>
    %137 = vector.shape_cast %136 : vector<32xf32> to vector<32x1xf32>
    %cst_100 = arith.constant 3.200000e+01 : f32
    %138 = vector.broadcast %cst_100 : f32 to vector<32x1xf32>
    %139 = arith.divf %137, %138 : vector<32x1xf32>
    %cst_101 = arith.constant 9.99999974E-6 : f32
    %140 = vector.broadcast %cst_101 : f32 to vector<32x1xf32>
    %141 = arith.addf %139, %140 : vector<32x1xf32>
    %142 = math.rsqrt %141 : vector<32x1xf32>
    %143 = vector.broadcast %142 : vector<32x1xf32> to vector<32x32xf32>
    %144 = arith.mulf %134, %143 : vector<32x32xf32>
    %c0_102 = arith.constant 0 : index
    %c0_103 = arith.constant 0 : index
    %145 = vector.load %arg5[%c0_102, %c0_103] : memref<32x128xf32, #tpu.memory_space<vmem>>, vector<32x128xf32>
    %cst_104 = arith.constant dense<0.000000e+00> : vector<32x128xf32>
    %146 = tpu.matmul %144, %145, %cst_104 {dimension_numbers = #tpu.dot_dimension_numbers<[1], [0], [0], [1], [0, 0, 1, 1], [], []>, precision = #tpu.contract_precision<fp32>} : vector<32x32xf32>, vector<32x128xf32>, vector<32x128xf32> -> vector<32x128xf32>
    %c0_105 = arith.constant 0 : index
    %c0_106 = arith.constant 0 : index
    %147 = vector.load %arg6[%c0_105, %c0_106] : memref<1x128xf32, #tpu.memory_space<vmem>>, vector<1x128xf32>
    %148 = vector.broadcast %147 : vector<1x128xf32> to vector<32x128xf32>
    %149 = arith.addf %146, %148 : vector<32x128xf32>
    %c0_107 = arith.constant 0 : index
    %c0_108 = arith.constant 0 : index
    %150 = vector.load %arg19[%c0_107, %c0_108] : memref<32x128xf32, #tpu.memory_space<vmem>>, vector<32x128xf32>
    tpu.vector_store %arg19[%c0_107, %c0_108], %149 {strides = array<i32>} : memref<32x128xf32, #tpu.memory_space<vmem>>, vector<32x128xf32>,
    %c0_109 = arith.constant 0 : index
    %151 = memref.load %arg2[%c0_109] : memref<40xi32, #tpu.memory_space<smem>>
    %152 = arith.index_cast %151 : i32 to index
    %c0_110 = arith.constant 0 : index
    %153 = vector.load %arg4[%152, %c0_110] : memref<40x32xf32, #tpu.memory_space<vmem>>, vector<1x32xf32>
    %c0_111 = arith.constant 0 : index
    %c0_112 = arith.constant 0 : index
    %154 = vector.load %arg18[%c0_111, %c0_112] : memref<40x32xf32, #tpu.memory_space<vmem>>, vector<1x32xf32>
    tpu.vector_store %arg18[%c0_111, %c0_112], %153 {strides = array<i32>} : memref<40x32xf32, #tpu.memory_space<vmem>>, vector<1x32xf32>,
    %c10_113 = arith.constant 10 : index
    %155 = memref.load %arg2[%c10_113] : memref<40xi32, #tpu.memory_space<smem>>
    %156 = arith.index_cast %155 : i32 to index
    %c0_114 = arith.constant 0 : index
    %157 = vector.load %arg4[%156, %c0_114] : memref<40x32xf32, #tpu.memory_space<vmem>>, vector<1x32xf32>
    %c1_115 = arith.constant 1 : index
    %c0_116 = arith.constant 0 : index
    %158 = vector.load %arg18[%c1_115, %c0_116] : memref<40x32xf32, #tpu.memory_space<vmem>>, vector<1x32xf32>
    tpu.vector_store %arg18[%c1_115, %c0_116], %157 {strides = array<i32>} : memref<40x32xf32, #tpu.memory_space<vmem>>, vector<1x32xf32>,
    %c20_117 = arith.constant 20 : index
    %159 = memref.load %arg2[%c20_117] : memref<40xi32, #tpu.memory_space<smem>>
    %160 = arith.index_cast %159 : i32 to index
    %c0_118 = arith.constant 0 : index
    %161 = vector.load %arg4[%160, %c0_118] : memref<40x32xf32, #tpu.memory_space<vmem>>, vector<1x32xf32>
    %c2_119 = arith.constant 2 : index
    %c0_120 = arith.constant 0 : index
    %162 = vector.load %arg18[%c2_119, %c0_120] : memref<40x32xf32, #tpu.memory_space<vmem>>, vector<1x32xf32>
    tpu.vector_store %arg18[%c2_119, %c0_120], %161 {strides = array<i32>} : memref<40x32xf32, #tpu.memory_space<vmem>>, vector<1x32xf32>,
    %c30_121 = arith.constant 30 : index
    %163 = memref.load %arg2[%c30_121] : memref<40xi32, #tpu.memory_space<smem>>
    %164 = arith.index_cast %163 : i32 to index
    %c0_122 = arith.constant 0 : index
    %165 = vector.load %arg4[%164, %c0_122] : memref<40x32xf32, #tpu.memory_space<vmem>>, vector<1x32xf32>
    %c3_123 = arith.constant 3 : index
    %c0_124 = arith.constant 0 : index
    %166 = vector.load %arg18[%c3_123, %c0_124] : memref<40x32xf32, #tpu.memory_space<vmem>>, vector<1x32xf32>
    tpu.vector_store %arg18[%c3_123, %c0_124], %165 {strides = array<i32>} : memref<40x32xf32, #tpu.memory_space<vmem>>, vector<1x32xf32>,
    %c1_125 = arith.constant 1 : index
    %167 = memref.load %arg2[%c1_125] : memref<40xi32, #tpu.memory_space<smem>>
    %168 = arith.index_cast %167 : i32 to index
    %c0_126 = arith.constant 0 : index
    %169 = vector.load %arg4[%168, %c0_126] : memref<40x32xf32, #tpu.memory_space<vmem>>, vector<1x32xf32>
    %c4_127 = arith.constant 4 : index
    %c0_128 = arith.constant 0 : index
    %170 = vector.load %arg18[%c4_127, %c0_128] : memref<40x32xf32, #tpu.memory_space<vmem>>, vector<1x32xf32>
    tpu.vector_store %arg18[%c4_127, %c0_128], %169 {strides = array<i32>} : memref<40x32xf32, #tpu.memory_space<vmem>>, vector<1x32xf32>,
    %c11_129 = arith.constant 11 : index
    %171 = memref.load %arg2[%c11_129] : memref<40xi32, #tpu.memory_space<smem>>
    %172 = arith.index_cast %171 : i32 to index
    %c0_130 = arith.constant 0 : index
    %173 = vector.load %arg4[%172, %c0_130] : memref<40x32xf32, #tpu.memory_space<vmem>>, vector<1x32xf32>
    %c5_131 = arith.constant 5 : index
    %c0_132 = arith.constant 0 : index
    %174 = vector.load %arg18[%c5_131, %c0_132] : memref<40x32xf32, #tpu.memory_space<vmem>>, vector<1x32xf32>
    tpu.vector_store %arg18[%c5_131, %c0_132], %173 {strides = array<i32>} : memref<40x32xf32, #tpu.memory_space<vmem>>, vector<1x32xf32>,
    %c21_133 = arith.constant 21 : index
    %175 = memref.load %arg2[%c21_133] : memref<40xi32, #tpu.memory_space<smem>>
    %176 = arith.index_cast %175 : i32 to index
    %c0_134 = arith.constant 0 : index
    %177 = vector.load %arg4[%176, %c0_134] : memref<40x32xf32, #tpu.memory_space<vmem>>, vector<1x32xf32>
    %c6_135 = arith.constant 6 : index
    %c0_136 = arith.constant 0 : index
    %178 = vector.load %arg18[%c6_135, %c0_136] : memref<40x32xf32, #tpu.memory_space<vmem>>, vector<1x32xf32>
    tpu.vector_store %arg18[%c6_135, %c0_136], %177 {strides = array<i32>} : memref<40x32xf32, #tpu.memory_space<vmem>>, vector<1x32xf32>,
    %c31_137 = arith.constant 31 : index
    %179 = memref.load %arg2[%c31_137] : memref<40xi32, #tpu.memory_space<smem>>
    %180 = arith.index_cast %179 : i32 to index
    %c0_138 = arith.constant 0 : index
    %181 = vector.load %arg4[%180, %c0_138] : memref<40x32xf32, #tpu.memory_space<vmem>>, vector<1x32xf32>
    %c7_139 = arith.constant 7 : index
    %c0_140 = arith.constant 0 : index
    %182 = vector.load %arg18[%c7_139, %c0_140] : memref<40x32xf32, #tpu.memory_space<vmem>>, vector<1x32xf32>
    tpu.vector_store %arg18[%c7_139, %c0_140], %181 {strides = array<i32>} : memref<40x32xf32, #tpu.memory_space<vmem>>, vector<1x32xf32>,
    %c2_141 = arith.constant 2 : index
    %183 = memref.load %arg2[%c2_141] : memref<40xi32, #tpu.memory_space<smem>>
    %184 = arith.index_cast %183 : i32 to index
    %c0_142 = arith.constant 0 : index
    %185 = vector.load %arg4[%184, %c0_142] : memref<40x32xf32, #tpu.memory_space<vmem>>, vector<1x32xf32>
    %c8_143 = arith.constant 8 : index
    %c0_144 = arith.constant 0 : index
    %186 = vector.load %arg18[%c8_143, %c0_144] : memref<40x32xf32, #tpu.memory_space<vmem>>, vector<1x32xf32>
    tpu.vector_store %arg18[%c8_143, %c0_144], %185 {strides = array<i32>} : memref<40x32xf32, #tpu.memory_space<vmem>>, vector<1x32xf32>,
    %c12_145 = arith.constant 12 : index
    %187 = memref.load %arg2[%c12_145] : memref<40xi32, #tpu.memory_space<smem>>
    %188 = arith.index_cast %187 : i32 to index
    %c0_146 = arith.constant 0 : index
    %189 = vector.load %arg4[%188, %c0_146] : memref<40x32xf32, #tpu.memory_space<vmem>>, vector<1x32xf32>
    %c9_147 = arith.constant 9 : index
    %c0_148 = arith.constant 0 : index
    %190 = vector.load %arg18[%c9_147, %c0_148] : memref<40x32xf32, #tpu.memory_space<vmem>>, vector<1x32xf32>
    tpu.vector_store %arg18[%c9_147, %c0_148], %189 {strides = array<i32>} : memref<40x32xf32, #tpu.memory_space<vmem>>, vector<1x32xf32>,
    %c22_149 = arith.constant 22 : index
    %191 = memref.load %arg2[%c22_149] : memref<40xi32, #tpu.memory_space<smem>>
    %192 = arith.index_cast %191 : i32 to index
    %c0_150 = arith.constant 0 : index
    %193 = vector.load %arg4[%192, %c0_150] : memref<40x32xf32, #tpu.memory_space<vmem>>, vector<1x32xf32>
    %c10_151 = arith.constant 10 : index
    %c0_152 = arith.constant 0 : index
    %194 = vector.load %arg18[%c10_151, %c0_152] : memref<40x32xf32, #tpu.memory_space<vmem>>, vector<1x32xf32>
    tpu.vector_store %arg18[%c10_151, %c0_152], %193 {strides = array<i32>} : memref<40x32xf32, #tpu.memory_space<vmem>>, vector<1x32xf32>,
    %c32 = arith.constant 32 : index
    %195 = memref.load %arg2[%c32] : memref<40xi32, #tpu.memory_space<smem>>
    %196 = arith.index_cast %195 : i32 to index
    %c0_153 = arith.constant 0 : index
    %197 = vector.load %arg4[%196, %c0_153] : memref<40x32xf32, #tpu.memory_space<vmem>>, vector<1x32xf32>
    %c11_154 = arith.constant 11 : index
    %c0_155 = arith.constant 0 : index
    %198 = vector.load %arg18[%c11_154, %c0_155] : memref<40x32xf32, #tpu.memory_space<vmem>>, vector<1x32xf32>
    tpu.vector_store %arg18[%c11_154, %c0_155], %197 {strides = array<i32>} : memref<40x32xf32, #tpu.memory_space<vmem>>, vector<1x32xf32>,
    %c3_156 = arith.constant 3 : index
    %199 = memref.load %arg2[%c3_156] : memref<40xi32, #tpu.memory_space<smem>>
    %200 = arith.index_cast %199 : i32 to index
    %c0_157 = arith.constant 0 : index
    %201 = vector.load %arg4[%200, %c0_157] : memref<40x32xf32, #tpu.memory_space<vmem>>, vector<1x32xf32>
    %c12_158 = arith.constant 12 : index
    %c0_159 = arith.constant 0 : index
    %202 = vector.load %arg18[%c12_158, %c0_159] : memref<40x32xf32, #tpu.memory_space<vmem>>, vector<1x32xf32>
    tpu.vector_store %arg18[%c12_158, %c0_159], %201 {strides = array<i32>} : memref<40x32xf32, #tpu.memory_space<vmem>>, vector<1x32xf32>,
    %c13_160 = arith.constant 13 : index
    %203 = memref.load %arg2[%c13_160] : memref<40xi32, #tpu.memory_space<smem>>
    %204 = arith.index_cast %203 : i32 to index
    %c0_161 = arith.constant 0 : index
    %205 = vector.load %arg4[%204, %c0_161] : memref<40x32xf32, #tpu.memory_space<vmem>>, vector<1x32xf32>
    %c13_162 = arith.constant 13 : index
    %c0_163 = arith.constant 0 : index
    %206 = vector.load %arg18[%c13_162, %c0_163] : memref<40x32xf32, #tpu.memory_space<vmem>>, vector<1x32xf32>
    tpu.vector_store %arg18[%c13_162, %c0_163], %205 {strides = array<i32>} : memref<40x32xf32, #tpu.memory_space<vmem>>, vector<1x32xf32>,
    %c23_164 = arith.constant 23 : index
    %207 = memref.load %arg2[%c23_164] : memref<40xi32, #tpu.memory_space<smem>>
    %208 = arith.index_cast %207 : i32 to index
    %c0_165 = arith.constant 0 : index
    %209 = vector.load %arg4[%208, %c0_165] : memref<40x32xf32, #tpu.memory_space<vmem>>, vector<1x32xf32>
    %c14_166 = arith.constant 14 : index
    %c0_167 = arith.constant 0 : index
    %210 = vector.load %arg18[%c14_166, %c0_167] : memref<40x32xf32, #tpu.memory_space<vmem>>, vector<1x32xf32>
    tpu.vector_store %arg18[%c14_166, %c0_167], %209 {strides = array<i32>} : memref<40x32xf32, #tpu.memory_space<vmem>>, vector<1x32xf32>,
    %c33 = arith.constant 33 : index
    %211 = memref.load %arg2[%c33] : memref<40xi32, #tpu.memory_space<smem>>
    %212 = arith.index_cast %211 : i32 to index
    %c0_168 = arith.constant 0 : index
    %213 = vector.load %arg4[%212, %c0_168] : memref<40x32xf32, #tpu.memory_space<vmem>>, vector<1x32xf32>
    %c15_169 = arith.constant 15 : index
    %c0_170 = arith.constant 0 : index
    %214 = vector.load %arg18[%c15_169, %c0_170] : memref<40x32xf32, #tpu.memory_space<vmem>>, vector<1x32xf32>
    tpu.vector_store %arg18[%c15_169, %c0_170], %213 {strides = array<i32>} : memref<40x32xf32, #tpu.memory_space<vmem>>, vector<1x32xf32>,
    %c4_171 = arith.constant 4 : index
    %215 = memref.load %arg2[%c4_171] : memref<40xi32, #tpu.memory_space<smem>>
    %216 = arith.index_cast %215 : i32 to index
    %c0_172 = arith.constant 0 : index
    %217 = vector.load %arg4[%216, %c0_172] : memref<40x32xf32, #tpu.memory_space<vmem>>, vector<1x32xf32>
    %c16_173 = arith.constant 16 : index
    %c0_174 = arith.constant 0 : index
    %218 = vector.load %arg18[%c16_173, %c0_174] : memref<40x32xf32, #tpu.memory_space<vmem>>, vector<1x32xf32>
    tpu.vector_store %arg18[%c16_173, %c0_174], %217 {strides = array<i32>} : memref<40x32xf32, #tpu.memory_space<vmem>>, vector<1x32xf32>,
    %c14_175 = arith.constant 14 : index
    %219 = memref.load %arg2[%c14_175] : memref<40xi32, #tpu.memory_space<smem>>
    %220 = arith.index_cast %219 : i32 to index
    %c0_176 = arith.constant 0 : index
    %221 = vector.load %arg4[%220, %c0_176] : memref<40x32xf32, #tpu.memory_space<vmem>>, vector<1x32xf32>
    %c17_177 = arith.constant 17 : index
    %c0_178 = arith.constant 0 : index
    %222 = vector.load %arg18[%c17_177, %c0_178] : memref<40x32xf32, #tpu.memory_space<vmem>>, vector<1x32xf32>
    tpu.vector_store %arg18[%c17_177, %c0_178], %221 {strides = array<i32>} : memref<40x32xf32, #tpu.memory_space<vmem>>, vector<1x32xf32>,
    %c24_179 = arith.constant 24 : index
    %223 = memref.load %arg2[%c24_179] : memref<40xi32, #tpu.memory_space<smem>>
    %224 = arith.index_cast %223 : i32 to index
    %c0_180 = arith.constant 0 : index
    %225 = vector.load %arg4[%224, %c0_180] : memref<40x32xf32, #tpu.memory_space<vmem>>, vector<1x32xf32>
    %c18_181 = arith.constant 18 : index
    %c0_182 = arith.constant 0 : index
    %226 = vector.load %arg18[%c18_181, %c0_182] : memref<40x32xf32, #tpu.memory_space<vmem>>, vector<1x32xf32>
    tpu.vector_store %arg18[%c18_181, %c0_182], %225 {strides = array<i32>} : memref<40x32xf32, #tpu.memory_space<vmem>>, vector<1x32xf32>,
    %c34 = arith.constant 34 : index
    %227 = memref.load %arg2[%c34] : memref<40xi32, #tpu.memory_space<smem>>
    %228 = arith.index_cast %227 : i32 to index
    %c0_183 = arith.constant 0 : index
    %229 = vector.load %arg4[%228, %c0_183] : memref<40x32xf32, #tpu.memory_space<vmem>>, vector<1x32xf32>
    %c19_184 = arith.constant 19 : index
    %c0_185 = arith.constant 0 : index
    %230 = vector.load %arg18[%c19_184, %c0_185] : memref<40x32xf32, #tpu.memory_space<vmem>>, vector<1x32xf32>
    tpu.vector_store %arg18[%c19_184, %c0_185], %229 {strides = array<i32>} : memref<40x32xf32, #tpu.memory_space<vmem>>, vector<1x32xf32>,
    %c5_186 = arith.constant 5 : index
    %231 = memref.load %arg2[%c5_186] : memref<40xi32, #tpu.memory_space<smem>>
    %232 = arith.index_cast %231 : i32 to index
    %c0_187 = arith.constant 0 : index
    %233 = vector.load %arg4[%232, %c0_187] : memref<40x32xf32, #tpu.memory_space<vmem>>, vector<1x32xf32>
    %c20_188 = arith.constant 20 : index
    %c0_189 = arith.constant 0 : index
    %234 = vector.load %arg18[%c20_188, %c0_189] : memref<40x32xf32, #tpu.memory_space<vmem>>, vector<1x32xf32>
    tpu.vector_store %arg18[%c20_188, %c0_189], %233 {strides = array<i32>} : memref<40x32xf32, #tpu.memory_space<vmem>>, vector<1x32xf32>,
    %c15_190 = arith.constant 15 : index
    %235 = memref.load %arg2[%c15_190] : memref<40xi32, #tpu.memory_space<smem>>
    %236 = arith.index_cast %235 : i32 to index
    %c0_191 = arith.constant 0 : index
    %237 = vector.load %arg4[%236, %c0_191] : memref<40x32xf32, #tpu.memory_space<vmem>>, vector<1x32xf32>
    %c21_192 = arith.constant 21 : index
    %c0_193 = arith.constant 0 : index
    %238 = vector.load %arg18[%c21_192, %c0_193] : memref<40x32xf32, #tpu.memory_space<vmem>>, vector<1x32xf32>
    tpu.vector_store %arg18[%c21_192, %c0_193], %237 {strides = array<i32>} : memref<40x32xf32, #tpu.memory_space<vmem>>, vector<1x32xf32>,
    %c25_194 = arith.constant 25 : index
    %239 = memref.load %arg2[%c25_194] : memref<40xi32, #tpu.memory_space<smem>>
    %240 = arith.index_cast %239 : i32 to index
    %c0_195 = arith.constant 0 : index
    %241 = vector.load %arg4[%240, %c0_195] : memref<40x32xf32, #tpu.memory_space<vmem>>, vector<1x32xf32>
    %c22_196 = arith.constant 22 : index
    %c0_197 = arith.constant 0 : index
    %242 = vector.load %arg18[%c22_196, %c0_197] : memref<40x32xf32, #tpu.memory_space<vmem>>, vector<1x32xf32>
    tpu.vector_store %arg18[%c22_196, %c0_197], %241 {strides = array<i32>} : memref<40x32xf32, #tpu.memory_space<vmem>>, vector<1x32xf32>,
    %c35 = arith.constant 35 : index
    %243 = memref.load %arg2[%c35] : memref<40xi32, #tpu.memory_space<smem>>
    %244 = arith.index_cast %243 : i32 to index
    %c0_198 = arith.constant 0 : index
    %245 = vector.load %arg4[%244, %c0_198] : memref<40x32xf32, #tpu.memory_space<vmem>>, vector<1x32xf32>
    %c23_199 = arith.constant 23 : index
    %c0_200 = arith.constant 0 : index
    %246 = vector.load %arg18[%c23_199, %c0_200] : memref<40x32xf32, #tpu.memory_space<vmem>>, vector<1x32xf32>
    tpu.vector_store %arg18[%c23_199, %c0_200], %245 {strides = array<i32>} : memref<40x32xf32, #tpu.memory_space<vmem>>, vector<1x32xf32>,
    %c6_201 = arith.constant 6 : index
    %247 = memref.load %arg2[%c6_201] : memref<40xi32, #tpu.memory_space<smem>>
    %248 = arith.index_cast %247 : i32 to index
    %c0_202 = arith.constant 0 : index
    %249 = vector.load %arg4[%248, %c0_202] : memref<40x32xf32, #tpu.memory_space<vmem>>, vector<1x32xf32>
    %c24_203 = arith.constant 24 : index
    %c0_204 = arith.constant 0 : index
    %250 = vector.load %arg18[%c24_203, %c0_204] : memref<40x32xf32, #tpu.memory_space<vmem>>, vector<1x32xf32>
    tpu.vector_store %arg18[%c24_203, %c0_204], %249 {strides = array<i32>} : memref<40x32xf32, #tpu.memory_space<vmem>>, vector<1x32xf32>,
    %c16_205 = arith.constant 16 : index
    %251 = memref.load %arg2[%c16_205] : memref<40xi32, #tpu.memory_space<smem>>
    %252 = arith.index_cast %251 : i32 to index
    %c0_206 = arith.constant 0 : index
    %253 = vector.load %arg4[%252, %c0_206] : memref<40x32xf32, #tpu.memory_space<vmem>>, vector<1x32xf32>
    %c25_207 = arith.constant 25 : index
    %c0_208 = arith.constant 0 : index
    %254 = vector.load %arg18[%c25_207, %c0_208] : memref<40x32xf32, #tpu.memory_space<vmem>>, vector<1x32xf32>
    tpu.vector_store %arg18[%c25_207, %c0_208], %253 {strides = array<i32>} : memref<40x32xf32, #tpu.memory_space<vmem>>, vector<1x32xf32>,
    %c26_209 = arith.constant 26 : index
    %255 = memref.load %arg2[%c26_209] : memref<40xi32, #tpu.memory_space<smem>>
    %256 = arith.index_cast %255 : i32 to index
    %c0_210 = arith.constant 0 : index
    %257 = vector.load %arg4[%256, %c0_210] : memref<40x32xf32, #tpu.memory_space<vmem>>, vector<1x32xf32>
    %c26_211 = arith.constant 26 : index
    %c0_212 = arith.constant 0 : index
    %258 = vector.load %arg18[%c26_211, %c0_212] : memref<40x32xf32, #tpu.memory_space<vmem>>, vector<1x32xf32>
    tpu.vector_store %arg18[%c26_211, %c0_212], %257 {strides = array<i32>} : memref<40x32xf32, #tpu.memory_space<vmem>>, vector<1x32xf32>,
    %c36 = arith.constant 36 : index
    %259 = memref.load %arg2[%c36] : memref<40xi32, #tpu.memory_space<smem>>
    %260 = arith.index_cast %259 : i32 to index
    %c0_213 = arith.constant 0 : index
    %261 = vector.load %arg4[%260, %c0_213] : memref<40x32xf32, #tpu.memory_space<vmem>>, vector<1x32xf32>
    %c27_214 = arith.constant 27 : index
    %c0_215 = arith.constant 0 : index
    %262 = vector.load %arg18[%c27_214, %c0_215] : memref<40x32xf32, #tpu.memory_space<vmem>>, vector<1x32xf32>
    tpu.vector_store %arg18[%c27_214, %c0_215], %261 {strides = array<i32>} : memref<40x32xf32, #tpu.memory_space<vmem>>, vector<1x32xf32>,
    %c7_216 = arith.constant 7 : index
    %263 = memref.load %arg2[%c7_216] : memref<40xi32, #tpu.memory_space<smem>>
    %264 = arith.index_cast %263 : i32 to index
    %c0_217 = arith.constant 0 : index
    %265 = vector.load %arg4[%264, %c0_217] : memref<40x32xf32, #tpu.memory_space<vmem>>, vector<1x32xf32>
    %c28_218 = arith.constant 28 : index
    %c0_219 = arith.constant 0 : index
    %266 = vector.load %arg18[%c28_218, %c0_219] : memref<40x32xf32, #tpu.memory_space<vmem>>, vector<1x32xf32>
    tpu.vector_store %arg18[%c28_218, %c0_219], %265 {strides = array<i32>} : memref<40x32xf32, #tpu.memory_space<vmem>>, vector<1x32xf32>,
    %c17_220 = arith.constant 17 : index
    %267 = memref.load %arg2[%c17_220] : memref<40xi32, #tpu.memory_space<smem>>
    %268 = arith.index_cast %267 : i32 to index
    %c0_221 = arith.constant 0 : index
    %269 = vector.load %arg4[%268, %c0_221] : memref<40x32xf32, #tpu.memory_space<vmem>>, vector<1x32xf32>
    %c29_222 = arith.constant 29 : index
    %c0_223 = arith.constant 0 : index
    %270 = vector.load %arg18[%c29_222, %c0_223] : memref<40x32xf32, #tpu.memory_space<vmem>>, vector<1x32xf32>
    tpu.vector_store %arg18[%c29_222, %c0_223], %269 {strides = array<i32>} : memref<40x32xf32, #tpu.memory_space<vmem>>, vector<1x32xf32>,
    %c27_224 = arith.constant 27 : index
    %271 = memref.load %arg2[%c27_224] : memref<40xi32, #tpu.memory_space<smem>>
    %272 = arith.index_cast %271 : i32 to index
    %c0_225 = arith.constant 0 : index
    %273 = vector.load %arg4[%272, %c0_225] : memref<40x32xf32, #tpu.memory_space<vmem>>, vector<1x32xf32>
    %c30_226 = arith.constant 30 : index
    %c0_227 = arith.constant 0 : index
    %274 = vector.load %arg18[%c30_226, %c0_227] : memref<40x32xf32, #tpu.memory_space<vmem>>, vector<1x32xf32>
    tpu.vector_store %arg18[%c30_226, %c0_227], %273 {strides = array<i32>} : memref<40x32xf32, #tpu.memory_space<vmem>>, vector<1x32xf32>,
    %c37 = arith.constant 37 : index
    %275 = memref.load %arg2[%c37] : memref<40xi32, #tpu.memory_space<smem>>
    %276 = arith.index_cast %275 : i32 to index
    %c0_228 = arith.constant 0 : index
    %277 = vector.load %arg4[%276, %c0_228] : memref<40x32xf32, #tpu.memory_space<vmem>>, vector<1x32xf32>
    %c31_229 = arith.constant 31 : index
    %c0_230 = arith.constant 0 : index
    %278 = vector.load %arg18[%c31_229, %c0_230] : memref<40x32xf32, #tpu.memory_space<vmem>>, vector<1x32xf32>
    tpu.vector_store %arg18[%c31_229, %c0_230], %277 {strides = array<i32>} : memref<40x32xf32, #tpu.memory_space<vmem>>, vector<1x32xf32>,
    %c8_231 = arith.constant 8 : index
    %279 = memref.load %arg2[%c8_231] : memref<40xi32, #tpu.memory_space<smem>>
    %280 = arith.index_cast %279 : i32 to index
    %c0_232 = arith.constant 0 : index
    %281 = vector.load %arg4[%280, %c0_232] : memref<40x32xf32, #tpu.memory_space<vmem>>, vector<1x32xf32>
    %c32_233 = arith.constant 32 : index
    %c0_234 = arith.constant 0 : index
    %282 = vector.load %arg18[%c32_233, %c0_234] : memref<40x32xf32, #tpu.memory_space<vmem>>, vector<1x32xf32>
    tpu.vector_store %arg18[%c32_233, %c0_234], %281 {strides = array<i32>} : memref<40x32xf32, #tpu.memory_space<vmem>>, vector<1x32xf32>,
    %c18_235 = arith.constant 18 : index
    %283 = memref.load %arg2[%c18_235] : memref<40xi32, #tpu.memory_space<smem>>
    %284 = arith.index_cast %283 : i32 to index
    %c0_236 = arith.constant 0 : index
    %285 = vector.load %arg4[%284, %c0_236] : memref<40x32xf32, #tpu.memory_space<vmem>>, vector<1x32xf32>
    %c33_237 = arith.constant 33 : index
    %c0_238 = arith.constant 0 : index
    %286 = vector.load %arg18[%c33_237, %c0_238] : memref<40x32xf32, #tpu.memory_space<vmem>>, vector<1x32xf32>
    tpu.vector_store %arg18[%c33_237, %c0_238], %285 {strides = array<i32>} : memref<40x32xf32, #tpu.memory_space<vmem>>, vector<1x32xf32>,
    %c28_239 = arith.constant 28 : index
    %287 = memref.load %arg2[%c28_239] : memref<40xi32, #tpu.memory_space<smem>>
    %288 = arith.index_cast %287 : i32 to index
    %c0_240 = arith.constant 0 : index
    %289 = vector.load %arg4[%288, %c0_240] : memref<40x32xf32, #tpu.memory_space<vmem>>, vector<1x32xf32>
    %c34_241 = arith.constant 34 : index
    %c0_242 = arith.constant 0 : index
    %290 = vector.load %arg18[%c34_241, %c0_242] : memref<40x32xf32, #tpu.memory_space<vmem>>, vector<1x32xf32>
    tpu.vector_store %arg18[%c34_241, %c0_242], %289 {strides = array<i32>} : memref<40x32xf32, #tpu.memory_space<vmem>>, vector<1x32xf32>,
    %c38 = arith.constant 38 : index
    %291 = memref.load %arg2[%c38] : memref<40xi32, #tpu.memory_space<smem>>
    %292 = arith.index_cast %291 : i32 to index
    %c0_243 = arith.constant 0 : index
    %293 = vector.load %arg4[%292, %c0_243] : memref<40x32xf32, #tpu.memory_space<vmem>>, vector<1x32xf32>
    %c35_244 = arith.constant 35 : index
    %c0_245 = arith.constant 0 : index
    %294 = vector.load %arg18[%c35_244, %c0_245] : memref<40x32xf32, #tpu.memory_space<vmem>>, vector<1x32xf32>
    tpu.vector_store %arg18[%c35_244, %c0_245], %293 {strides = array<i32>} : memref<40x32xf32, #tpu.memory_space<vmem>>, vector<1x32xf32>,
    %c9_246 = arith.constant 9 : index
    %295 = memref.load %arg2[%c9_246] : memref<40xi32, #tpu.memory_space<smem>>
    %296 = arith.index_cast %295 : i32 to index
    %c0_247 = arith.constant 0 : index
    %297 = vector.load %arg4[%296, %c0_247] : memref<40x32xf32, #tpu.memory_space<vmem>>, vector<1x32xf32>
    %c36_248 = arith.constant 36 : index
    %c0_249 = arith.constant 0 : index
    %298 = vector.load %arg18[%c36_248, %c0_249] : memref<40x32xf32, #tpu.memory_space<vmem>>, vector<1x32xf32>
    tpu.vector_store %arg18[%c36_248, %c0_249], %297 {strides = array<i32>} : memref<40x32xf32, #tpu.memory_space<vmem>>, vector<1x32xf32>,
    %c19_250 = arith.constant 19 : index
    %299 = memref.load %arg2[%c19_250] : memref<40xi32, #tpu.memory_space<smem>>
    %300 = arith.index_cast %299 : i32 to index
    %c0_251 = arith.constant 0 : index
    %301 = vector.load %arg4[%300, %c0_251] : memref<40x32xf32, #tpu.memory_space<vmem>>, vector<1x32xf32>
    %c37_252 = arith.constant 37 : index
    %c0_253 = arith.constant 0 : index
    %302 = vector.load %arg18[%c37_252, %c0_253] : memref<40x32xf32, #tpu.memory_space<vmem>>, vector<1x32xf32>
    tpu.vector_store %arg18[%c37_252, %c0_253], %301 {strides = array<i32>} : memref<40x32xf32, #tpu.memory_space<vmem>>, vector<1x32xf32>,
    %c29_254 = arith.constant 29 : index
    %303 = memref.load %arg2[%c29_254] : memref<40xi32, #tpu.memory_space<smem>>
    %304 = arith.index_cast %303 : i32 to index
    %c0_255 = arith.constant 0 : index
    %305 = vector.load %arg4[%304, %c0_255] : memref<40x32xf32, #tpu.memory_space<vmem>>, vector<1x32xf32>
    %c38_256 = arith.constant 38 : index
    %c0_257 = arith.constant 0 : index
    %306 = vector.load %arg18[%c38_256, %c0_257] : memref<40x32xf32, #tpu.memory_space<vmem>>, vector<1x32xf32>
    tpu.vector_store %arg18[%c38_256, %c0_257], %305 {strides = array<i32>} : memref<40x32xf32, #tpu.memory_space<vmem>>, vector<1x32xf32>,
    %c39 = arith.constant 39 : index
    %307 = memref.load %arg2[%c39] : memref<40xi32, #tpu.memory_space<smem>>
    %308 = arith.index_cast %307 : i32 to index
    %c0_258 = arith.constant 0 : index
    %309 = vector.load %arg4[%308, %c0_258] : memref<40x32xf32, #tpu.memory_space<vmem>>, vector<1x32xf32>
    %c39_259 = arith.constant 39 : index
    %c0_260 = arith.constant 0 : index
    %310 = vector.load %arg18[%c39_259, %c0_260] : memref<40x32xf32, #tpu.memory_space<vmem>>, vector<1x32xf32>
    tpu.vector_store %arg18[%c39_259, %c0_260], %309 {strides = array<i32>} : memref<40x32xf32, #tpu.memory_space<vmem>>, vector<1x32xf32>,
    %c0_261 = arith.constant 0 : index
    %c0_262 = arith.constant 0 : index
    %311 = vector.load %arg18[%c0_261, %c0_262] : memref<40x32xf32, #tpu.memory_space<vmem>>, vector<40x32xf32>
    %cst_263 = arith.constant dense<0.000000e+00> : vector<40xf32>
    %312 = vector.multi_reduction <add>, %311, %cst_263 [1] : vector<40x32xf32> to vector<40xf32>
    %313 = vector.shape_cast %312 : vector<40xf32> to vector<40x1xf32>
    %cst_264 = arith.constant 3.200000e+01 : f32
    %314 = vector.broadcast %cst_264 : f32 to vector<40x1xf32>
    %315 = arith.divf %313, %314 : vector<40x1xf32>
    %316 = vector.broadcast %315 : vector<40x1xf32> to vector<40x32xf32>
    %317 = arith.subf %311, %316 : vector<40x32xf32>
    %318 = arith.mulf %317, %317 : vector<40x32xf32>
    %cst_265 = arith.constant dense<0.000000e+00> : vector<40xf32>
    %319 = vector.multi_reduction <add>, %318, %cst_265 [1] : vector<40x32xf32> to vector<40xf32>
    %320 = vector.shape_cast %319 : vector<40xf32> to vector<40x1xf32>
    %cst_266 = arith.constant 3.200000e+01 : f32
    %321 = vector.broadcast %cst_266 : f32 to vector<40x1xf32>
    %322 = arith.divf %320, %321 : vector<40x1xf32>
    %cst_267 = arith.constant 9.99999974E-6 : f32
    %323 = vector.broadcast %cst_267 : f32 to vector<40x1xf32>
    %324 = arith.addf %322, %323 : vector<40x1xf32>
    %325 = math.rsqrt %324 : vector<40x1xf32>
    %326 = vector.broadcast %325 : vector<40x1xf32> to vector<40x32xf32>
    %327 = arith.mulf %317, %326 : vector<40x32xf32>
    %c0_268 = arith.constant 0 : index
    %c0_269 = arith.constant 0 : index
    %328 = vector.load %arg9[%c0_268, %c0_269] : memref<32x128xf32, #tpu.memory_space<vmem>>, vector<32x128xf32>
    %cst_270 = arith.constant dense<0.000000e+00> : vector<40x128xf32>
    %329 = tpu.matmul %327, %328, %cst_270 {dimension_numbers = #tpu.dot_dimension_numbers<[1], [0], [0], [1], [0, 0, 1, 1], [], []>, precision = #tpu.contract_precision<fp32>} : vector<40x32xf32>, vector<32x128xf32>, vector<40x128xf32> -> vector<40x128xf32>
    %c0_271 = arith.constant 0 : index
    %c0_272 = arith.constant 0 : index
    %330 = vector.load %arg10[%c0_271, %c0_272] : memref<1x128xf32, #tpu.memory_space<vmem>>, vector<1x128xf32>
    %331 = vector.broadcast %330 : vector<1x128xf32> to vector<40x128xf32>
    %332 = arith.addf %329, %331 : vector<40x128xf32>
    %c0_273 = arith.constant 0 : index
    %c0_274 = arith.constant 0 : index
    %333 = vector.load %arg20[%c0_273, %c0_274] : memref<40x128xf32, #tpu.memory_space<vmem>>, vector<40x128xf32>
    tpu.vector_store %arg20[%c0_273, %c0_274], %332 {strides = array<i32>} : memref<40x128xf32, #tpu.memory_space<vmem>>, vector<40x128xf32>,
    %c0_275 = arith.constant 0 : index
    %c0_276 = arith.constant 0 : index
    %334 = vector.load %arg7[%c0_275, %c0_276] : memref<32x128xf32, #tpu.memory_space<vmem>>, vector<32x128xf32>
    %c0_277 = arith.constant 0 : index
    %c0_278 = arith.constant 0 : index
    %335 = vector.load %arg8[%c0_277, %c0_278] : memref<1x128xf32, #tpu.memory_space<vmem>>, vector<1x128xf32>
    %c0_279 = arith.constant 0 : index
    %c0_280 = arith.constant 0 : index
    %336 = vector.load %arg11[%c0_279, %c0_280] : memref<32x128xf32, #tpu.memory_space<vmem>>, vector<32x128xf32>
    %c0_281 = arith.constant 0 : index
    %c0_282 = arith.constant 0 : index
    %337 = vector.load %arg12[%c0_281, %c0_282] : memref<1x128xf32, #tpu.memory_space<vmem>>, vector<1x128xf32>
    %cst_283 = arith.constant 0.000000e+00 : f32
    %338 = vector.broadcast %cst_283 : f32 to vector<4x32xf32>
    %c0_i32 = arith.constant 0 : i32
    %c7_i32 = arith.constant 7 : i32
    %339 = arith.minsi %c0_i32, %c7_i32 : i32
    %c4_i32 = arith.constant 4 : i32
    %340 = arith.muli %339, %c4_i32 : i32
    %341 = arith.index_cast %340 : i32 to index
    %c0_284 = arith.constant 0 : index
    %342 = vector.load %arg19[%341, %c0_284] : memref<32x128xf32, #tpu.memory_space<vmem>>, vector<4x128xf32>
    %cst_285 = arith.constant dense<0.000000e+00> : vector<4x128xf32>
    %343 = tpu.matmul %338, %334, %cst_285 {dimension_numbers = #tpu.dot_dimension_numbers<[1], [0], [0], [1], [0, 0, 1, 1], [], []>, precision = #tpu.contract_precision<fp32>} : vector<4x32xf32>, vector<32x128xf32>, vector<4x128xf32> -> vector<4x128xf32>
    %344 = vector.broadcast %335 : vector<1x128xf32> to vector<4x128xf32>
    %345 = arith.addf %343, %344 : vector<4x128xf32>
    %346 = vector.extract_strided_slice %342 {offsets = [0, 0], sizes = [4, 32], strides = [1, 1]} : vector<4x128xf32> to vector<4x32xf32>
    %347 = vector.extract_strided_slice %345 {offsets = [0, 0], sizes = [4, 32], strides = [1, 1]} : vector<4x128xf32> to vector<4x32xf32>
    %348 = arith.addf %346, %347 : vector<4x32xf32>
    %349 = arith.negf %348 : vector<4x32xf32>
    %350 = math.exp %349 : vector<4x32xf32>
    %cst_286 = arith.constant 1.000000e+00 : f32
    %351 = vector.broadcast %cst_286 : f32 to vector<4x32xf32>
    %352 = arith.addf %351, %350 : vector<4x32xf32>
    %353 = arith.divf %351, %352 : vector<4x32xf32>
    %354 = vector.extract_strided_slice %342 {offsets = [0, 32], sizes = [4, 32], strides = [1, 1]} : vector<4x128xf32> to vector<4x32xf32>
    %355 = vector.extract_strided_slice %345 {offsets = [0, 32], sizes = [4, 32], strides = [1, 1]} : vector<4x128xf32> to vector<4x32xf32>
    %356 = arith.addf %354, %355 : vector<4x32xf32>
    %357 = arith.negf %356 : vector<4x32xf32>
    %358 = math.exp %357 : vector<4x32xf32>
    %cst_287 = arith.constant 1.000000e+00 : f32
    %359 = vector.broadcast %cst_287 : f32 to vector<4x32xf32>
    %360 = arith.addf %359, %358 : vector<4x32xf32>
    %361 = arith.divf %359, %360 : vector<4x32xf32>
    %362 = vector.extract_strided_slice %342 {offsets = [0, 64], sizes = [4, 32], strides = [1, 1]} : vector<4x128xf32> to vector<4x32xf32>
    %363 = vector.extract_strided_slice %345 {offsets = [0, 64], sizes = [4, 32], strides = [1, 1]} : vector<4x128xf32> to vector<4x32xf32>
    %364 = arith.mulf %353, %363 : vector<4x32xf32>
    %365 = arith.addf %362, %364 : vector<4x32xf32>
    %366 = math.tanh %365 : vector<4x32xf32>
    %cst_288 = arith.constant 1.000000e+00 : f32
    %367 = vector.broadcast %cst_288 : f32 to vector<4x32xf32>
    %368 = arith.subf %367, %361 : vector<4x32xf32>
    %369 = arith.mulf %368, %366 : vector<4x32xf32>
    %370 = arith.mulf %361, %338 : vector<4x32xf32>
    %371 = arith.addf %369, %370 : vector<4x32xf32>
    %c8_i32 = arith.constant 8 : i32
    %372 = arith.cmpi slt, %c0_i32, %c8_i32 : i32
    %373 = arith.select %372, %371, %338 : vector<4x32xf32>
    %c4_i32_289 = arith.constant 4 : i32
    %374 = arith.muli %c0_i32, %c4_i32_289 : i32
    %375 = arith.index_cast %374 : i32 to index
    %c0_290 = arith.constant 0 : index
    %376 = vector.load %arg20[%375, %c0_290] : memref<40x128xf32, #tpu.memory_space<vmem>>, vector<4x128xf32>
    %cst_291 = arith.constant dense<0.000000e+00> : vector<4x128xf32>
    %377 = tpu.matmul %338, %336, %cst_291 {dimension_numbers = #tpu.dot_dimension_numbers<[1], [0], [0], [1], [0, 0, 1, 1], [], []>, precision = #tpu.contract_precision<fp32>} : vector<4x32xf32>, vector<32x128xf32>, vector<4x128xf32> -> vector<4x128xf32>
    %378 = vector.broadcast %337 : vector<1x128xf32> to vector<4x128xf32>
    %379 = arith.addf %377, %378 : vector<4x128xf32>
    %380 = vector.extract_strided_slice %376 {offsets = [0, 0], sizes = [4, 32], strides = [1, 1]} : vector<4x128xf32> to vector<4x32xf32>
    %381 = vector.extract_strided_slice %379 {offsets = [0, 0], sizes = [4, 32], strides = [1, 1]} : vector<4x128xf32> to vector<4x32xf32>
    %382 = arith.addf %380, %381 : vector<4x32xf32>
    %383 = arith.negf %382 : vector<4x32xf32>
    %384 = math.exp %383 : vector<4x32xf32>
    %cst_292 = arith.constant 1.000000e+00 : f32
    %385 = vector.broadcast %cst_292 : f32 to vector<4x32xf32>
    %386 = arith.addf %385, %384 : vector<4x32xf32>
    %387 = arith.divf %385, %386 : vector<4x32xf32>
    %388 = vector.extract_strided_slice %376 {offsets = [0, 32], sizes = [4, 32], strides = [1, 1]} : vector<4x128xf32> to vector<4x32xf32>
    %389 = vector.extract_strided_slice %379 {offsets = [0, 32], sizes = [4, 32], strides = [1, 1]} : vector<4x128xf32> to vector<4x32xf32>
    %390 = arith.addf %388, %389 : vector<4x32xf32>
    %391 = arith.negf %390 : vector<4x32xf32>
    %392 = math.exp %391 : vector<4x32xf32>
    %cst_293 = arith.constant 1.000000e+00 : f32
    %393 = vector.broadcast %cst_293 : f32 to vector<4x32xf32>
    %394 = arith.addf %393, %392 : vector<4x32xf32>
    %395 = arith.divf %393, %394 : vector<4x32xf32>
    %396 = vector.extract_strided_slice %376 {offsets = [0, 64], sizes = [4, 32], strides = [1, 1]} : vector<4x128xf32> to vector<4x32xf32>
    %397 = vector.extract_strided_slice %379 {offsets = [0, 64], sizes = [4, 32], strides = [1, 1]} : vector<4x128xf32> to vector<4x32xf32>
    %398 = arith.mulf %387, %397 : vector<4x32xf32>
    %399 = arith.addf %396, %398 : vector<4x32xf32>
    %400 = math.tanh %399 : vector<4x32xf32>
    %cst_294 = arith.constant 1.000000e+00 : f32
    %401 = vector.broadcast %cst_294 : f32 to vector<4x32xf32>
    %402 = arith.subf %401, %395 : vector<4x32xf32>
    %403 = arith.mulf %402, %400 : vector<4x32xf32>
    %404 = arith.mulf %395, %338 : vector<4x32xf32>
    %405 = arith.addf %403, %404 : vector<4x32xf32>
    %c1_i32 = arith.constant 1 : i32
    %c7_i32_295 = arith.constant 7 : i32
    %406 = arith.minsi %c1_i32, %c7_i32_295 : i32
    %c4_i32_296 = arith.constant 4 : i32
    %407 = arith.muli %406, %c4_i32_296 : i32
    %408 = arith.index_cast %407 : i32 to index
    %c0_297 = arith.constant 0 : index
    %409 = vector.load %arg19[%408, %c0_297] : memref<32x128xf32, #tpu.memory_space<vmem>>, vector<4x128xf32>
    %cst_298 = arith.constant dense<0.000000e+00> : vector<4x128xf32>
    %410 = tpu.matmul %373, %334, %cst_298 {dimension_numbers = #tpu.dot_dimension_numbers<[1], [0], [0], [1], [0, 0, 1, 1], [], []>, precision = #tpu.contract_precision<fp32>} : vector<4x32xf32>, vector<32x128xf32>, vector<4x128xf32> -> vector<4x128xf32>
    %411 = vector.broadcast %335 : vector<1x128xf32> to vector<4x128xf32>
    %412 = arith.addf %410, %411 : vector<4x128xf32>
    %413 = vector.extract_strided_slice %409 {offsets = [0, 0], sizes = [4, 32], strides = [1, 1]} : vector<4x128xf32> to vector<4x32xf32>
    %414 = vector.extract_strided_slice %412 {offsets = [0, 0], sizes = [4, 32], strides = [1, 1]} : vector<4x128xf32> to vector<4x32xf32>
    %415 = arith.addf %413, %414 : vector<4x32xf32>
    %416 = arith.negf %415 : vector<4x32xf32>
    %417 = math.exp %416 : vector<4x32xf32>
    %cst_299 = arith.constant 1.000000e+00 : f32
    %418 = vector.broadcast %cst_299 : f32 to vector<4x32xf32>
    %419 = arith.addf %418, %417 : vector<4x32xf32>
    %420 = arith.divf %418, %419 : vector<4x32xf32>
    %421 = vector.extract_strided_slice %409 {offsets = [0, 32], sizes = [4, 32], strides = [1, 1]} : vector<4x128xf32> to vector<4x32xf32>
    %422 = vector.extract_strided_slice %412 {offsets = [0, 32], sizes = [4, 32], strides = [1, 1]} : vector<4x128xf32> to vector<4x32xf32>
    %423 = arith.addf %421, %422 : vector<4x32xf32>
    %424 = arith.negf %423 : vector<4x32xf32>
    %425 = math.exp %424 : vector<4x32xf32>
    %cst_300 = arith.constant 1.000000e+00 : f32
    %426 = vector.broadcast %cst_300 : f32 to vector<4x32xf32>
    %427 = arith.addf %426, %425 : vector<4x32xf32>
    %428 = arith.divf %426, %427 : vector<4x32xf32>
    %429 = vector.extract_strided_slice %409 {offsets = [0, 64], sizes = [4, 32], strides = [1, 1]} : vector<4x128xf32> to vector<4x32xf32>
    %430 = vector.extract_strided_slice %412 {offsets = [0, 64], sizes = [4, 32], strides = [1, 1]} : vector<4x128xf32> to vector<4x32xf32>
    %431 = arith.mulf %420, %430 : vector<4x32xf32>
    %432 = arith.addf %429, %431 : vector<4x32xf32>
    %433 = math.tanh %432 : vector<4x32xf32>
    %cst_301 = arith.constant 1.000000e+00 : f32
    %434 = vector.broadcast %cst_301 : f32 to vector<4x32xf32>
    %435 = arith.subf %434, %428 : vector<4x32xf32>
    %436 = arith.mulf %435, %433 : vector<4x32xf32>
    %437 = arith.mulf %428, %373 : vector<4x32xf32>
    %438 = arith.addf %436, %437 : vector<4x32xf32>
    %c8_i32_302 = arith.constant 8 : i32
    %439 = arith.cmpi slt, %c1_i32, %c8_i32_302 : i32
    %440 = arith.select %439, %438, %373 : vector<4x32xf32>
    %c4_i32_303 = arith.constant 4 : i32
    %441 = arith.muli %c1_i32, %c4_i32_303 : i32
    %442 = arith.index_cast %441 : i32 to index
    %c0_304 = arith.constant 0 : index
    %443 = vector.load %arg20[%442, %c0_304] : memref<40x128xf32, #tpu.memory_space<vmem>>, vector<4x128xf32>
    %cst_305 = arith.constant dense<0.000000e+00> : vector<4x128xf32>
    %444 = tpu.matmul %405, %336, %cst_305 {dimension_numbers = #tpu.dot_dimension_numbers<[1], [0], [0], [1], [0, 0, 1, 1], [], []>, precision = #tpu.contract_precision<fp32>} : vector<4x32xf32>, vector<32x128xf32>, vector<4x128xf32> -> vector<4x128xf32>
    %445 = vector.broadcast %337 : vector<1x128xf32> to vector<4x128xf32>
    %446 = arith.addf %444, %445 : vector<4x128xf32>
    %447 = vector.extract_strided_slice %443 {offsets = [0, 0], sizes = [4, 32], strides = [1, 1]} : vector<4x128xf32> to vector<4x32xf32>
    %448 = vector.extract_strided_slice %446 {offsets = [0, 0], sizes = [4, 32], strides = [1, 1]} : vector<4x128xf32> to vector<4x32xf32>
    %449 = arith.addf %447, %448 : vector<4x32xf32>
    %450 = arith.negf %449 : vector<4x32xf32>
    %451 = math.exp %450 : vector<4x32xf32>
    %cst_306 = arith.constant 1.000000e+00 : f32
    %452 = vector.broadcast %cst_306 : f32 to vector<4x32xf32>
    %453 = arith.addf %452, %451 : vector<4x32xf32>
    %454 = arith.divf %452, %453 : vector<4x32xf32>
    %455 = vector.extract_strided_slice %443 {offsets = [0, 32], sizes = [4, 32], strides = [1, 1]} : vector<4x128xf32> to vector<4x32xf32>
    %456 = vector.extract_strided_slice %446 {offsets = [0, 32], sizes = [4, 32], strides = [1, 1]} : vector<4x128xf32> to vector<4x32xf32>
    %457 = arith.addf %455, %456 : vector<4x32xf32>
    %458 = arith.negf %457 : vector<4x32xf32>
    %459 = math.exp %458 : vector<4x32xf32>
    %cst_307 = arith.constant 1.000000e+00 : f32
    %460 = vector.broadcast %cst_307 : f32 to vector<4x32xf32>
    %461 = arith.addf %460, %459 : vector<4x32xf32>
    %462 = arith.divf %460, %461 : vector<4x32xf32>
    %463 = vector.extract_strided_slice %443 {offsets = [0, 64], sizes = [4, 32], strides = [1, 1]} : vector<4x128xf32> to vector<4x32xf32>
    %464 = vector.extract_strided_slice %446 {offsets = [0, 64], sizes = [4, 32], strides = [1, 1]} : vector<4x128xf32> to vector<4x32xf32>
    %465 = arith.mulf %454, %464 : vector<4x32xf32>
    %466 = arith.addf %463, %465 : vector<4x32xf32>
    %467 = math.tanh %466 : vector<4x32xf32>
    %cst_308 = arith.constant 1.000000e+00 : f32
    %468 = vector.broadcast %cst_308 : f32 to vector<4x32xf32>
    %469 = arith.subf %468, %462 : vector<4x32xf32>
    %470 = arith.mulf %469, %467 : vector<4x32xf32>
    %471 = arith.mulf %462, %405 : vector<4x32xf32>
    %472 = arith.addf %470, %471 : vector<4x32xf32>
    %c2_i32 = arith.constant 2 : i32
    %c7_i32_309 = arith.constant 7 : i32
    %473 = arith.minsi %c2_i32, %c7_i32_309 : i32
    %c4_i32_310 = arith.constant 4 : i32
    %474 = arith.muli %473, %c4_i32_310 : i32
    %475 = arith.index_cast %474 : i32 to index
    %c0_311 = arith.constant 0 : index
    %476 = vector.load %arg19[%475, %c0_311] : memref<32x128xf32, #tpu.memory_space<vmem>>, vector<4x128xf32>
    %cst_312 = arith.constant dense<0.000000e+00> : vector<4x128xf32>
    %477 = tpu.matmul %440, %334, %cst_312 {dimension_numbers = #tpu.dot_dimension_numbers<[1], [0], [0], [1], [0, 0, 1, 1], [], []>, precision = #tpu.contract_precision<fp32>} : vector<4x32xf32>, vector<32x128xf32>, vector<4x128xf32> -> vector<4x128xf32>
    %478 = vector.broadcast %335 : vector<1x128xf32> to vector<4x128xf32>
    %479 = arith.addf %477, %478 : vector<4x128xf32>
    %480 = vector.extract_strided_slice %476 {offsets = [0, 0], sizes = [4, 32], strides = [1, 1]} : vector<4x128xf32> to vector<4x32xf32>
    %481 = vector.extract_strided_slice %479 {offsets = [0, 0], sizes = [4, 32], strides = [1, 1]} : vector<4x128xf32> to vector<4x32xf32>
    %482 = arith.addf %480, %481 : vector<4x32xf32>
    %483 = arith.negf %482 : vector<4x32xf32>
    %484 = math.exp %483 : vector<4x32xf32>
    %cst_313 = arith.constant 1.000000e+00 : f32
    %485 = vector.broadcast %cst_313 : f32 to vector<4x32xf32>
    %486 = arith.addf %485, %484 : vector<4x32xf32>
    %487 = arith.divf %485, %486 : vector<4x32xf32>
    %488 = vector.extract_strided_slice %476 {offsets = [0, 32], sizes = [4, 32], strides = [1, 1]} : vector<4x128xf32> to vector<4x32xf32>
    %489 = vector.extract_strided_slice %479 {offsets = [0, 32], sizes = [4, 32], strides = [1, 1]} : vector<4x128xf32> to vector<4x32xf32>
    %490 = arith.addf %488, %489 : vector<4x32xf32>
    %491 = arith.negf %490 : vector<4x32xf32>
    %492 = math.exp %491 : vector<4x32xf32>
    %cst_314 = arith.constant 1.000000e+00 : f32
    %493 = vector.broadcast %cst_314 : f32 to vector<4x32xf32>
    %494 = arith.addf %493, %492 : vector<4x32xf32>
    %495 = arith.divf %493, %494 : vector<4x32xf32>
    %496 = vector.extract_strided_slice %476 {offsets = [0, 64], sizes = [4, 32], strides = [1, 1]} : vector<4x128xf32> to vector<4x32xf32>
    %497 = vector.extract_strided_slice %479 {offsets = [0, 64], sizes = [4, 32], strides = [1, 1]} : vector<4x128xf32> to vector<4x32xf32>
    %498 = arith.mulf %487, %497 : vector<4x32xf32>
    %499 = arith.addf %496, %498 : vector<4x32xf32>
    %500 = math.tanh %499 : vector<4x32xf32>
    %cst_315 = arith.constant 1.000000e+00 : f32
    %501 = vector.broadcast %cst_315 : f32 to vector<4x32xf32>
    %502 = arith.subf %501, %495 : vector<4x32xf32>
    %503 = arith.mulf %502, %500 : vector<4x32xf32>
    %504 = arith.mulf %495, %440 : vector<4x32xf32>
    %505 = arith.addf %503, %504 : vector<4x32xf32>
    %c8_i32_316 = arith.constant 8 : i32
    %506 = arith.cmpi slt, %c2_i32, %c8_i32_316 : i32
    %507 = arith.select %506, %505, %440 : vector<4x32xf32>
    %c4_i32_317 = arith.constant 4 : i32
    %508 = arith.muli %c2_i32, %c4_i32_317 : i32
    %509 = arith.index_cast %508 : i32 to index
    %c0_318 = arith.constant 0 : index
    %510 = vector.load %arg20[%509, %c0_318] : memref<40x128xf32, #tpu.memory_space<vmem>>, vector<4x128xf32>
    %cst_319 = arith.constant dense<0.000000e+00> : vector<4x128xf32>
    %511 = tpu.matmul %472, %336, %cst_319 {dimension_numbers = #tpu.dot_dimension_numbers<[1], [0], [0], [1], [0, 0, 1, 1], [], []>, precision = #tpu.contract_precision<fp32>} : vector<4x32xf32>, vector<32x128xf32>, vector<4x128xf32> -> vector<4x128xf32>
    %512 = vector.broadcast %337 : vector<1x128xf32> to vector<4x128xf32>
    %513 = arith.addf %511, %512 : vector<4x128xf32>
    %514 = vector.extract_strided_slice %510 {offsets = [0, 0], sizes = [4, 32], strides = [1, 1]} : vector<4x128xf32> to vector<4x32xf32>
    %515 = vector.extract_strided_slice %513 {offsets = [0, 0], sizes = [4, 32], strides = [1, 1]} : vector<4x128xf32> to vector<4x32xf32>
    %516 = arith.addf %514, %515 : vector<4x32xf32>
    %517 = arith.negf %516 : vector<4x32xf32>
    %518 = math.exp %517 : vector<4x32xf32>
    %cst_320 = arith.constant 1.000000e+00 : f32
    %519 = vector.broadcast %cst_320 : f32 to vector<4x32xf32>
    %520 = arith.addf %519, %518 : vector<4x32xf32>
    %521 = arith.divf %519, %520 : vector<4x32xf32>
    %522 = vector.extract_strided_slice %510 {offsets = [0, 32], sizes = [4, 32], strides = [1, 1]} : vector<4x128xf32> to vector<4x32xf32>
    %523 = vector.extract_strided_slice %513 {offsets = [0, 32], sizes = [4, 32], strides = [1, 1]} : vector<4x128xf32> to vector<4x32xf32>
    %524 = arith.addf %522, %523 : vector<4x32xf32>
    %525 = arith.negf %524 : vector<4x32xf32>
    %526 = math.exp %525 : vector<4x32xf32>
    %cst_321 = arith.constant 1.000000e+00 : f32
    %527 = vector.broadcast %cst_321 : f32 to vector<4x32xf32>
    %528 = arith.addf %527, %526 : vector<4x32xf32>
    %529 = arith.divf %527, %528 : vector<4x32xf32>
    %530 = vector.extract_strided_slice %510 {offsets = [0, 64], sizes = [4, 32], strides = [1, 1]} : vector<4x128xf32> to vector<4x32xf32>
    %531 = vector.extract_strided_slice %513 {offsets = [0, 64], sizes = [4, 32], strides = [1, 1]} : vector<4x128xf32> to vector<4x32xf32>
    %532 = arith.mulf %521, %531 : vector<4x32xf32>
    %533 = arith.addf %530, %532 : vector<4x32xf32>
    %534 = math.tanh %533 : vector<4x32xf32>
    %cst_322 = arith.constant 1.000000e+00 : f32
    %535 = vector.broadcast %cst_322 : f32 to vector<4x32xf32>
    %536 = arith.subf %535, %529 : vector<4x32xf32>
    %537 = arith.mulf %536, %534 : vector<4x32xf32>
    %538 = arith.mulf %529, %472 : vector<4x32xf32>
    %539 = arith.addf %537, %538 : vector<4x32xf32>
    %c3_i32 = arith.constant 3 : i32
    %c7_i32_323 = arith.constant 7 : i32
    %540 = arith.minsi %c3_i32, %c7_i32_323 : i32
    %c4_i32_324 = arith.constant 4 : i32
    %541 = arith.muli %540, %c4_i32_324 : i32
    %542 = arith.index_cast %541 : i32 to index
    %c0_325 = arith.constant 0 : index
    %543 = vector.load %arg19[%542, %c0_325] : memref<32x128xf32, #tpu.memory_space<vmem>>, vector<4x128xf32>
    %cst_326 = arith.constant dense<0.000000e+00> : vector<4x128xf32>
    %544 = tpu.matmul %507, %334, %cst_326 {dimension_numbers = #tpu.dot_dimension_numbers<[1], [0], [0], [1], [0, 0, 1, 1], [], []>, precision = #tpu.contract_precision<fp32>} : vector<4x32xf32>, vector<32x128xf32>, vector<4x128xf32> -> vector<4x128xf32>
    %545 = vector.broadcast %335 : vector<1x128xf32> to vector<4x128xf32>
    %546 = arith.addf %544, %545 : vector<4x128xf32>
    %547 = vector.extract_strided_slice %543 {offsets = [0, 0], sizes = [4, 32], strides = [1, 1]} : vector<4x128xf32> to vector<4x32xf32>
    %548 = vector.extract_strided_slice %546 {offsets = [0, 0], sizes = [4, 32], strides = [1, 1]} : vector<4x128xf32> to vector<4x32xf32>
    %549 = arith.addf %547, %548 : vector<4x32xf32>
    %550 = arith.negf %549 : vector<4x32xf32>
    %551 = math.exp %550 : vector<4x32xf32>
    %cst_327 = arith.constant 1.000000e+00 : f32
    %552 = vector.broadcast %cst_327 : f32 to vector<4x32xf32>
    %553 = arith.addf %552, %551 : vector<4x32xf32>
    %554 = arith.divf %552, %553 : vector<4x32xf32>
    %555 = vector.extract_strided_slice %543 {offsets = [0, 32], sizes = [4, 32], strides = [1, 1]} : vector<4x128xf32> to vector<4x32xf32>
    %556 = vector.extract_strided_slice %546 {offsets = [0, 32], sizes = [4, 32], strides = [1, 1]} : vector<4x128xf32> to vector<4x32xf32>
    %557 = arith.addf %555, %556 : vector<4x32xf32>
    %558 = arith.negf %557 : vector<4x32xf32>
    %559 = math.exp %558 : vector<4x32xf32>
    %cst_328 = arith.constant 1.000000e+00 : f32
    %560 = vector.broadcast %cst_328 : f32 to vector<4x32xf32>
    %561 = arith.addf %560, %559 : vector<4x32xf32>
    %562 = arith.divf %560, %561 : vector<4x32xf32>
    %563 = vector.extract_strided_slice %543 {offsets = [0, 64], sizes = [4, 32], strides = [1, 1]} : vector<4x128xf32> to vector<4x32xf32>
    %564 = vector.extract_strided_slice %546 {offsets = [0, 64], sizes = [4, 32], strides = [1, 1]} : vector<4x128xf32> to vector<4x32xf32>
    %565 = arith.mulf %554, %564 : vector<4x32xf32>
    %566 = arith.addf %563, %565 : vector<4x32xf32>
    %567 = math.tanh %566 : vector<4x32xf32>
    %cst_329 = arith.constant 1.000000e+00 : f32
    %568 = vector.broadcast %cst_329 : f32 to vector<4x32xf32>
    %569 = arith.subf %568, %562 : vector<4x32xf32>
    %570 = arith.mulf %569, %567 : vector<4x32xf32>
    %571 = arith.mulf %562, %507 : vector<4x32xf32>
    %572 = arith.addf %570, %571 : vector<4x32xf32>
    %c8_i32_330 = arith.constant 8 : i32
    %573 = arith.cmpi slt, %c3_i32, %c8_i32_330 : i32
    %574 = arith.select %573, %572, %507 : vector<4x32xf32>
    %c4_i32_331 = arith.constant 4 : i32
    %575 = arith.muli %c3_i32, %c4_i32_331 : i32
    %576 = arith.index_cast %575 : i32 to index
    %c0_332 = arith.constant 0 : index
    %577 = vector.load %arg20[%576, %c0_332] : memref<40x128xf32, #tpu.memory_space<vmem>>, vector<4x128xf32>
    %cst_333 = arith.constant dense<0.000000e+00> : vector<4x128xf32>
    %578 = tpu.matmul %539, %336, %cst_333 {dimension_numbers = #tpu.dot_dimension_numbers<[1], [0], [0], [1], [0, 0, 1, 1], [], []>, precision = #tpu.contract_precision<fp32>} : vector<4x32xf32>, vector<32x128xf32>, vector<4x128xf32> -> vector<4x128xf32>
    %579 = vector.broadcast %337 : vector<1x128xf32> to vector<4x128xf32>
    %580 = arith.addf %578, %579 : vector<4x128xf32>
    %581 = vector.extract_strided_slice %577 {offsets = [0, 0], sizes = [4, 32], strides = [1, 1]} : vector<4x128xf32> to vector<4x32xf32>
    %582 = vector.extract_strided_slice %580 {offsets = [0, 0], sizes = [4, 32], strides = [1, 1]} : vector<4x128xf32> to vector<4x32xf32>
    %583 = arith.addf %581, %582 : vector<4x32xf32>
    %584 = arith.negf %583 : vector<4x32xf32>
    %585 = math.exp %584 : vector<4x32xf32>
    %cst_334 = arith.constant 1.000000e+00 : f32
    %586 = vector.broadcast %cst_334 : f32 to vector<4x32xf32>
    %587 = arith.addf %586, %585 : vector<4x32xf32>
    %588 = arith.divf %586, %587 : vector<4x32xf32>
    %589 = vector.extract_strided_slice %577 {offsets = [0, 32], sizes = [4, 32], strides = [1, 1]} : vector<4x128xf32> to vector<4x32xf32>
    %590 = vector.extract_strided_slice %580 {offsets = [0, 32], sizes = [4, 32], strides = [1, 1]} : vector<4x128xf32> to vector<4x32xf32>
    %591 = arith.addf %589, %590 : vector<4x32xf32>
    %592 = arith.negf %591 : vector<4x32xf32>
    %593 = math.exp %592 : vector<4x32xf32>
    %cst_335 = arith.constant 1.000000e+00 : f32
    %594 = vector.broadcast %cst_335 : f32 to vector<4x32xf32>
    %595 = arith.addf %594, %593 : vector<4x32xf32>
    %596 = arith.divf %594, %595 : vector<4x32xf32>
    %597 = vector.extract_strided_slice %577 {offsets = [0, 64], sizes = [4, 32], strides = [1, 1]} : vector<4x128xf32> to vector<4x32xf32>
    %598 = vector.extract_strided_slice %580 {offsets = [0, 64], sizes = [4, 32], strides = [1, 1]} : vector<4x128xf32> to vector<4x32xf32>
    %599 = arith.mulf %588, %598 : vector<4x32xf32>
    %600 = arith.addf %597, %599 : vector<4x32xf32>
    %601 = math.tanh %600 : vector<4x32xf32>
    %cst_336 = arith.constant 1.000000e+00 : f32
    %602 = vector.broadcast %cst_336 : f32 to vector<4x32xf32>
    %603 = arith.subf %602, %596 : vector<4x32xf32>
    %604 = arith.mulf %603, %601 : vector<4x32xf32>
    %605 = arith.mulf %596, %539 : vector<4x32xf32>
    %606 = arith.addf %604, %605 : vector<4x32xf32>
    %c4_i32_337 = arith.constant 4 : i32
    %c7_i32_338 = arith.constant 7 : i32
    %607 = arith.minsi %c4_i32_337, %c7_i32_338 : i32
    %c4_i32_339 = arith.constant 4 : i32
    %608 = arith.muli %607, %c4_i32_339 : i32
    %609 = arith.index_cast %608 : i32 to index
    %c0_340 = arith.constant 0 : index
    %610 = vector.load %arg19[%609, %c0_340] : memref<32x128xf32, #tpu.memory_space<vmem>>, vector<4x128xf32>
    %cst_341 = arith.constant dense<0.000000e+00> : vector<4x128xf32>
    %611 = tpu.matmul %574, %334, %cst_341 {dimension_numbers = #tpu.dot_dimension_numbers<[1], [0], [0], [1], [0, 0, 1, 1], [], []>, precision = #tpu.contract_precision<fp32>} : vector<4x32xf32>, vector<32x128xf32>, vector<4x128xf32> -> vector<4x128xf32>
    %612 = vector.broadcast %335 : vector<1x128xf32> to vector<4x128xf32>
    %613 = arith.addf %611, %612 : vector<4x128xf32>
    %614 = vector.extract_strided_slice %610 {offsets = [0, 0], sizes = [4, 32], strides = [1, 1]} : vector<4x128xf32> to vector<4x32xf32>
    %615 = vector.extract_strided_slice %613 {offsets = [0, 0], sizes = [4, 32], strides = [1, 1]} : vector<4x128xf32> to vector<4x32xf32>
    %616 = arith.addf %614, %615 : vector<4x32xf32>
    %617 = arith.negf %616 : vector<4x32xf32>
    %618 = math.exp %617 : vector<4x32xf32>
    %cst_342 = arith.constant 1.000000e+00 : f32
    %619 = vector.broadcast %cst_342 : f32 to vector<4x32xf32>
    %620 = arith.addf %619, %618 : vector<4x32xf32>
    %621 = arith.divf %619, %620 : vector<4x32xf32>
    %622 = vector.extract_strided_slice %610 {offsets = [0, 32], sizes = [4, 32], strides = [1, 1]} : vector<4x128xf32> to vector<4x32xf32>
    %623 = vector.extract_strided_slice %613 {offsets = [0, 32], sizes = [4, 32], strides = [1, 1]} : vector<4x128xf32> to vector<4x32xf32>
    %624 = arith.addf %622, %623 : vector<4x32xf32>
    %625 = arith.negf %624 : vector<4x32xf32>
    %626 = math.exp %625 : vector<4x32xf32>
    %cst_343 = arith.constant 1.000000e+00 : f32
    %627 = vector.broadcast %cst_343 : f32 to vector<4x32xf32>
    %628 = arith.addf %627, %626 : vector<4x32xf32>
    %629 = arith.divf %627, %628 : vector<4x32xf32>
    %630 = vector.extract_strided_slice %610 {offsets = [0, 64], sizes = [4, 32], strides = [1, 1]} : vector<4x128xf32> to vector<4x32xf32>
    %631 = vector.extract_strided_slice %613 {offsets = [0, 64], sizes = [4, 32], strides = [1, 1]} : vector<4x128xf32> to vector<4x32xf32>
    %632 = arith.mulf %621, %631 : vector<4x32xf32>
    %633 = arith.addf %630, %632 : vector<4x32xf32>
    %634 = math.tanh %633 : vector<4x32xf32>
    %cst_344 = arith.constant 1.000000e+00 : f32
    %635 = vector.broadcast %cst_344 : f32 to vector<4x32xf32>
    %636 = arith.subf %635, %629 : vector<4x32xf32>
    %637 = arith.mulf %636, %634 : vector<4x32xf32>
    %638 = arith.mulf %629, %574 : vector<4x32xf32>
    %639 = arith.addf %637, %638 : vector<4x32xf32>
    %c8_i32_345 = arith.constant 8 : i32
    %640 = arith.cmpi slt, %c4_i32_337, %c8_i32_345 : i32
    %641 = arith.select %640, %639, %574 : vector<4x32xf32>
    %c4_i32_346 = arith.constant 4 : i32
    %642 = arith.muli %c4_i32_337, %c4_i32_346 : i32
    %643 = arith.index_cast %642 : i32 to index
    %c0_347 = arith.constant 0 : index
    %644 = vector.load %arg20[%643, %c0_347] : memref<40x128xf32, #tpu.memory_space<vmem>>, vector<4x128xf32>
    %cst_348 = arith.constant dense<0.000000e+00> : vector<4x128xf32>
    %645 = tpu.matmul %606, %336, %cst_348 {dimension_numbers = #tpu.dot_dimension_numbers<[1], [0], [0], [1], [0, 0, 1, 1], [], []>, precision = #tpu.contract_precision<fp32>} : vector<4x32xf32>, vector<32x128xf32>, vector<4x128xf32> -> vector<4x128xf32>
    %646 = vector.broadcast %337 : vector<1x128xf32> to vector<4x128xf32>
    %647 = arith.addf %645, %646 : vector<4x128xf32>
    %648 = vector.extract_strided_slice %644 {offsets = [0, 0], sizes = [4, 32], strides = [1, 1]} : vector<4x128xf32> to vector<4x32xf32>
    %649 = vector.extract_strided_slice %647 {offsets = [0, 0], sizes = [4, 32], strides = [1, 1]} : vector<4x128xf32> to vector<4x32xf32>
    %650 = arith.addf %648, %649 : vector<4x32xf32>
    %651 = arith.negf %650 : vector<4x32xf32>
    %652 = math.exp %651 : vector<4x32xf32>
    %cst_349 = arith.constant 1.000000e+00 : f32
    %653 = vector.broadcast %cst_349 : f32 to vector<4x32xf32>
    %654 = arith.addf %653, %652 : vector<4x32xf32>
    %655 = arith.divf %653, %654 : vector<4x32xf32>
    %656 = vector.extract_strided_slice %644 {offsets = [0, 32], sizes = [4, 32], strides = [1, 1]} : vector<4x128xf32> to vector<4x32xf32>
    %657 = vector.extract_strided_slice %647 {offsets = [0, 32], sizes = [4, 32], strides = [1, 1]} : vector<4x128xf32> to vector<4x32xf32>
    %658 = arith.addf %656, %657 : vector<4x32xf32>
    %659 = arith.negf %658 : vector<4x32xf32>
    %660 = math.exp %659 : vector<4x32xf32>
    %cst_350 = arith.constant 1.000000e+00 : f32
    %661 = vector.broadcast %cst_350 : f32 to vector<4x32xf32>
    %662 = arith.addf %661, %660 : vector<4x32xf32>
    %663 = arith.divf %661, %662 : vector<4x32xf32>
    %664 = vector.extract_strided_slice %644 {offsets = [0, 64], sizes = [4, 32], strides = [1, 1]} : vector<4x128xf32> to vector<4x32xf32>
    %665 = vector.extract_strided_slice %647 {offsets = [0, 64], sizes = [4, 32], strides = [1, 1]} : vector<4x128xf32> to vector<4x32xf32>
    %666 = arith.mulf %655, %665 : vector<4x32xf32>
    %667 = arith.addf %664, %666 : vector<4x32xf32>
    %668 = math.tanh %667 : vector<4x32xf32>
    %cst_351 = arith.constant 1.000000e+00 : f32
    %669 = vector.broadcast %cst_351 : f32 to vector<4x32xf32>
    %670 = arith.subf %669, %663 : vector<4x32xf32>
    %671 = arith.mulf %670, %668 : vector<4x32xf32>
    %672 = arith.mulf %663, %606 : vector<4x32xf32>
    %673 = arith.addf %671, %672 : vector<4x32xf32>
    %c5_i32 = arith.constant 5 : i32
    %c7_i32_352 = arith.constant 7 : i32
    %674 = arith.minsi %c5_i32, %c7_i32_352 : i32
    %c4_i32_353 = arith.constant 4 : i32
    %675 = arith.muli %674, %c4_i32_353 : i32
    %676 = arith.index_cast %675 : i32 to index
    %c0_354 = arith.constant 0 : index
    %677 = vector.load %arg19[%676, %c0_354] : memref<32x128xf32, #tpu.memory_space<vmem>>, vector<4x128xf32>
    %cst_355 = arith.constant dense<0.000000e+00> : vector<4x128xf32>
    %678 = tpu.matmul %641, %334, %cst_355 {dimension_numbers = #tpu.dot_dimension_numbers<[1], [0], [0], [1], [0, 0, 1, 1], [], []>, precision = #tpu.contract_precision<fp32>} : vector<4x32xf32>, vector<32x128xf32>, vector<4x128xf32> -> vector<4x128xf32>
    %679 = vector.broadcast %335 : vector<1x128xf32> to vector<4x128xf32>
    %680 = arith.addf %678, %679 : vector<4x128xf32>
    %681 = vector.extract_strided_slice %677 {offsets = [0, 0], sizes = [4, 32], strides = [1, 1]} : vector<4x128xf32> to vector<4x32xf32>
    %682 = vector.extract_strided_slice %680 {offsets = [0, 0], sizes = [4, 32], strides = [1, 1]} : vector<4x128xf32> to vector<4x32xf32>
    %683 = arith.addf %681, %682 : vector<4x32xf32>
    %684 = arith.negf %683 : vector<4x32xf32>
    %685 = math.exp %684 : vector<4x32xf32>
    %cst_356 = arith.constant 1.000000e+00 : f32
    %686 = vector.broadcast %cst_356 : f32 to vector<4x32xf32>
    %687 = arith.addf %686, %685 : vector<4x32xf32>
    %688 = arith.divf %686, %687 : vector<4x32xf32>
    %689 = vector.extract_strided_slice %677 {offsets = [0, 32], sizes = [4, 32], strides = [1, 1]} : vector<4x128xf32> to vector<4x32xf32>
    %690 = vector.extract_strided_slice %680 {offsets = [0, 32], sizes = [4, 32], strides = [1, 1]} : vector<4x128xf32> to vector<4x32xf32>
    %691 = arith.addf %689, %690 : vector<4x32xf32>
    %692 = arith.negf %691 : vector<4x32xf32>
    %693 = math.exp %692 : vector<4x32xf32>
    %cst_357 = arith.constant 1.000000e+00 : f32
    %694 = vector.broadcast %cst_357 : f32 to vector<4x32xf32>
    %695 = arith.addf %694, %693 : vector<4x32xf32>
    %696 = arith.divf %694, %695 : vector<4x32xf32>
    %697 = vector.extract_strided_slice %677 {offsets = [0, 64], sizes = [4, 32], strides = [1, 1]} : vector<4x128xf32> to vector<4x32xf32>
    %698 = vector.extract_strided_slice %680 {offsets = [0, 64], sizes = [4, 32], strides = [1, 1]} : vector<4x128xf32> to vector<4x32xf32>
    %699 = arith.mulf %688, %698 : vector<4x32xf32>
    %700 = arith.addf %697, %699 : vector<4x32xf32>
    %701 = math.tanh %700 : vector<4x32xf32>
    %cst_358 = arith.constant 1.000000e+00 : f32
    %702 = vector.broadcast %cst_358 : f32 to vector<4x32xf32>
    %703 = arith.subf %702, %696 : vector<4x32xf32>
    %704 = arith.mulf %703, %701 : vector<4x32xf32>
    %705 = arith.mulf %696, %641 : vector<4x32xf32>
    %706 = arith.addf %704, %705 : vector<4x32xf32>
    %c8_i32_359 = arith.constant 8 : i32
    %707 = arith.cmpi slt, %c5_i32, %c8_i32_359 : i32
    %708 = arith.select %707, %706, %641 : vector<4x32xf32>
    %c4_i32_360 = arith.constant 4 : i32
    %709 = arith.muli %c5_i32, %c4_i32_360 : i32
    %710 = arith.index_cast %709 : i32 to index
    %c0_361 = arith.constant 0 : index
    %711 = vector.load %arg20[%710, %c0_361] : memref<40x128xf32, #tpu.memory_space<vmem>>, vector<4x128xf32>
    %cst_362 = arith.constant dense<0.000000e+00> : vector<4x128xf32>
    %712 = tpu.matmul %673, %336, %cst_362 {dimension_numbers = #tpu.dot_dimension_numbers<[1], [0], [0], [1], [0, 0, 1, 1], [], []>, precision = #tpu.contract_precision<fp32>} : vector<4x32xf32>, vector<32x128xf32>, vector<4x128xf32> -> vector<4x128xf32>
    %713 = vector.broadcast %337 : vector<1x128xf32> to vector<4x128xf32>
    %714 = arith.addf %712, %713 : vector<4x128xf32>
    %715 = vector.extract_strided_slice %711 {offsets = [0, 0], sizes = [4, 32], strides = [1, 1]} : vector<4x128xf32> to vector<4x32xf32>
    %716 = vector.extract_strided_slice %714 {offsets = [0, 0], sizes = [4, 32], strides = [1, 1]} : vector<4x128xf32> to vector<4x32xf32>
    %717 = arith.addf %715, %716 : vector<4x32xf32>
    %718 = arith.negf %717 : vector<4x32xf32>
    %719 = math.exp %718 : vector<4x32xf32>
    %cst_363 = arith.constant 1.000000e+00 : f32
    %720 = vector.broadcast %cst_363 : f32 to vector<4x32xf32>
    %721 = arith.addf %720, %719 : vector<4x32xf32>
    %722 = arith.divf %720, %721 : vector<4x32xf32>
    %723 = vector.extract_strided_slice %711 {offsets = [0, 32], sizes = [4, 32], strides = [1, 1]} : vector<4x128xf32> to vector<4x32xf32>
    %724 = vector.extract_strided_slice %714 {offsets = [0, 32], sizes = [4, 32], strides = [1, 1]} : vector<4x128xf32> to vector<4x32xf32>
    %725 = arith.addf %723, %724 : vector<4x32xf32>
    %726 = arith.negf %725 : vector<4x32xf32>
    %727 = math.exp %726 : vector<4x32xf32>
    %cst_364 = arith.constant 1.000000e+00 : f32
    %728 = vector.broadcast %cst_364 : f32 to vector<4x32xf32>
    %729 = arith.addf %728, %727 : vector<4x32xf32>
    %730 = arith.divf %728, %729 : vector<4x32xf32>
    %731 = vector.extract_strided_slice %711 {offsets = [0, 64], sizes = [4, 32], strides = [1, 1]} : vector<4x128xf32> to vector<4x32xf32>
    %732 = vector.extract_strided_slice %714 {offsets = [0, 64], sizes = [4, 32], strides = [1, 1]} : vector<4x128xf32> to vector<4x32xf32>
    %733 = arith.mulf %722, %732 : vector<4x32xf32>
    %734 = arith.addf %731, %733 : vector<4x32xf32>
    %735 = math.tanh %734 : vector<4x32xf32>
    %cst_365 = arith.constant 1.000000e+00 : f32
    %736 = vector.broadcast %cst_365 : f32 to vector<4x32xf32>
    %737 = arith.subf %736, %730 : vector<4x32xf32>
    %738 = arith.mulf %737, %735 : vector<4x32xf32>
    %739 = arith.mulf %730, %673 : vector<4x32xf32>
    %740 = arith.addf %738, %739 : vector<4x32xf32>
    %c6_i32 = arith.constant 6 : i32
    %c7_i32_366 = arith.constant 7 : i32
    %741 = arith.minsi %c6_i32, %c7_i32_366 : i32
    %c4_i32_367 = arith.constant 4 : i32
    %742 = arith.muli %741, %c4_i32_367 : i32
    %743 = arith.index_cast %742 : i32 to index
    %c0_368 = arith.constant 0 : index
    %744 = vector.load %arg19[%743, %c0_368] : memref<32x128xf32, #tpu.memory_space<vmem>>, vector<4x128xf32>
    %cst_369 = arith.constant dense<0.000000e+00> : vector<4x128xf32>
    %745 = tpu.matmul %708, %334, %cst_369 {dimension_numbers = #tpu.dot_dimension_numbers<[1], [0], [0], [1], [0, 0, 1, 1], [], []>, precision = #tpu.contract_precision<fp32>} : vector<4x32xf32>, vector<32x128xf32>, vector<4x128xf32> -> vector<4x128xf32>
    %746 = vector.broadcast %335 : vector<1x128xf32> to vector<4x128xf32>
    %747 = arith.addf %745, %746 : vector<4x128xf32>
    %748 = vector.extract_strided_slice %744 {offsets = [0, 0], sizes = [4, 32], strides = [1, 1]} : vector<4x128xf32> to vector<4x32xf32>
    %749 = vector.extract_strided_slice %747 {offsets = [0, 0], sizes = [4, 32], strides = [1, 1]} : vector<4x128xf32> to vector<4x32xf32>
    %750 = arith.addf %748, %749 : vector<4x32xf32>
    %751 = arith.negf %750 : vector<4x32xf32>
    %752 = math.exp %751 : vector<4x32xf32>
    %cst_370 = arith.constant 1.000000e+00 : f32
    %753 = vector.broadcast %cst_370 : f32 to vector<4x32xf32>
    %754 = arith.addf %753, %752 : vector<4x32xf32>
    %755 = arith.divf %753, %754 : vector<4x32xf32>
    %756 = vector.extract_strided_slice %744 {offsets = [0, 32], sizes = [4, 32], strides = [1, 1]} : vector<4x128xf32> to vector<4x32xf32>
    %757 = vector.extract_strided_slice %747 {offsets = [0, 32], sizes = [4, 32], strides = [1, 1]} : vector<4x128xf32> to vector<4x32xf32>
    %758 = arith.addf %756, %757 : vector<4x32xf32>
    %759 = arith.negf %758 : vector<4x32xf32>
    %760 = math.exp %759 : vector<4x32xf32>
    %cst_371 = arith.constant 1.000000e+00 : f32
    %761 = vector.broadcast %cst_371 : f32 to vector<4x32xf32>
    %762 = arith.addf %761, %760 : vector<4x32xf32>
    %763 = arith.divf %761, %762 : vector<4x32xf32>
    %764 = vector.extract_strided_slice %744 {offsets = [0, 64], sizes = [4, 32], strides = [1, 1]} : vector<4x128xf32> to vector<4x32xf32>
    %765 = vector.extract_strided_slice %747 {offsets = [0, 64], sizes = [4, 32], strides = [1, 1]} : vector<4x128xf32> to vector<4x32xf32>
    %766 = arith.mulf %755, %765 : vector<4x32xf32>
    %767 = arith.addf %764, %766 : vector<4x32xf32>
    %768 = math.tanh %767 : vector<4x32xf32>
    %cst_372 = arith.constant 1.000000e+00 : f32
    %769 = vector.broadcast %cst_372 : f32 to vector<4x32xf32>
    %770 = arith.subf %769, %763 : vector<4x32xf32>
    %771 = arith.mulf %770, %768 : vector<4x32xf32>
    %772 = arith.mulf %763, %708 : vector<4x32xf32>
    %773 = arith.addf %771, %772 : vector<4x32xf32>
    %c8_i32_373 = arith.constant 8 : i32
    %774 = arith.cmpi slt, %c6_i32, %c8_i32_373 : i32
    %775 = arith.select %774, %773, %708 : vector<4x32xf32>
    %c4_i32_374 = arith.constant 4 : i32
    %776 = arith.muli %c6_i32, %c4_i32_374 : i32
    %777 = arith.index_cast %776 : i32 to index
    %c0_375 = arith.constant 0 : index
    %778 = vector.load %arg20[%777, %c0_375] : memref<40x128xf32, #tpu.memory_space<vmem>>, vector<4x128xf32>
    %cst_376 = arith.constant dense<0.000000e+00> : vector<4x128xf32>
    %779 = tpu.matmul %740, %336, %cst_376 {dimension_numbers = #tpu.dot_dimension_numbers<[1], [0], [0], [1], [0, 0, 1, 1], [], []>, precision = #tpu.contract_precision<fp32>} : vector<4x32xf32>, vector<32x128xf32>, vector<4x128xf32> -> vector<4x128xf32>
    %780 = vector.broadcast %337 : vector<1x128xf32> to vector<4x128xf32>
    %781 = arith.addf %779, %780 : vector<4x128xf32>
    %782 = vector.extract_strided_slice %778 {offsets = [0, 0], sizes = [4, 32], strides = [1, 1]} : vector<4x128xf32> to vector<4x32xf32>
    %783 = vector.extract_strided_slice %781 {offsets = [0, 0], sizes = [4, 32], strides = [1, 1]} : vector<4x128xf32> to vector<4x32xf32>
    %784 = arith.addf %782, %783 : vector<4x32xf32>
    %785 = arith.negf %784 : vector<4x32xf32>
    %786 = math.exp %785 : vector<4x32xf32>
    %cst_377 = arith.constant 1.000000e+00 : f32
    %787 = vector.broadcast %cst_377 : f32 to vector<4x32xf32>
    %788 = arith.addf %787, %786 : vector<4x32xf32>
    %789 = arith.divf %787, %788 : vector<4x32xf32>
    %790 = vector.extract_strided_slice %778 {offsets = [0, 32], sizes = [4, 32], strides = [1, 1]} : vector<4x128xf32> to vector<4x32xf32>
    %791 = vector.extract_strided_slice %781 {offsets = [0, 32], sizes = [4, 32], strides = [1, 1]} : vector<4x128xf32> to vector<4x32xf32>
    %792 = arith.addf %790, %791 : vector<4x32xf32>
    %793 = arith.negf %792 : vector<4x32xf32>
    %794 = math.exp %793 : vector<4x32xf32>
    %cst_378 = arith.constant 1.000000e+00 : f32
    %795 = vector.broadcast %cst_378 : f32 to vector<4x32xf32>
    %796 = arith.addf %795, %794 : vector<4x32xf32>
    %797 = arith.divf %795, %796 : vector<4x32xf32>
    %798 = vector.extract_strided_slice %778 {offsets = [0, 64], sizes = [4, 32], strides = [1, 1]} : vector<4x128xf32> to vector<4x32xf32>
    %799 = vector.extract_strided_slice %781 {offsets = [0, 64], sizes = [4, 32], strides = [1, 1]} : vector<4x128xf32> to vector<4x32xf32>
    %800 = arith.mulf %789, %799 : vector<4x32xf32>
    %801 = arith.addf %798, %800 : vector<4x32xf32>
    %802 = math.tanh %801 : vector<4x32xf32>
    %cst_379 = arith.constant 1.000000e+00 : f32
    %803 = vector.broadcast %cst_379 : f32 to vector<4x32xf32>
    %804 = arith.subf %803, %797 : vector<4x32xf32>
    %805 = arith.mulf %804, %802 : vector<4x32xf32>
    %806 = arith.mulf %797, %740 : vector<4x32xf32>
    %807 = arith.addf %805, %806 : vector<4x32xf32>
    %c7_i32_380 = arith.constant 7 : i32
    %c7_i32_381 = arith.constant 7 : i32
    %808 = arith.minsi %c7_i32_380, %c7_i32_381 : i32
    %c4_i32_382 = arith.constant 4 : i32
    %809 = arith.muli %808, %c4_i32_382 : i32
    %810 = arith.index_cast %809 : i32 to index
    %c0_383 = arith.constant 0 : index
    %811 = vector.load %arg19[%810, %c0_383] : memref<32x128xf32, #tpu.memory_space<vmem>>, vector<4x128xf32>
    %cst_384 = arith.constant dense<0.000000e+00> : vector<4x128xf32>
    %812 = tpu.matmul %775, %334, %cst_384 {dimension_numbers = #tpu.dot_dimension_numbers<[1], [0], [0], [1], [0, 0, 1, 1], [], []>, precision = #tpu.contract_precision<fp32>} : vector<4x32xf32>, vector<32x128xf32>, vector<4x128xf32> -> vector<4x128xf32>
    %813 = vector.broadcast %335 : vector<1x128xf32> to vector<4x128xf32>
    %814 = arith.addf %812, %813 : vector<4x128xf32>
    %815 = vector.extract_strided_slice %811 {offsets = [0, 0], sizes = [4, 32], strides = [1, 1]} : vector<4x128xf32> to vector<4x32xf32>
    %816 = vector.extract_strided_slice %814 {offsets = [0, 0], sizes = [4, 32], strides = [1, 1]} : vector<4x128xf32> to vector<4x32xf32>
    %817 = arith.addf %815, %816 : vector<4x32xf32>
    %818 = arith.negf %817 : vector<4x32xf32>
    %819 = math.exp %818 : vector<4x32xf32>
    %cst_385 = arith.constant 1.000000e+00 : f32
    %820 = vector.broadcast %cst_385 : f32 to vector<4x32xf32>
    %821 = arith.addf %820, %819 : vector<4x32xf32>
    %822 = arith.divf %820, %821 : vector<4x32xf32>
    %823 = vector.extract_strided_slice %811 {offsets = [0, 32], sizes = [4, 32], strides = [1, 1]} : vector<4x128xf32> to vector<4x32xf32>
    %824 = vector.extract_strided_slice %814 {offsets = [0, 32], sizes = [4, 32], strides = [1, 1]} : vector<4x128xf32> to vector<4x32xf32>
    %825 = arith.addf %823, %824 : vector<4x32xf32>
    %826 = arith.negf %825 : vector<4x32xf32>
    %827 = math.exp %826 : vector<4x32xf32>
    %cst_386 = arith.constant 1.000000e+00 : f32
    %828 = vector.broadcast %cst_386 : f32 to vector<4x32xf32>
    %829 = arith.addf %828, %827 : vector<4x32xf32>
    %830 = arith.divf %828, %829 : vector<4x32xf32>
    %831 = vector.extract_strided_slice %811 {offsets = [0, 64], sizes = [4, 32], strides = [1, 1]} : vector<4x128xf32> to vector<4x32xf32>
    %832 = vector.extract_strided_slice %814 {offsets = [0, 64], sizes = [4, 32], strides = [1, 1]} : vector<4x128xf32> to vector<4x32xf32>
    %833 = arith.mulf %822, %832 : vector<4x32xf32>
    %834 = arith.addf %831, %833 : vector<4x32xf32>
    %835 = math.tanh %834 : vector<4x32xf32>
    %cst_387 = arith.constant 1.000000e+00 : f32
    %836 = vector.broadcast %cst_387 : f32 to vector<4x32xf32>
    %837 = arith.subf %836, %830 : vector<4x32xf32>
    %838 = arith.mulf %837, %835 : vector<4x32xf32>
    %839 = arith.mulf %830, %775 : vector<4x32xf32>
    %840 = arith.addf %838, %839 : vector<4x32xf32>
    %c8_i32_388 = arith.constant 8 : i32
    %841 = arith.cmpi slt, %c7_i32_380, %c8_i32_388 : i32
    %842 = arith.select %841, %840, %775 : vector<4x32xf32>
    %c4_i32_389 = arith.constant 4 : i32
    %843 = arith.muli %c7_i32_380, %c4_i32_389 : i32
    %844 = arith.index_cast %843 : i32 to index
    %c0_390 = arith.constant 0 : index
    %845 = vector.load %arg20[%844, %c0_390] : memref<40x128xf32, #tpu.memory_space<vmem>>, vector<4x128xf32>
    %cst_391 = arith.constant dense<0.000000e+00> : vector<4x128xf32>
    %846 = tpu.matmul %807, %336, %cst_391 {dimension_numbers = #tpu.dot_dimension_numbers<[1], [0], [0], [1], [0, 0, 1, 1], [], []>, precision = #tpu.contract_precision<fp32>} : vector<4x32xf32>, vector<32x128xf32>, vector<4x128xf32> -> vector<4x128xf32>
    %847 = vector.broadcast %337 : vector<1x128xf32> to vector<4x128xf32>
    %848 = arith.addf %846, %847 : vector<4x128xf32>
    %849 = vector.extract_strided_slice %845 {offsets = [0, 0], sizes = [4, 32], strides = [1, 1]} : vector<4x128xf32> to vector<4x32xf32>
    %850 = vector.extract_strided_slice %848 {offsets = [0, 0], sizes = [4, 32], strides = [1, 1]} : vector<4x128xf32> to vector<4x32xf32>
    %851 = arith.addf %849, %850 : vector<4x32xf32>
    %852 = arith.negf %851 : vector<4x32xf32>
    %853 = math.exp %852 : vector<4x32xf32>
    %cst_392 = arith.constant 1.000000e+00 : f32
    %854 = vector.broadcast %cst_392 : f32 to vector<4x32xf32>
    %855 = arith.addf %854, %853 : vector<4x32xf32>
    %856 = arith.divf %854, %855 : vector<4x32xf32>
    %857 = vector.extract_strided_slice %845 {offsets = [0, 32], sizes = [4, 32], strides = [1, 1]} : vector<4x128xf32> to vector<4x32xf32>
    %858 = vector.extract_strided_slice %848 {offsets = [0, 32], sizes = [4, 32], strides = [1, 1]} : vector<4x128xf32> to vector<4x32xf32>
    %859 = arith.addf %857, %858 : vector<4x32xf32>
    %860 = arith.negf %859 : vector<4x32xf32>
    %861 = math.exp %860 : vector<4x32xf32>
    %cst_393 = arith.constant 1.000000e+00 : f32
    %862 = vector.broadcast %cst_393 : f32 to vector<4x32xf32>
    %863 = arith.addf %862, %861 : vector<4x32xf32>
    %864 = arith.divf %862, %863 : vector<4x32xf32>
    %865 = vector.extract_strided_slice %845 {offsets = [0, 64], sizes = [4, 32], strides = [1, 1]} : vector<4x128xf32> to vector<4x32xf32>
    %866 = vector.extract_strided_slice %848 {offsets = [0, 64], sizes = [4, 32], strides = [1, 1]} : vector<4x128xf32> to vector<4x32xf32>
    %867 = arith.mulf %856, %866 : vector<4x32xf32>
    %868 = arith.addf %865, %867 : vector<4x32xf32>
    %869 = math.tanh %868 : vector<4x32xf32>
    %cst_394 = arith.constant 1.000000e+00 : f32
    %870 = vector.broadcast %cst_394 : f32 to vector<4x32xf32>
    %871 = arith.subf %870, %864 : vector<4x32xf32>
    %872 = arith.mulf %871, %869 : vector<4x32xf32>
    %873 = arith.mulf %864, %807 : vector<4x32xf32>
    %874 = arith.addf %872, %873 : vector<4x32xf32>
    %c8_i32_395 = arith.constant 8 : i32
    %c7_i32_396 = arith.constant 7 : i32
    %875 = arith.minsi %c8_i32_395, %c7_i32_396 : i32
    %c4_i32_397 = arith.constant 4 : i32
    %876 = arith.muli %875, %c4_i32_397 : i32
    %877 = arith.index_cast %876 : i32 to index
    %c0_398 = arith.constant 0 : index
    %878 = vector.load %arg19[%877, %c0_398] : memref<32x128xf32, #tpu.memory_space<vmem>>, vector<4x128xf32>
    %cst_399 = arith.constant dense<0.000000e+00> : vector<4x128xf32>
    %879 = tpu.matmul %842, %334, %cst_399 {dimension_numbers = #tpu.dot_dimension_numbers<[1], [0], [0], [1], [0, 0, 1, 1], [], []>, precision = #tpu.contract_precision<fp32>} : vector<4x32xf32>, vector<32x128xf32>, vector<4x128xf32> -> vector<4x128xf32>
    %880 = vector.broadcast %335 : vector<1x128xf32> to vector<4x128xf32>
    %881 = arith.addf %879, %880 : vector<4x128xf32>
    %882 = vector.extract_strided_slice %878 {offsets = [0, 0], sizes = [4, 32], strides = [1, 1]} : vector<4x128xf32> to vector<4x32xf32>
    %883 = vector.extract_strided_slice %881 {offsets = [0, 0], sizes = [4, 32], strides = [1, 1]} : vector<4x128xf32> to vector<4x32xf32>
    %884 = arith.addf %882, %883 : vector<4x32xf32>
    %885 = arith.negf %884 : vector<4x32xf32>
    %886 = math.exp %885 : vector<4x32xf32>
    %cst_400 = arith.constant 1.000000e+00 : f32
    %887 = vector.broadcast %cst_400 : f32 to vector<4x32xf32>
    %888 = arith.addf %887, %886 : vector<4x32xf32>
    %889 = arith.divf %887, %888 : vector<4x32xf32>
    %890 = vector.extract_strided_slice %878 {offsets = [0, 32], sizes = [4, 32], strides = [1, 1]} : vector<4x128xf32> to vector<4x32xf32>
    %891 = vector.extract_strided_slice %881 {offsets = [0, 32], sizes = [4, 32], strides = [1, 1]} : vector<4x128xf32> to vector<4x32xf32>
    %892 = arith.addf %890, %891 : vector<4x32xf32>
    %893 = arith.negf %892 : vector<4x32xf32>
    %894 = math.exp %893 : vector<4x32xf32>
    %cst_401 = arith.constant 1.000000e+00 : f32
    %895 = vector.broadcast %cst_401 : f32 to vector<4x32xf32>
    %896 = arith.addf %895, %894 : vector<4x32xf32>
    %897 = arith.divf %895, %896 : vector<4x32xf32>
    %898 = vector.extract_strided_slice %878 {offsets = [0, 64], sizes = [4, 32], strides = [1, 1]} : vector<4x128xf32> to vector<4x32xf32>
    %899 = vector.extract_strided_slice %881 {offsets = [0, 64], sizes = [4, 32], strides = [1, 1]} : vector<4x128xf32> to vector<4x32xf32>
    %900 = arith.mulf %889, %899 : vector<4x32xf32>
    %901 = arith.addf %898, %900 : vector<4x32xf32>
    %902 = math.tanh %901 : vector<4x32xf32>
    %cst_402 = arith.constant 1.000000e+00 : f32
    %903 = vector.broadcast %cst_402 : f32 to vector<4x32xf32>
    %904 = arith.subf %903, %897 : vector<4x32xf32>
    %905 = arith.mulf %904, %902 : vector<4x32xf32>
    %906 = arith.mulf %897, %842 : vector<4x32xf32>
    %907 = arith.addf %905, %906 : vector<4x32xf32>
    %c8_i32_403 = arith.constant 8 : i32
    %908 = arith.cmpi slt, %c8_i32_395, %c8_i32_403 : i32
    %909 = arith.select %908, %907, %842 : vector<4x32xf32>
    %c4_i32_404 = arith.constant 4 : i32
    %910 = arith.muli %c8_i32_395, %c4_i32_404 : i32
    %911 = arith.index_cast %910 : i32 to index
    %c0_405 = arith.constant 0 : index
    %912 = vector.load %arg20[%911, %c0_405] : memref<40x128xf32, #tpu.memory_space<vmem>>, vector<4x128xf32>
    %cst_406 = arith.constant dense<0.000000e+00> : vector<4x128xf32>
    %913 = tpu.matmul %874, %336, %cst_406 {dimension_numbers = #tpu.dot_dimension_numbers<[1], [0], [0], [1], [0, 0, 1, 1], [], []>, precision = #tpu.contract_precision<fp32>} : vector<4x32xf32>, vector<32x128xf32>, vector<4x128xf32> -> vector<4x128xf32>
    %914 = vector.broadcast %337 : vector<1x128xf32> to vector<4x128xf32>
    %915 = arith.addf %913, %914 : vector<4x128xf32>
    %916 = vector.extract_strided_slice %912 {offsets = [0, 0], sizes = [4, 32], strides = [1, 1]} : vector<4x128xf32> to vector<4x32xf32>
    %917 = vector.extract_strided_slice %915 {offsets = [0, 0], sizes = [4, 32], strides = [1, 1]} : vector<4x128xf32> to vector<4x32xf32>
    %918 = arith.addf %916, %917 : vector<4x32xf32>
    %919 = arith.negf %918 : vector<4x32xf32>
    %920 = math.exp %919 : vector<4x32xf32>
    %cst_407 = arith.constant 1.000000e+00 : f32
    %921 = vector.broadcast %cst_407 : f32 to vector<4x32xf32>
    %922 = arith.addf %921, %920 : vector<4x32xf32>
    %923 = arith.divf %921, %922 : vector<4x32xf32>
    %924 = vector.extract_strided_slice %912 {offsets = [0, 32], sizes = [4, 32], strides = [1, 1]} : vector<4x128xf32> to vector<4x32xf32>
    %925 = vector.extract_strided_slice %915 {offsets = [0, 32], sizes = [4, 32], strides = [1, 1]} : vector<4x128xf32> to vector<4x32xf32>
    %926 = arith.addf %924, %925 : vector<4x32xf32>
    %927 = arith.negf %926 : vector<4x32xf32>
    %928 = math.exp %927 : vector<4x32xf32>
    %cst_408 = arith.constant 1.000000e+00 : f32
    %929 = vector.broadcast %cst_408 : f32 to vector<4x32xf32>
    %930 = arith.addf %929, %928 : vector<4x32xf32>
    %931 = arith.divf %929, %930 : vector<4x32xf32>
    %932 = vector.extract_strided_slice %912 {offsets = [0, 64], sizes = [4, 32], strides = [1, 1]} : vector<4x128xf32> to vector<4x32xf32>
    %933 = vector.extract_strided_slice %915 {offsets = [0, 64], sizes = [4, 32], strides = [1, 1]} : vector<4x128xf32> to vector<4x32xf32>
    %934 = arith.mulf %923, %933 : vector<4x32xf32>
    %935 = arith.addf %932, %934 : vector<4x32xf32>
    %936 = math.tanh %935 : vector<4x32xf32>
    %cst_409 = arith.constant 1.000000e+00 : f32
    %937 = vector.broadcast %cst_409 : f32 to vector<4x32xf32>
    %938 = arith.subf %937, %931 : vector<4x32xf32>
    %939 = arith.mulf %938, %936 : vector<4x32xf32>
    %940 = arith.mulf %931, %874 : vector<4x32xf32>
    %941 = arith.addf %939, %940 : vector<4x32xf32>
    %c9_i32 = arith.constant 9 : i32
    %c7_i32_410 = arith.constant 7 : i32
    %942 = arith.minsi %c9_i32, %c7_i32_410 : i32
    %c4_i32_411 = arith.constant 4 : i32
    %943 = arith.muli %942, %c4_i32_411 : i32
    %944 = arith.index_cast %943 : i32 to index
    %c0_412 = arith.constant 0 : index
    %945 = vector.load %arg19[%944, %c0_412] : memref<32x128xf32, #tpu.memory_space<vmem>>, vector<4x128xf32>
    %cst_413 = arith.constant dense<0.000000e+00> : vector<4x128xf32>
    %946 = tpu.matmul %909, %334, %cst_413 {dimension_numbers = #tpu.dot_dimension_numbers<[1], [0], [0], [1], [0, 0, 1, 1], [], []>, precision = #tpu.contract_precision<fp32>} : vector<4x32xf32>, vector<32x128xf32>, vector<4x128xf32> -> vector<4x128xf32>
    %947 = vector.broadcast %335 : vector<1x128xf32> to vector<4x128xf32>
    %948 = arith.addf %946, %947 : vector<4x128xf32>
    %949 = vector.extract_strided_slice %945 {offsets = [0, 0], sizes = [4, 32], strides = [1, 1]} : vector<4x128xf32> to vector<4x32xf32>
    %950 = vector.extract_strided_slice %948 {offsets = [0, 0], sizes = [4, 32], strides = [1, 1]} : vector<4x128xf32> to vector<4x32xf32>
    %951 = arith.addf %949, %950 : vector<4x32xf32>
    %952 = arith.negf %951 : vector<4x32xf32>
    %953 = math.exp %952 : vector<4x32xf32>
    %cst_414 = arith.constant 1.000000e+00 : f32
    %954 = vector.broadcast %cst_414 : f32 to vector<4x32xf32>
    %955 = arith.addf %954, %953 : vector<4x32xf32>
    %956 = arith.divf %954, %955 : vector<4x32xf32>
    %957 = vector.extract_strided_slice %945 {offsets = [0, 32], sizes = [4, 32], strides = [1, 1]} : vector<4x128xf32> to vector<4x32xf32>
    %958 = vector.extract_strided_slice %948 {offsets = [0, 32], sizes = [4, 32], strides = [1, 1]} : vector<4x128xf32> to vector<4x32xf32>
    %959 = arith.addf %957, %958 : vector<4x32xf32>
    %960 = arith.negf %959 : vector<4x32xf32>
    %961 = math.exp %960 : vector<4x32xf32>
    %cst_415 = arith.constant 1.000000e+00 : f32
    %962 = vector.broadcast %cst_415 : f32 to vector<4x32xf32>
    %963 = arith.addf %962, %961 : vector<4x32xf32>
    %964 = arith.divf %962, %963 : vector<4x32xf32>
    %965 = vector.extract_strided_slice %945 {offsets = [0, 64], sizes = [4, 32], strides = [1, 1]} : vector<4x128xf32> to vector<4x32xf32>
    %966 = vector.extract_strided_slice %948 {offsets = [0, 64], sizes = [4, 32], strides = [1, 1]} : vector<4x128xf32> to vector<4x32xf32>
    %967 = arith.mulf %956, %966 : vector<4x32xf32>
    %968 = arith.addf %965, %967 : vector<4x32xf32>
    %969 = math.tanh %968 : vector<4x32xf32>
    %cst_416 = arith.constant 1.000000e+00 : f32
    %970 = vector.broadcast %cst_416 : f32 to vector<4x32xf32>
    %971 = arith.subf %970, %964 : vector<4x32xf32>
    %972 = arith.mulf %971, %969 : vector<4x32xf32>
    %973 = arith.mulf %964, %909 : vector<4x32xf32>
    %974 = arith.addf %972, %973 : vector<4x32xf32>
    %c8_i32_417 = arith.constant 8 : i32
    %975 = arith.cmpi slt, %c9_i32, %c8_i32_417 : i32
    %976 = arith.select %975, %974, %909 : vector<4x32xf32>
    %c4_i32_418 = arith.constant 4 : i32
    %977 = arith.muli %c9_i32, %c4_i32_418 : i32
    %978 = arith.index_cast %977 : i32 to index
    %c0_419 = arith.constant 0 : index
    %979 = vector.load %arg20[%978, %c0_419] : memref<40x128xf32, #tpu.memory_space<vmem>>, vector<4x128xf32>
    %cst_420 = arith.constant dense<0.000000e+00> : vector<4x128xf32>
    %980 = tpu.matmul %941, %336, %cst_420 {dimension_numbers = #tpu.dot_dimension_numbers<[1], [0], [0], [1], [0, 0, 1, 1], [], []>, precision = #tpu.contract_precision<fp32>} : vector<4x32xf32>, vector<32x128xf32>, vector<4x128xf32> -> vector<4x128xf32>
    %981 = vector.broadcast %337 : vector<1x128xf32> to vector<4x128xf32>
    %982 = arith.addf %980, %981 : vector<4x128xf32>
    %983 = vector.extract_strided_slice %979 {offsets = [0, 0], sizes = [4, 32], strides = [1, 1]} : vector<4x128xf32> to vector<4x32xf32>
    %984 = vector.extract_strided_slice %982 {offsets = [0, 0], sizes = [4, 32], strides = [1, 1]} : vector<4x128xf32> to vector<4x32xf32>
    %985 = arith.addf %983, %984 : vector<4x32xf32>
    %986 = arith.negf %985 : vector<4x32xf32>
    %987 = math.exp %986 : vector<4x32xf32>
    %cst_421 = arith.constant 1.000000e+00 : f32
    %988 = vector.broadcast %cst_421 : f32 to vector<4x32xf32>
    %989 = arith.addf %988, %987 : vector<4x32xf32>
    %990 = arith.divf %988, %989 : vector<4x32xf32>
    %991 = vector.extract_strided_slice %979 {offsets = [0, 32], sizes = [4, 32], strides = [1, 1]} : vector<4x128xf32> to vector<4x32xf32>
    %992 = vector.extract_strided_slice %982 {offsets = [0, 32], sizes = [4, 32], strides = [1, 1]} : vector<4x128xf32> to vector<4x32xf32>
    %993 = arith.addf %991, %992 : vector<4x32xf32>
    %994 = arith.negf %993 : vector<4x32xf32>
    %995 = math.exp %994 : vector<4x32xf32>
    %cst_422 = arith.constant 1.000000e+00 : f32
    %996 = vector.broadcast %cst_422 : f32 to vector<4x32xf32>
    %997 = arith.addf %996, %995 : vector<4x32xf32>
    %998 = arith.divf %996, %997 : vector<4x32xf32>
    %999 = vector.extract_strided_slice %979 {offsets = [0, 64], sizes = [4, 32], strides = [1, 1]} : vector<4x128xf32> to vector<4x32xf32>
    %1000 = vector.extract_strided_slice %982 {offsets = [0, 64], sizes = [4, 32], strides = [1, 1]} : vector<4x128xf32> to vector<4x32xf32>
    %1001 = arith.mulf %990, %1000 : vector<4x32xf32>
    %1002 = arith.addf %999, %1001 : vector<4x32xf32>
    %1003 = math.tanh %1002 : vector<4x32xf32>
    %cst_423 = arith.constant 1.000000e+00 : f32
    %1004 = vector.broadcast %cst_423 : f32 to vector<4x32xf32>
    %1005 = arith.subf %1004, %998 : vector<4x32xf32>
    %1006 = arith.mulf %1005, %1003 : vector<4x32xf32>
    %1007 = arith.mulf %998, %941 : vector<4x32xf32>
    %1008 = arith.addf %1006, %1007 : vector<4x32xf32>
    %c10_i32 = arith.constant 10 : i32
    %c0_424 = arith.constant 0 : index
    %c0_425 = arith.constant 0 : index
    %1009 = vector.load %arg13[%c0_424, %c0_425] : memref<32x50xf32, #tpu.memory_space<vmem>>, vector<32x50xf32>
    %cst_426 = arith.constant dense<0.000000e+00> : vector<4x50xf32>
    %1010 = tpu.matmul %976, %1009, %cst_426 {dimension_numbers = #tpu.dot_dimension_numbers<[1], [0], [0], [1], [0, 0, 1, 1], [], []>, precision = #tpu.contract_precision<fp32>} : vector<4x32xf32>, vector<32x50xf32>, vector<4x50xf32> -> vector<4x50xf32>
    %c0_427 = arith.constant 0 : index
    %c0_428 = arith.constant 0 : index
    %1011 = vector.load %arg14[%c0_427, %c0_428] : memref<32x50xf32, #tpu.memory_space<vmem>>, vector<32x50xf32>
    %cst_429 = arith.constant dense<0.000000e+00> : vector<4x50xf32>
    %1012 = tpu.matmul %1008, %1011, %cst_429 {dimension_numbers = #tpu.dot_dimension_numbers<[1], [0], [0], [1], [0, 0, 1, 1], [], []>, precision = #tpu.contract_precision<fp32>} : vector<4x32xf32>, vector<32x50xf32>, vector<4x50xf32> -> vector<4x50xf32>
    %1013 = arith.addf %1010, %1012 : vector<4x50xf32>
    %c0_430 = arith.constant 0 : index
    %c0_431 = arith.constant 0 : index
    %1014 = vector.load %arg15[%c0_430, %c0_431] : memref<1x50xf32, #tpu.memory_space<vmem>>, vector<1x50xf32>
    %1015 = vector.broadcast %1014 : vector<1x50xf32> to vector<4x50xf32>
    %1016 = arith.addf %1013, %1015 : vector<4x50xf32>
    %c0_432 = arith.constant 0 : index
    %c0_433 = arith.constant 0 : index
    %1017 = vector.load %arg16[%c0_432, %c0_433] : memref<4x50xf32, #tpu.memory_space<vmem>>, vector<4x50xf32>
    tpu.vector_store %arg16[%c0_432, %c0_433], %1016 {strides = array<i32>} : memref<4x50xf32, #tpu.memory_space<vmem>>, vector<4x50xf32>,
    return
  }
  func.func @transform_0(%arg0: i32, %arg1: memref<32xi32, #tpu.memory_space<smem>>, %arg2: memref<40xi32, #tpu.memory_space<smem>>) -> (i32, i32) {
    %c0_i32 = arith.constant 0 : i32
    %c0_i32_0 = arith.constant 0 : i32
    %c0_i32_1 = arith.constant 0 : i32
    return %c0_i32, %c0_i32_0 : i32, i32
  }
  func.func @transform_1(%arg0: i32, %arg1: memref<32xi32, #tpu.memory_space<smem>>, %arg2: memref<40xi32, #tpu.memory_space<smem>>) -> (i32, i32) {
    %c0_i32 = arith.constant 0 : i32
    %c0_i32_0 = arith.constant 0 : i32
    %c0_i32_1 = arith.constant 0 : i32
    return %c0_i32, %c0_i32_0 : i32, i32
  }
  func.func @transform_2(%arg0: i32, %arg1: memref<32xi32, #tpu.memory_space<smem>>, %arg2: memref<40xi32, #tpu.memory_space<smem>>) -> (i32, i32) {
    %c0_i32 = arith.constant 0 : i32
    %c0_i32_0 = arith.constant 0 : i32
    %c0_i32_1 = arith.constant 0 : i32
    return %c0_i32, %c0_i32_0 : i32, i32
  }
  func.func @transform_3(%arg0: i32, %arg1: memref<32xi32, #tpu.memory_space<smem>>, %arg2: memref<40xi32, #tpu.memory_space<smem>>) -> (i32, i32) {
    %c0_i32 = arith.constant 0 : i32
    %c0_i32_0 = arith.constant 0 : i32
    %c0_i32_1 = arith.constant 0 : i32
    return %c0_i32, %c0_i32_0 : i32, i32
  }
  func.func @transform_4(%arg0: i32, %arg1: memref<32xi32, #tpu.memory_space<smem>>, %arg2: memref<40xi32, #tpu.memory_space<smem>>) -> (i32, i32) {
    %c0_i32 = arith.constant 0 : i32
    %c0_i32_0 = arith.constant 0 : i32
    %c0_i32_1 = arith.constant 0 : i32
    return %c0_i32, %c0_i32_0 : i32, i32
  }
  func.func @transform_5(%arg0: i32, %arg1: memref<32xi32, #tpu.memory_space<smem>>, %arg2: memref<40xi32, #tpu.memory_space<smem>>) -> (i32, i32) {
    %c0_i32 = arith.constant 0 : i32
    %c0_i32_0 = arith.constant 0 : i32
    %c0_i32_1 = arith.constant 0 : i32
    return %c0_i32, %c0_i32_0 : i32, i32
  }
  func.func @transform_6(%arg0: i32, %arg1: memref<32xi32, #tpu.memory_space<smem>>, %arg2: memref<40xi32, #tpu.memory_space<smem>>) -> (i32, i32) {
    %c0_i32 = arith.constant 0 : i32
    %c0_i32_0 = arith.constant 0 : i32
    %c0_i32_1 = arith.constant 0 : i32
    return %c0_i32, %c0_i32_0 : i32, i32
  }
  func.func @transform_7(%arg0: i32, %arg1: memref<32xi32, #tpu.memory_space<smem>>, %arg2: memref<40xi32, #tpu.memory_space<smem>>) -> (i32, i32) {
    %c0_i32 = arith.constant 0 : i32
    %c0_i32_0 = arith.constant 0 : i32
    %c0_i32_1 = arith.constant 0 : i32
    return %c0_i32, %c0_i32_0 : i32, i32
  }
  func.func @transform_8(%arg0: i32, %arg1: memref<32xi32, #tpu.memory_space<smem>>, %arg2: memref<40xi32, #tpu.memory_space<smem>>) -> (i32, i32) {
    %c0_i32 = arith.constant 0 : i32
    %c0_i32_0 = arith.constant 0 : i32
    %c0_i32_1 = arith.constant 0 : i32
    return %c0_i32, %c0_i32_0 : i32, i32
  }
  func.func @transform_9(%arg0: i32, %arg1: memref<32xi32, #tpu.memory_space<smem>>, %arg2: memref<40xi32, #tpu.memory_space<smem>>) -> (i32, i32) {
    %c0_i32 = arith.constant 0 : i32
    %c0_i32_0 = arith.constant 0 : i32
    %c0_i32_1 = arith.constant 0 : i32
    return %c0_i32, %c0_i32_0 : i32, i32
  }
  func.func @transform_10(%arg0: i32, %arg1: memref<32xi32, #tpu.memory_space<smem>>, %arg2: memref<40xi32, #tpu.memory_space<smem>>) -> (i32, i32) {
    %c0_i32 = arith.constant 0 : i32
    %c0_i32_0 = arith.constant 0 : i32
    %c0_i32_1 = arith.constant 0 : i32
    return %c0_i32, %c0_i32_0 : i32, i32
  }
  func.func @transform_11(%arg0: i32, %arg1: memref<32xi32, #tpu.memory_space<smem>>, %arg2: memref<40xi32, #tpu.memory_space<smem>>) -> (i32, i32) {
    %c0_i32 = arith.constant 0 : i32
    %c0_i32_0 = arith.constant 0 : i32
    %c0_i32_1 = arith.constant 0 : i32
    return %c0_i32, %c0_i32_0 : i32, i32
  }
  func.func @transform_12(%arg0: i32, %arg1: memref<32xi32, #tpu.memory_space<smem>>, %arg2: memref<40xi32, #tpu.memory_space<smem>>) -> (i32, i32) {
    %c0_i32 = arith.constant 0 : i32
    %c0_i32_0 = arith.constant 0 : i32
    %c0_i32_1 = arith.constant 0 : i32
    return %c0_i32, %c0_i32_0 : i32, i32
  }
  func.func @transform_13(%arg0: i32, %arg1: memref<32xi32, #tpu.memory_space<smem>>, %arg2: memref<40xi32, #tpu.memory_space<smem>>) -> (i32, i32) {
    %c0_i32 = arith.constant 0 : i32
    %c0_i32_0 = arith.constant 0 : i32
    %c0_i32_1 = arith.constant 0 : i32
    return %c0_i32, %c0_i32_0 : i32, i32
  }
}

</mosaic_0001>

<bundles_post_ra>
// kernel: gru_model_forward.1
= control target key start
LH: loop header
LB: loop body
LE: loop exit
PB: predicated region body
PF: predicated region fallthrough
CT: control target
= control target key end

     0   :  { %s18171_s0 = inlined_call_operand.vmem [shape: s32[32], index: 0, kind: input, shape index: {}]   ;;  %s18172_s2 = inlined_call_operand.vmem [shape: f32[50,32], index: 2, kind: input, shape index: {}]   ;;  %s18173_s3 = inlined_call_operand.vmem [shape: f32[40,32], index: 3, kind: input, shape index: {}]   ;;  %s18174_s4 = inlined_call_operand.vmem [shape: f32[32,128], index: 4, kind: input, shape index: {}]   ;;  %s18175_s5 = inlined_call_operand.hbm [shape: f32[1,128], index: 5, kind: input, shape index: {}]   ;;  %s18176_s6 = inlined_call_operand.vmem [shape: f32[32,128], index: 6, kind: input, shape index: {}]   ;;  %s18177_s7 = inlined_call_operand.hbm [shape: f32[1,128], index: 7, kind: input, shape index: {}]   ;;  %s18178_s8 = inlined_call_operand.vmem [shape: f32[32,128], index: 8, kind: input, shape index: {}]   ;;  %s18179_s9 = inlined_call_operand.hbm [shape: f32[1,128], index: 9, kind: input, shape index: {}]   ;;  %s18180_s10 = inlined_call_operand.vmem [shape: f32[32,128], index: 10, kind: input, shape index: {}]   ;;  %s18181_s11 = inlined_call_operand.hbm [shape: f32[1,128], index: 11, kind: input, shape index: {}]   ;;  %s18182_s12 = inlined_call_operand.vmem [shape: f32[32,50], index: 12, kind: input, shape index: {}]   ;;  %s18183_s13 = inlined_call_operand.vmem [shape: f32[32,50], index: 13, kind: input, shape index: {}]   ;;  %s18184_s14 = inlined_call_operand.hbm [shape: f32[1,50], index: 14, kind: input, shape index: {}]   ;;  %s18185_s15 = inlined_call_operand.hbm [shape: f32[4,50], index: 15, kind: output, shape index: {}]   ;;  %s18186_s1 = inlined_call_operand.vmem [shape: s32[40], index: 1, kind: input, shape index: {}]  }
   0x1   :  { %18189 = sst [smem:[#allocation24_spill]] %s18182_s12  ;;  %s20_s20 = sshll.u32 %s18171_s0, 4  ;;  %s21_s20 = int_to_ptr.vmem [resolvable:$true] %s20_s20 }
   0x2   :  { %18190 = sst [smem:[#allocation25_spill]] %s18185_s15  ;;  %s24_s23 = sshll.u32 %s18186_s1, 4  ;;  %s25_s23 = int_to_ptr.vmem [resolvable:$true] %s24_s23 }
   0x3   :  { %s15829_s24 = scalar_lea.vmem %s21_s20, 16  ;;  %p15834_p1 = scmp.lt.s32.totalorder %s21_s20, %s21_s20 }
   0x4   :  { %p15830_p0 = scmp.ne.s32.totalorder %s21_s20, %s15829_s24  ;;  %p15835_p2 = scmp.lt.s32.totalorder %s15829_s24, %s15829_s24 }
   0x6   :  { %p15836_p3 = por %p15835_p2, %p15834_p1 }
   0x8   :  { %p15837_p4 = pnand %p15836_p3, %p15830_p0 }
   0xa   :  { %15840 = shalt.err (!%p15837_p4)  }
   0xb   :  { %s15995_s25 = smov [#allocation7]   ;;  %s15841_s26 = scalar_lea.vmem %s25_s23, 16 }
   0xc   :  { %23 = dma.vmem_to_smem %s21_s20, 16, %s15995_s25, [#allocation6] }
   0xd   :  { %p15842_p5 = scmp.ne.s32.totalorder %s25_s23, %s15841_s26  ;;  %p15846_p6 = scmp.lt.s32.totalorder %s25_s23, %s25_s23 }
   0xe   :  { %p15847_p7 = scmp.lt.s32.totalorder %s15841_s26, %s15841_s26 }
  0x10   :  { %p15848_p8 = por %p15847_p7, %p15846_p6 }
  0x12   :  { %p15849_p9 = pnand %p15848_p8, %p15842_p5 }
  0x14   :  { %15852 = shalt.err (!%p15849_p9)  }
  0x15   :  { %s15996_s0 = smov [#allocation8]  }
  0x16   :  { %27 = dma.vmem_to_smem %s25_s23, 16, %s15996_s0, [#allocation6] }
  0x17   :  { %15985 = dma.done.wait [#allocation6], 32 }
  0x18   :  { %15986 = vsyncadd [#allocation6], 4294967264 }
  0x19   :  { %29 = sfence }
  0x1a   :  { %30 = vsyncpa [#allocation10], 0 }
  0x1b   :  { %31 = vsyncpa [#allocation13], 0 }
  0x1c   :  { %32 = vsyncpa [#allocation16], 0 }
  0x1d   :  { %33 = vsyncpa [#allocation11], 0  ;;  %s15997_s1 = smov [#allocation12]   ;;  %s15998_s28 = smov [#allocation15]  }
  0x1e   :  { %s58_s27 = sshll.u32 %s15997_s1, 4  ;;  %s82_s29 = sshll.u32 %s15998_s28, 4  ;;  %s59_s27 = int_to_ptr.vmem [resolvable:$true] %s58_s27  ;;  %s83_s29 = int_to_ptr.vmem [resolvable:$true] %s82_s29 }
  0x1f   :  { %s15853_s17 = scalar_lea.hbm %s18177_s7, 16 }
  0x20   :  { %p15854_p10 = scmp.ne.s32.totalorder %s18177_s7, %s15853_s17  ;;  %p15857_p11 = scmp.lt.u32.totalorder %s15853_s17, %s18177_s7 }
  0x22   :  { %p15859_p12 = pnand %p15857_p11, %p15854_p10 }
  0x24   :  { %15862 = shalt.err (!%p15859_p12)
}
  0x25   :  { %s15863_s22 = scalar_lea.vmem %s59_s27, 16  ;;  %s15867_s23 = scalar_lea.vmem %s59_s27, 32 }
  0x26   :  { %p15864_p13 = scmp.ne.s32.totalorder %s59_s27, %s15863_s22  ;;  %p15868_p0 = scmp.lt.s32.totalorder %s59_s27, %s59_s27 }
  0x27   :  { %p15869_p1 = scmp.lt.s32.totalorder %s15867_s23, %s15863_s22 }
  0x29   :  { %p15870_p2 = por %p15869_p1, %p15868_p0 }
  0x2b   :  { %p15871_p3 = pnand %p15870_p2, %p15864_p13 }
  0x2d   :  { %15874 = shalt.err (!%p15871_p3)
}
  0x2e   :  { %61 = dma.hbm_to_vmem [thread:$0]  %s18177_s7, 16, %s59_s27, [#allocation13]  }
  0x2f   :  { %s15875_s1 = scalar_lea.hbm %s18181_s11, 16 }
  0x30   :  { %p15876_p4 = scmp.ne.s32.totalorder %s18181_s11, %s15875_s1  ;;  %p15879_p5 = scmp.lt.u32.totalorder %s15875_s1, %s18181_s11 }
  0x32   :  { %p15881_p6 = pnand %p15879_p5, %p15876_p4 }
  0x34   :  { %15884 = shalt.err (!%p15881_p6)
}
  0x35   :  { %s15885_s18 = scalar_lea.vmem %s83_s29, 16  ;;  %s15889_s19 = scalar_lea.vmem %s83_s29, 32 }
  0x36   :  { %p15886_p7 = scmp.ne.s32.totalorder %s83_s29, %s15885_s18  ;;  %p15890_p8 = scmp.lt.s32.totalorder %s83_s29, %s83_s29 }
  0x37   :  { %p15891_p9 = scmp.lt.s32.totalorder %s15889_s19, %s15885_s18 }
  0x39   :  { %p15892_p10 = por %p15891_p9, %p15890_p8 }
  0x3b   :  { %p15893_p11 = pnand %p15892_p10, %p15886_p7 }
  0x3d   :  { %15896 = shalt.err (!%p15893_p11)
}
  0x3e   :  { %85 = dma.hbm_to_vmem [thread:$0]  %s18181_s11, 16, %s83_s29, [#allocation16]  }
  0x3f   :  { %s15999_s20 = smov [#allocation9]   ;;  %s16000_s22 = smov [#allocation14]  }
  0x40   :  { %s46_s21 = sshll.u32 %s15999_s20, 4  ;;  %s70_s23 = sshll.u32 %s16000_s22, 4  ;;  %s47_s21 = int_to_ptr.vmem [resolvable:$true] %s46_s21  ;;  %s71_s23 = int_to_ptr.vmem [resolvable:$true] %s70_s23 }
  0x41   :  { %s15897_s26 = scalar_lea.hbm %s18175_s5, 16 }
  0x42   :  { %p15898_p12 = scmp.ne.s32.totalorder %s18175_s5, %s15897_s26  ;;  %p15901_p13 = scmp.lt.u32.totalorder %s15897_s26, %s18175_s5 }
  0x44   :  { %p15903_p0 = pnand %p15901_p13, %p15898_p12 }
  0x46   :  { %15906 = shalt.err (!%p15903_p0)
}
  0x47   :  { %s15907_s11 = scalar_lea.vmem %s47_s21, 16  ;;  %s15911_s29 = scalar_lea.vmem %s47_s21, 32 }
  0x48   :  { %p15908_p1 = scmp.ne.s32.totalorder %s47_s21, %s15907_s11  ;;  %p15912_p2 = scmp.lt.s32.totalorder %s47_s21, %s47_s21 }
  0x49   :  { %p15913_p3 = scmp.lt.s32.totalorder %s15911_s29, %s15907_s11 }
  0x4b   :  { %p15914_p4 = por %p15913_p3, %p15912_p2 }
  0x4d   :  { %p15915_p5 = pnand %p15914_p4, %p15908_p1 }
  0x4f   :  { %15918 = shalt.err (!%p15915_p5)
}
  0x50   :  { %49 = dma.hbm_to_vmem [thread:$0]  %s18175_s5, 16, %s47_s21, [#allocation10]  }
  0x51   :  { %s15919_s7 = scalar_lea.hbm %s18179_s9, 16 }
  0x52   :  { %p15920_p6 = scmp.ne.s32.totalorder %s18179_s9, %s15919_s7  ;;  %p15923_p7 = scmp.lt.u32.totalorder %s15919_s7, %s18179_s9 }
  0x54   :  { %p15925_p8 = pnand %p15923_p7, %p15920_p6 }
  0x56   :  { %15928 = shalt.err (!%p15925_p8)
}
  0x57   :  { %s15929_s25 = scalar_lea.vmem %s71_s23, 16  ;;  %s15933_s26 = scalar_lea.vmem %s71_s23, 32 }
  0x58   :  { %p15930_p9 = scmp.ne.s32.totalorder %s71_s23, %s15929_s25  ;;  %p15934_p10 = scmp.lt.s32.totalorder %s71_s23, %s71_s23 }
  0x59   :  { %p15935_p11 = scmp.lt.s32.totalorder %s15933_s26, %s15929_s25 }
  0x5b   :  { %p15936_p12 = por %p15935_p11, %p15934_p10 }
  0x5d   :  { %p15937_p13 = pnand %p15936_p12, %p15930_p9 }
  0x5f   :  { %15940 = shalt.err (!%p15937_p13)
}
  0x60   :  { %73 = dma.hbm_to_vmem [thread:$0]  %s18179_s9, 16, %s71_s23, [#allocation13]  }
  0x61   :  { %s16001_s0 = smov [#allocation17]   ;;  %s15941_s11 = scalar_lea.hbm %s18184_s14, 16 }
  0x62   :  { %s96_s1 = sshll.u32 %s16001_s0, 4  ;;  %p15942_p0 = scmp.ne.s32.totalorder %s18184_s14, %s15941_s11  ;;  %s97_s1 = int_to_ptr.vmem [resolvable:$true] %s96_s1 }
  0x63   :  { %p15945_p1 = scmp.lt.u32.totalorder %s15941_s11, %s18184_s14 }
  0x65   :  { %p15947_p2 = pnand %p15945_p1, %p15942_p0 }
  0x67   :  { %15950 = shalt.err (!%p15947_p2)
}
  0x68   :  { %s15951_s19 = scalar_lea.vmem %s97_s1, 16  ;;  %s15955_s9 = scalar_lea.vmem %s97_s1, 32 }
  0x69   :  { %p15952_p3 = scmp.ne.s32.totalorder %s97_s1, %s15951_s19  ;;  %p15956_p4 = scmp.lt.s32.totalorder %s97_s1, %s97_s1 }
  0x6a   :  { %p15957_p5 = scmp.lt.s32.totalorder %s15955_s9, %s15951_s19 }
  0x6c   :  { %p15958_p6 = por %p15957_p5, %p15956_p4 }
  0x6e   :  { %p15959_p7 = pnand %p15958_p6, %p15952_p3 }
  0x70   :  { %15962 = shalt.err (!%p15959_p7)
}
  0x71   :  { %99 = dma.hbm_to_vmem [thread:$0]  %s18184_s14, 16, %s97_s1, [#allocation16]  }
  0x72   :  { %15987 = dma.done.wait [#allocation10], 16  }
  0x73   :  { %15988 = vsyncadd [#allocation10], 4294967280 }
  0x74   :  { %15989 = dma.done.wait [#allocation13], 32  }
  0x75   :  { %15990 = vsyncadd [#allocation13], 4294967264 }
  0x76   :  { %15991 = dma.done.wait [#allocation16], 32  }
  0x77   :  { %15992 = vsyncadd [#allocation16], 4294967264  ;;  %s115_s27 = sld [smem:[#allocation7]]  ;;  %s12272_s25 = sld [smem:[#allocation7 + $0x1]]  ;;  %vm118_vm0 = vcmask 253952   ;;  %vm248_vm1 = vcmask 261120  }
  0x78   :  { %s12269_s20 = sld [smem:[#allocation7 + $0x8]]  ;;  %s12273_s26 = sld [smem:[#allocation7 + $0x9]]  ;;  %vm16003_vm2 = vmmov 0   ;;  %vm12178_vm3 = vcmask 404480  }
  0x79   :  { %s12270_s22 = sld [smem:[#allocation7 + $0x10]]  ;;  %s12274_s5 = sld [smem:[#allocation7 + $0x11]] }
  0x7a   :  { %s12271_s24 = sld [smem:[#allocation7 + $0x18]]  ;;  %s12275_s21 = sld [smem:[#allocation7 + $0x19]] }
  0x7b   :  { %s16154_s0 = sld [smem:[#allocation7 + $0x4]]  ;;  %s12276_s15 = sld [smem:[#allocation7 + $0x2]] }
  0x7c   :  { %s16156_s28 = sld [smem:[#allocation7 + $0xc]]  ;;  %s16218_s16 = sld [smem:[#allocation7 + $0xb]] }
  0x7d   :  { %s16158_s14 = sld [smem:[#allocation7 + $0x14]]  ;;  %s116_s29 = scalar_lea.vmem %s18172_s2, %s115_s27 }
  0x7e   :  { %s16160_s1 = sld [smem:[#allocation7 + $0x1c]]  ;;  %s121_s18 = scalar_lea.vmem %s18172_s2, %s12269_s20  ;;  %v117_v0 = vld [vmem:[%s116_s29] sm:$0x1] }
  0x7f   :  { %v122_v1 = vld [vmem:[%s121_s18] sm:$0x1]  ;;  %s125_s23 = scalar_lea.vmem %s18172_s2, %s12270_s22  ;;  %119 = vst.msk [vmem:[#allocation2] sm:$0x1] %vm118_vm0, %v117_v0  ;;  %s133_s30 = scalar_lea.vmem %s18172_s2, %s12272_s25 }
  0x80   :  { %s129_s12 = scalar_lea.vmem %s18172_s2, %s12271_s24  ;;  %123 = vst.msk [vmem:[#allocation2 + $0x1] sm:$0x1] %vm118_vm0, %v122_v1  ;;  %v126_v2 = vld [vmem:[%s125_s23] sm:$0x1]  ;;  %s137_s22 = scalar_lea.vmem %s18172_s2, %s12273_s26 }
  0x81   :  { %v130_v3 = vld [vmem:[%s129_s12] sm:$0x1]  ;;  %127 = vst.msk [vmem:[#allocation2 + $0x2] sm:$0x1] %vm118_vm0, %v126_v2  ;;  %s141_s12 = scalar_lea.vmem %s18172_s2, %s12274_s5  ;;  %s145_s25 = scalar_lea.vmem %s18172_s2, %s12275_s21 }
  0x82   :  { %131 = vst.msk [vmem:[#allocation2 + $0x3] sm:$0x1] %vm118_vm0, %v130_v3  ;;  %v134_v4 = vld [vmem:[%s133_s30] sm:$0x1]  ;;  %s181_s19 = scalar_lea.vmem %s18172_s2, %s16154_s0  ;;  %s185_s7 = scalar_lea.vmem %s18172_s2, %s16156_s28 }
  0x83   :  { %v138_v5 = vld [vmem:[%s137_s22] sm:$0x1]  ;;  %135 = vst.msk [vmem:[#allocation2 + $0x4] sm:$0x1] %vm118_vm0, %v134_v4  ;;  %s189_s27 = scalar_lea.vmem %s18172_s2, %s16158_s14  ;;  %s12288_s0 = sld [smem:[#allocation7 + $0x5]] }
  0x84   :  { %139 = vst.msk [vmem:[#allocation2 + $0x5] sm:$0x1] %vm118_vm0, %v138_v5  ;;  %v142_v6 = vld [vmem:[%s141_s12] sm:$0x1]  ;;  %s193_s11 = scalar_lea.vmem %s18172_s2, %s16160_s1  ;;  %s12289_s28 = sld [smem:[#allocation7 + $0xd]] }
  0x85   :  { %v146_v7 = vld [vmem:[%s145_s25] sm:$0x1]  ;;  %143 = vst.msk [vmem:[#allocation2 + $0x6] sm:$0x1] %vm118_vm0, %v142_v6  ;;  %s12290_s29 = sld [smem:[#allocation7 + $0x15]]  ;;  %s12277_s14 = sld [smem:[#allocation7 + $0xa]] }
  0x86   :  { %147 = vst.msk [vmem:[#allocation2 + $0x7] sm:$0x1] %vm118_vm0, %v146_v7  ;;  %v182_v8 = vld [vmem:[%s181_s19] sm:$0x1]  ;;  %s12291_s22 = sld [smem:[#allocation7 + $0x1d]]  ;;  %s12278_s24 = sld [smem:[#allocation7 + $0x12]] }
  0x87   :  { %v186_v9 = vld [vmem:[%s185_s7] sm:$0x1]  ;;  %183 = vst.msk [vmem:[#allocation2 + $0x10] sm:$0x1] %vm118_vm0, %v182_v8  ;;  %s16214_s12 = sld [smem:[#allocation7 + $0x1a]]  ;;  %s16216_s1 = sld [smem:[#allocation7 + $0x3]] }
  0x88   :  { %187 = vst.msk [vmem:[#allocation2 + $0x11] sm:$0x1] %vm118_vm0, %v186_v9  ;;  %v190_v10 = vld [vmem:[%s189_s27] sm:$0x1]  ;;  %s16220_s17 = sld [smem:[#allocation7 + $0x13]]  ;;  %s149_s26 = scalar_lea.vmem %s18172_s2, %s12276_s15 }
  0x89   :  { %v194_v11 = vld [vmem:[%s193_s11] sm:$0x1]  ;;  %191 = vst.msk [vmem:[#allocation2 + $0x12] sm:$0x1] %vm118_vm0, %v190_v10  ;;  %s197_s18 = scalar_lea.vmem %s18172_s2, %s12288_s0  ;;  %s16227_s19 = sld [smem:[#allocation7 + $0x1b]] }
  0x8a   :  { %195 = vst.msk [vmem:[#allocation2 + $0x13] sm:$0x1] %vm118_vm0, %v194_v11  ;;  %v198_v14 = vld [vmem:[%s197_s18] sm:$0x1]  ;;  %s201_s7 = scalar_lea.vmem %s18172_s2, %s12289_s28  ;;  %s169_s30 = scalar_lea.vmem %s18172_s2, %s16218_s16 }
  0x8b   :  { %s205_s27 = scalar_lea.vmem %s18172_s2, %s12290_s29  ;;  %199 = vst.msk [vmem:[#allocation2 + $0x14] sm:$0x1] %vm118_vm0, %v198_v14  ;;  %v202_v15 = vld [vmem:[%s201_s7] sm:$0x1]  ;;  %s153_s18 = scalar_lea.vmem %s18172_s2, %s12277_s14 }
  0x8c   :  { %v206_v16 = vld [vmem:[%s205_s27] sm:$0x1]  ;;  %s209_s11 = scalar_lea.vmem %s18172_s2, %s12291_s22  ;;  %203 = vst.msk [vmem:[#allocation2 + $0x15] sm:$0x1] %vm118_vm0, %v202_v15  ;;  %s157_s22 = scalar_lea.vmem %s18172_s2, %s12278_s24 }
  0x8d   :  { %v16222_v12 = vld [vmem:[#allocation2] sm:$0xff]  ;;  %207 = vst.msk [vmem:[#allocation2 + $0x16] sm:$0x1] %vm118_vm0, %v206_v16  ;;  %s161_s5 = scalar_lea.vmem %s18172_s2, %s16214_s12  ;;  %s165_s20 = scalar_lea.vmem %s18172_s2, %s16216_s1 }
  0x8e   :  { %v249_v13 = vsel %vm248_vm1, %v16222_v12, 0.0  ;;  %v210_v17 = vld [vmem:[%s209_s11] sm:$0x1]  ;;  %s173_s25 = scalar_lea.vmem %s18172_s2, %s16220_s17  ;;  %s12292_s28 = sld [smem:[#allocation7 + $0x6]] }
  0x8f   :  { %250 = vadd.xlane.f32.xlu0 %v249_v13  ;;  %v150_v18 = vld [vmem:[%s149_s26] sm:$0x1]  ;;  %211 = vst.msk [vmem:[#allocation2 + $0x17] sm:$0x1] %vm118_vm0, %v210_v17  ;;  %s177_s26 = scalar_lea.vmem %s18172_s2, %s16227_s19  ;;  %s12293_s16 = sld [smem:[#allocation7 + $0xe]] }
  0x90   :  { %151 = vst.msk [vmem:[#allocation2 + $0x8] sm:$0x1] %vm118_vm0, %v150_v18  ;;  %v154_v19 = vld [vmem:[%s153_s18] sm:$0x1]  ;;  %s12294_s29 = sld [smem:[#allocation7 + $0x16]]  ;;  %s12296_s18 = sld [smem:[#allocation7 + $0x7]] }
  0x91   :  { %v158_v20 = vld [vmem:[%s157_s22] sm:$0x1]  ;;  %155 = vst.msk [vmem:[#allocation2 + $0x9] sm:$0x1] %vm118_vm0, %v154_v19  ;;  %s12295_s17 = sld [smem:[#allocation7 + $0x1e]]  ;;  %s16281_s9 = sld [smem:[#allocation7 + $0xf]] }
  0x92   :  { %159 = vst.msk [vmem:[#allocation2 + $0xa] sm:$0x1] %vm118_vm0, %v158_v20  ;;  %v162_v21 = vld [vmem:[%s161_s5] sm:$0x1]  ;;  %s16283_s23 = sld [smem:[#allocation7 + $0x17]]  ;;  %s16287_s15 = sld [smem:[#allocation8]] }
  0x93   :  { %v166_v22 = vld [vmem:[%s165_s20] sm:$0x1]  ;;  %163 = vst.msk [vmem:[#allocation2 + $0xb] sm:$0x1] %vm118_vm0, %v162_v21  ;;  %s16285_s22 = sld [smem:[#allocation7 + $0x1f]]  ;;  %s16291_s19 = sld [smem:[#allocation8 + $0xa]] }
  0x94   :  { %167 = vst.msk [vmem:[#allocation2 + $0xc] sm:$0x1] %vm118_vm0, %v166_v22  ;;  %v170_v23 = vld [vmem:[%s169_s30] sm:$0x1]  ;;  %s16293_s7 = sld [smem:[#allocation8 + $0x14]]  ;;  %s213_s27 = scalar_lea.vmem %s18172_s2, %s12292_s28 }
  0x95   :  { %v174_v24 = vld [vmem:[%s173_s25] sm:$0x1]  ;;  %171 = vst.msk [vmem:[#allocation2 + $0xd] sm:$0x1] %vm118_vm0, %v170_v23  ;;  %s16300_s20 = sld [smem:[#allocation8 + $0x1e]]  ;;  %s217_s30 = scalar_lea.vmem %s18172_s2, %s12293_s16 }
  0x96   :  { %175 = vst.msk [vmem:[#allocation2 + $0xe] sm:$0x1] %vm118_vm0, %v174_v24  ;;  %v178_v25 = vld [vmem:[%s177_s26] sm:$0x1]  ;;  %v16289_v26 = vld [vmem:[#allocation2 + $0x10] sm:$0xff]  ;;  %s221_s25 = scalar_lea.vmem %s18172_s2, %s12294_s29  ;;  %s229_s21 = scalar_lea.vmem %s18172_s2, %s12296_s18 }
  0x97   :  { %179 = vst.msk [vmem:[#allocation2 + $0xf] sm:$0x1] %vm118_vm0, %v178_v25  ;;  %v255_v27 = vsel %vm248_vm1, %v16289_v26, 0.0  ;;  %v214_v28 = vld [vmem:[%s213_s27] sm:$0x1]  ;;  %s225_s26 = scalar_lea.vmem %s18172_s2, %s12295_s17  ;;  %s233_s27 = scalar_lea.vmem %s18172_s2, %s16281_s9 }
  0x98   :  { %256 = vadd.xlane.f32.xlu1 %v255_v27  ;;  %215 = vst.msk [vmem:[#allocation2 + $0x18] sm:$0x1] %vm118_vm0, %v214_v28  ;;  %v218_v29 = vld [vmem:[%s217_s30] sm:$0x1]  ;;  %s237_s24 = scalar_lea.vmem %s18172_s2, %s16283_s23  ;;  %s12306_s16 = sld [smem:[#allocation8 + $0x15]] }
  0x99   :  { %v222_v30 = vld [vmem:[%s221_s25] sm:$0x1]  ;;  %219 = vst.msk [vmem:[#allocation2 + $0x19] sm:$0x1] %vm118_vm0, %v218_v29  ;;  %s241_s11 = scalar_lea.vmem %s18172_s2, %s16285_s22  ;;  %s944_s25 = scalar_lea.vmem %s18173_s3, %s16287_s15 }
  0x9a   :  { %223 = vst.msk [vmem:[#allocation2 + $0x1a] sm:$0x1] %vm118_vm0, %v222_v30  ;;  %v226_v32 = vld [vmem:[%s225_s26] sm:$0x1]  ;;  %s948_s1 = scalar_lea.vmem %s18173_s3, %s16291_s19  ;;  %s952_s5 = scalar_lea.vmem %s18173_s3, %s16293_s7 }
  0x9b   :  { %v230_v33 = vld [vmem:[%s229_s21] sm:$0x1]  ;;  %227 = vst.msk [vmem:[#allocation2 + $0x1b] sm:$0x1] %vm118_vm0, %v226_v32  ;;  %s956_s15 = scalar_lea.vmem %s18173_s3, %s16300_s20  ;;  %s12304_s21 = sld [smem:[#allocation8 + $0x1]] }
  0x9c   :  { %231 = vst.msk [vmem:[#allocation2 + $0x1c] sm:$0x1] %vm118_vm0, %v230_v33  ;;  %v234_v35 = vld [vmem:[%s233_s27] sm:$0x1]  ;;  %s12305_s19 = sld [smem:[#allocation8 + $0xb]]  ;;  %s12307_s7 = sld [smem:[#allocation8 + $0x1f]] }
  0x9d   :  { %v238_v36 = vld [vmem:[%s237_s24] sm:$0x1]  ;;  %235 = vst.msk [vmem:[#allocation2 + $0x1d] sm:$0x1] %vm118_vm0, %v234_v35  ;;  %s12308_s29 = sld [smem:[#allocation8 + $0x2]]  ;;  %s12309_s27 = sld [smem:[#allocation8 + $0xc]] }
  0x9e   :  { %v16315_v31 = vld [vmem:[#allocation2 + $0x8] sm:$0xff]  ;;  %239 = vst.msk [vmem:[#allocation2 + $0x1e] sm:$0x1] %vm118_vm0, %v238_v36  ;;  %v242_v37 = vld [vmem:[%s241_s11] sm:$0x1]  ;;  %s12310_s14 = sld [smem:[#allocation8 + $0x16]]  ;;  %s968_s28 = scalar_lea.vmem %s18173_s3, %s12306_s16 }
  0x9f   :  { %v252_v34 = vsel %vm248_vm1, %v16315_v31, 0.0  ;;  %v945_v38 = vld [vmem:[%s944_s25] sm:$0x1]  ;;  %243 = vst.msk [vmem:[#allocation2 + $0x1f] sm:$0x1] %vm118_vm0, %v242_v37  ;;  %s16358_s17 = sld [smem:[#allocation8 + $0x20]] }
  0xa0   :  { %253 = vadd.xlane.f32.xlu0 %v252_v34  ;;  %946 = vst.msk [vmem:[#allocation3] sm:$0x1] %vm118_vm0, %v945_v38  ;;  %v949_v39 = vld [vmem:[%s948_s1] sm:$0x1]  ;;  %s16360_s24 = sld [smem:[#allocation8 + $0x3]]  ;;  %s16362_s18 = sld [smem:[#allocation8 + $0xd]] }
  0xa1   :  { %v953_v40 = vld [vmem:[%s952_s5] sm:$0x1]  ;;  %950 = vst.msk [vmem:[#allocation3 + $0x1] sm:$0x1] %vm118_vm0, %v949_v39  ;;  %s16364_s20 = sld [smem:[#allocation8 + $0x17]]  ;;  %s960_s0 = scalar_lea.vmem %s18173_s3, %s12304_s21 }
  0xa2   :  { %954 = vst.msk [vmem:[#allocation3 + $0x2] sm:$0x1] %vm118_vm0, %v953_v40  ;;  %v957_v41 = vld [vmem:[%s956_s15] sm:$0x1]  ;;  %s16369_s9 = sld [smem:[#allocation8 + $0x21]]  ;;  %s964_s12 = scalar_lea.vmem %s18173_s3, %s12305_s19 }
  0xa3   :  { %958 = vst.msk [vmem:[#allocation3 + $0x3] sm:$0x1] %vm118_vm0, %v957_v41  ;;  %v961_v43 = vld [vmem:[%s960_s0] sm:$0x1]  ;;  %s972_s22 = scalar_lea.vmem %s18173_s3, %s12307_s7  ;;  %s976_s19 = scalar_lea.vmem %s18173_s3, %s12308_s29 }
  0xa4   :  { %962 = vst.msk [vmem:[#allocation3 + $0x4] sm:$0x1] %vm118_vm0, %v961_v43  ;;  %v965_v45 = vld [vmem:[%s964_s12] sm:$0x1]  ;;  %s980_s11 = scalar_lea.vmem %s18173_s3, %s12309_s27  ;;  %s984_s7 = scalar_lea.vmem %s18173_s3, %s12310_s14 }
  0xa5   :  { %v969_v46 = vld [vmem:[%s968_s28] sm:$0x1]  ;;  %966 = vst.msk [vmem:[#allocation3 + $0x5] sm:$0x1] %vm118_vm0, %v965_v45  ;;  %s988_s12 = scalar_lea.vmem %s18173_s3, %s16358_s17  ;;  %s12318_s16 = sld [smem:[#allocation8 + $0x18]] }
  0xa6   :  { %v16371_v42 = vld [vmem:[#allocation2 + $0x18] sm:$0xff]  ;;  %970 = vst.msk [vmem:[#allocation3 + $0x6] sm:$0x1] %vm118_vm0, %v969_v46  ;;  %v973_v47 = vld [vmem:[%s972_s22] sm:$0x1]  ;;  %s992_s28 = scalar_lea.vmem %s18173_s3, %s16360_s24  ;;  %s996_s5 = scalar_lea.vmem %s18173_s3, %s16362_s18 }
  0xa7   :  { %v258_v44 = vsel %vm248_vm1, %v16371_v42, 0.0  ;;  %v977_v48 = vld [vmem:[%s976_s19] sm:$0x1]  ;;  %974 = vst.msk [vmem:[#allocation3 + $0x7] sm:$0x1] %vm118_vm0, %v973_v47  ;;  %s1000_s15 = scalar_lea.vmem %s18173_s3, %s16364_s20  ;;  %s12316_s19 = sld [smem:[#allocation8 + $0x4]] }
  0xa8   :  { %259 = vadd.xlane.f32.xlu1 %v258_v44  ;;  %978 = vst.msk [vmem:[#allocation3 + $0x8] sm:$0x1] %vm118_vm0, %v977_v48  ;;  %v981_v49 = vld [vmem:[%s980_s11] sm:$0x1]  ;;  %s1004_s21 = scalar_lea.vmem %s18173_s3, %s16369_s9  ;;  %s12317_s18 = sld [smem:[#allocation8 + $0xe]] }
  0xa9   :  { %v985_v50 = vld [vmem:[%s984_s7] sm:$0x1]  ;;  %982 = vst.msk [vmem:[#allocation3 + $0x9] sm:$0x1] %vm118_vm0, %v981_v49  ;;  %s12319_s20 = sld [smem:[#allocation8 + $0x22]]  ;;  %s12320_s30 = sld [smem:[#allocation8 + $0x5]] }
  0xaa   :  { %986 = vst.msk [vmem:[#allocation3 + $0xa] sm:$0x1] %vm118_vm0, %v985_v50  ;;  %v989_v51 = vld [vmem:[%s988_s12] sm:$0x1]  ;;  %s16425_s11 = sld [smem:[#allocation8 + $0xf]]  ;;  %s16427_s0 = sld [smem:[#allocation8 + $0x19]] }
  0xab   :  { %v993_v52 = vld [vmem:[%s992_s28] sm:$0x1]  ;;  %990 = vst.msk [vmem:[#allocation3 + $0xb] sm:$0x1] %vm118_vm0, %v989_v51  ;;  %s16429_s25 = sld [smem:[#allocation8 + $0x23]]  ;;  %s16431_s7 = sld [smem:[#allocation8 + $0x6]] }
  0xac   :  { %994 = vst.msk [vmem:[#allocation3 + $0xc] sm:$0x1] %vm118_vm0, %v993_v52  ;;  %v997_v53 = vld [vmem:[%s996_s5] sm:$0x1]  ;;  %s16435_s9 = sld [smem:[#allocation8 + $0x10]]  ;;  %s16437_s29 = sld [smem:[#allocation8 + $0x1a]] }
  0xad   :  { %v1001_v54 = vld [vmem:[%s1000_s15] sm:$0x1]  ;;  %998 = vst.msk [vmem:[#allocation3 + $0xd] sm:$0x1] %vm118_vm0, %v997_v53  ;;  %s1008_s1 = scalar_lea.vmem %s18173_s3, %s12316_s19  ;;  %s16444_s26 = sld [smem:[#allocation8 + $0x24]] }
  0xae   :  { %1002 = vst.msk [vmem:[#allocation3 + $0xe] sm:$0x1] %vm118_vm0, %v1001_v54  ;;  %v1005_v55 = vld [vmem:[%s1004_s21] sm:$0x1]  ;;  %s1012_s14 = scalar_lea.vmem %s18173_s3, %s12317_s18  ;;  %s1016_s22 = scalar_lea.vmem %s18173_s3, %s12318_s16 }
  0xaf   :  { %1006 = vst.msk [vmem:[#allocation3 + $0xf] sm:$0x1] %vm118_vm0, %v1005_v55  ;;  %v16433_v56 = vld [vmem:[#allocation3] sm:$0xff]  ;;  %s1020_s24 = scalar_lea.vmem %s18173_s3, %s12319_s20  ;;  %s1024_s23 = scalar_lea.vmem %s18173_s3, %s12320_s30 }
  0xb0   :  { %v1108_v57 = vsel %vm248_vm1, %v16433_v56, 0.0  ;;  %v1009_v58 = vld [vmem:[%s1008_s1] sm:$0x1]  ;;  %s1028_s12 = scalar_lea.vmem %s18173_s3, %s16425_s11  ;;  %s1032_s28 = scalar_lea.vmem %s18173_s3, %s16427_s0 }
  0xb1   :  { %1109 = vadd.xlane.f32.xlu0 %v1108_v57  ;;  %1010 = vst.msk [vmem:[#allocation3 + $0x10] sm:$0x1] %vm118_vm0, %v1009_v58  ;;  %v1013_v59 = vld [vmem:[%s1012_s14] sm:$0x1]  ;;  %s1036_s14 = scalar_lea.vmem %s18173_s3, %s16429_s25  ;;  %s1040_s2 = scalar_lea.vmem %s18173_s3, %s16431_s7 }
  0xb2   :  { %v1017_v60 = vld [vmem:[%s1016_s22] sm:$0x1]  ;;  %1014 = vst.msk [vmem:[#allocation3 + $0x11] sm:$0x1] %vm118_vm0, %v1013_v59  ;;  %s1044_s15 = scalar_lea.vmem %s18173_s3, %s16435_s9  ;;  %s1048_s21 = scalar_lea.vmem %s18173_s3, %s16437_s29 }
  0xb3   :  { %1018 = vst.msk [vmem:[#allocation3 + $0x12] sm:$0x1] %vm118_vm0, %v1017_v60  ;;  %v1021_v62 = vld [vmem:[%s1020_s24] sm:$0x1]  ;;  %s1052_s19 = scalar_lea.vmem %s18173_s3, %s16444_s26  ;;  %s12329_s9 = sld [smem:[#allocation8 + $0x11]] }
  0xb4   :  { %v1025_v63 = vld [vmem:[%s1024_s23] sm:$0x1]  ;;  %1022 = vst.msk [vmem:[#allocation3 + $0x13] sm:$0x1] %vm118_vm0, %v1021_v62  ;;  %s12328_s23 = sld [smem:[#allocation8 + $0x7]]  ;;  %s12330_s18 = sld [smem:[#allocation8 + $0x1b]] }
  0xb5   :  { %1026 = vst.msk [vmem:[#allocation3 + $0x14] sm:$0x1] %vm118_vm0, %v1025_v63  ;;  %v1029_v1 = vld [vmem:[%s1028_s12] sm:$0x1]  ;;  %s12331_s29 = sld [smem:[#allocation8 + $0x25]]  ;;  %s12332_s16 = sld [smem:[#allocation8 + $0x8]] }
  0xb6   :  { %v16459_v61 = vld [vmem:[#allocation3 + $0x8] sm:$0xff]  ;;  %v1033_v2 = vld [vmem:[%s1032_s28] sm:$0x1]  ;;  %1030 = vst.msk [vmem:[#allocation3 + $0x15] sm:$0x1] %vm118_vm0, %v1029_v1  ;;  %s12333_s12 = sld [smem:[#allocation8 + $0x12]] }
  0xb7   :  { %v1111_v0 = vsel %vm248_vm1, %v16459_v61, 0.0  ;;  %1034 = vst.msk [vmem:[#allocation3 + $0x16] sm:$0x1] %vm118_vm0, %v1033_v2  ;;  %v1037_v3 = vld [vmem:[%s1036_s14] sm:$0x1]  ;;  %s12334_s1 = sld [smem:[#allocation8 + $0x1c]] }
  0xb8   :  { %1112 = vadd.xlane.f32.xlu1 %v1111_v0  ;;  %v1041_v4 = vld [vmem:[%s1040_s2] sm:$0x1]  ;;  %1038 = vst.msk [vmem:[#allocation3 + $0x17] sm:$0x1] %vm118_vm0, %v1037_v3  ;;  %s16502_s20 = sld [smem:[#allocation8 + $0x26]]  ;;  %s16504_s28 = sld [smem:[#allocation8 + $0x9]] }
  0xb9   :  { %1042 = vst.msk [vmem:[#allocation3 + $0x18] sm:$0x1] %vm118_vm0, %v1041_v4  ;;  %v1045_v5 = vld [vmem:[%s1044_s15] sm:$0x1]  ;;  %s16506_s30 = sld [smem:[#allocation8 + $0x13]]  ;;  %s16508_s26 = sld [smem:[#allocation8 + $0x1d]] }
  0xba   :  { %v1049_v6 = vld [vmem:[%s1048_s21] sm:$0x1]  ;;  %1046 = vst.msk [vmem:[#allocation3 + $0x19] sm:$0x1] %vm118_vm0, %v1045_v5  ;;  %s1056_s5 = scalar_lea.vmem %s18173_s3, %s12328_s23  ;;  %s16513_s11 = sld [smem:[#allocation8 + $0x27]] }
  0xbb   :  { %1050 = vst.msk [vmem:[#allocation3 + $0x1a] sm:$0x1] %vm118_vm0, %v1049_v6  ;;  %v1053_v7 = vld [vmem:[%s1052_s19] sm:$0x1]  ;;  %s1060_s22 = scalar_lea.vmem %s18173_s3, %s12329_s9  ;;  %s1064_s24 = scalar_lea.vmem %s18173_s3, %s12330_s18 }
  0xbc   :  { %1054 = vst.msk [vmem:[#allocation3 + $0x1b] sm:$0x1] %vm118_vm0, %v1053_v7  ;;  %v1057_v9 = vld [vmem:[%s1056_s5] sm:$0x1]  ;;  %s1068_s7 = scalar_lea.vmem %s18173_s3, %s12331_s29  ;;  %s1072_s9 = scalar_lea.vmem %s18173_s3, %s12332_s16 }
  0xbd   :  { %1058 = vst.msk [vmem:[#allocation3 + $0x1c] sm:$0x1] %vm118_vm0, %v1057_v9  ;;  %v1061_v11 = vld [vmem:[%s1060_s22] sm:$0x1]  ;;  %s1076_s14 = scalar_lea.vmem %s18173_s3, %s12333_s12  ;;  %s1080_s29 = scalar_lea.vmem %s18173_s3, %s12334_s1 }
  0xbe   :  { %v1065_v13 = vld [vmem:[%s1064_s24] sm:$0x1]  ;;  %1062 = vst.msk [vmem:[#allocation3 + $0x1d] sm:$0x1] %vm118_vm0, %v1061_v11  ;;  %s1084_s22 = scalar_lea.vmem %s18173_s3, %s16502_s20  ;;  %s1088_s24 = scalar_lea.vmem %s18173_s3, %s16504_s28  ;;  %v304_v11 = vld [vmem:[%s18174_s4 + $0x10] sm:$0xff] }
  0xbf   :  { %v16515_v8 = vld [vmem:[#allocation3 + $0x10] sm:$0xff]  ;;  %1066 = vst.msk [vmem:[#allocation3 + $0x1e] sm:$0x1] %vm118_vm0, %v1065_v13  ;;  %v1069_v14 = vld [vmem:[%s1068_s7] sm:$0x1]  ;;  %s1092_s21 = scalar_lea.vmem %s18173_s3, %s16506_s30  ;;  %s1096_s19 = scalar_lea.vmem %s18173_s3, %s16508_s26  ;;  %v305_v13 = vld [vmem:[%s18174_s4 + $0x18] sm:$0xff] }
  0xc0   :  { %v1114_v10 = vsel %vm248_vm1, %v16515_v8, 0.0  ;;  %v1073_v15 = vld [vmem:[%s1072_s9] sm:$0x1]  ;;  %1070 = vst.msk [vmem:[#allocation3 + $0x1f] sm:$0x1] %vm118_vm0, %v1069_v14  ;;  %s1100_s23 = scalar_lea.vmem %s18173_s3, %s16513_s11  ;;  %s16006_s11 = smov 96  }
  0xc1   :  { %1115 = vadd.xlane.f32.xlu0 %v1114_v10  ;;  %1074 = vst.msk [vmem:[#allocation3 + $0x20] sm:$0x1] %vm118_vm0, %v1073_v15  ;;  %v1077_v16 = vld [vmem:[%s1076_s14] sm:$0x1]  ;;  %s16007_s1 = smov [#allocation18]  }
  0xc2   :  { %v1081_v17 = vld [vmem:[%s1080_s29] sm:$0x1]  ;;  %1078 = vst.msk [vmem:[#allocation3 + $0x21] sm:$0x1] %vm118_vm0, %v1077_v16  ;;  %v332_v16 = vand.u32 4294901760, %v304_v11 }
  0xc3   :  { %1082 = vst.msk [vmem:[#allocation3 + $0x22] sm:$0x1] %vm118_vm0, %v1081_v17  ;;  %v1085_v18 = vld [vmem:[%s1084_s22] sm:$0x1]  ;;  %v335_v17 = vand.u32 4294901760, %v305_v13  ;;  %s18191_s22 = sld [smem:[#allocation24_spill]] }
  0xc4   :  { %v1089_v19 = vld [vmem:[%s1088_s24] sm:$0x1]  ;;  %1086 = vst.msk [vmem:[#allocation3 + $0x23] sm:$0x1] %vm118_vm0, %v1085_v18  ;;  %v16002_v18 = vmov 0.0|0.0  }
  0xc5   :  { %1090 = vst.msk [vmem:[#allocation3 + $0x24] sm:$0x1] %vm118_vm0, %v1089_v19  ;;  %v1093_v20 = vld [vmem:[%s1092_s21] sm:$0x1]  ;;  %14654 = vmatprep.subr.bf16.mxu1 %v16002_v18  ;;  %v1174_v19 = vld [vmem:[%s18178_s8 + $0x8] sm:$0xff]  ;;  %s12186_s21 = sshll.u32 %s16007_s1, 4  ;;  %s12187_s21 = int_to_ptr.vmem [resolvable:$true] %s12186_s21 }
  0xc6   :  { %v1097_v21 = vld [vmem:[%s1096_s19] sm:$0x1]  ;;  %1094 = vst.msk [vmem:[#allocation3 + $0x25] sm:$0x1] %vm118_vm0, %v1093_v20  ;;  %s15963_s25 = scalar_lea.vmem %s12187_s21, 64  ;;  %p15968_p9 = scmp.lt.s32.totalorder %s12187_s21, %s12187_s21 }
  0xc7   :  { %1098 = vst.msk [vmem:[#allocation3 + $0x26] sm:$0x1] %vm118_vm0, %v1097_v21  ;;  %v1101_v22 = vld [vmem:[%s1100_s23] sm:$0x1]  ;;  %v1106_v23 = vld [vmem:[#allocation3 + $0x18] sm:$0xff]  ;;  %v1175_v21 = vld [vmem:[%s18178_s8 + $0x10] sm:$0xff]  ;;  %p15964_p8 = scmp.ne.s32.totalorder %s12187_s21, %s15963_s25  ;;  %p15969_p10 = scmp.lt.s32.totalorder %s15963_s25, %s15963_s25 }
  0xc8   :  { %1102 = vst.msk [vmem:[#allocation3 + $0x27] sm:$0x1] %vm118_vm0, %v1101_v22  ;;  %v1117_v24 = vsel %vm248_vm1, %v1106_v23, 0.0  ;;  %v302_v7 = vld [vmem:[%s18174_s4] sm:$0xff]  ;;  %v1176_v22 = vld [vmem:[%s18178_s8 + $0x18] sm:$0xff] }
  0xc9   :  { %1118 = vadd.xlane.f32.xlu1 %v1117_v24  ;;  %v326_v9 = vand.u32 4294901760, %v302_v7  ;;  %v1173_v14 = vld [vmem:[%s18178_s8] sm:$0xff]  ;;  %v1203_v24 = vand.u32 4294901760, %v1174_v19  ;;  %p15970_p11 = por %p15969_p10, %p15968_p9 }
  0xca   :  { %v1200_v20 = vand.u32 4294901760, %v1173_v14 }
  0xcb   :  { %p15971_p12 = pnand %p15970_p11, %p15964_p8 }
  0xcf   :  { %v1107_v25 = vld [vmem:[#allocation3 + $0x20] sm:$0xff] }
  0xd0   :  { %v1120_v27 = vsel %vm248_vm1, %v1107_v25, 0.0 }
  0xd1   :  { %1121 = vadd.xlane.f32.xlu0 %v1120_v27 }
 0x11c   :  { %v251_v28 = vpop.xlane.xlu0 %250 }
 0x11d   :  { %v262_v29 = vmul.f32 0.03125, %v251_v28  ;;  %v1206_v28 = vand.u32 4294901760, %v1175_v21 }
 0x11f   :  { %v16572_v30 = vsub.f32 %v16222_v12, %v262_v29  ;;  %v16653_v29 = vpack.c.bf16 %v335_v17, %v332_v16 }
 0x121   :  { %v270_v32 = vmul.f32 %v16572_v30, %v16572_v30 }
 0x123   :  { %v274_v33 = vsel %vm248_vm1, %v270_v32, 0.0  ;;  %v16655_v32 = vsub.f32 %v1173_v14, %v1200_v20 }
 0x124   :  { %275 = vadd.xlane.f32.xlu1 %v274_v33  ;;  %v1209_v33 = vand.u32 4294901760, %v1176_v22 }
 0x125   :  { %v257_v34 = vpop.xlane.xlu1 %256 }
 0x126   :  { %v264_v35 = vmul.f32 0.03125, %v257_v34  ;;  %v450_v34 = vsub.f32 %v304_v11, %v332_v16 }
 0x128   :  { %v16578_v36 = vsub.f32 %v16289_v26, %v264_v35  ;;  %v16658_v35 = vpack.c.bf16 %v1203_v24, %v1200_v20 }
 0x12a   :  { %v272_v39 = vmul.f32 %v16578_v36, %v16578_v36  ;;  %14656 = vmatpush3.bf16.msra.mxu1 %v16658_v35 }
 0x12b   :  { %14657 = vmatprep.subr.bf16.mxu1 %v16002_v18 }
 0x12c   :  { %v280_v12 = vsel %vm248_vm1, %v272_v39, 0.0 }
 0x12d   :  { %v254_v37 = vpop.xlane.xlu0 %253  ;;  %281 = vadd.xlane.f32.xlu1 %v280_v12  ;;  %v16663_v12 = vpack.c.bf16 %v1209_v33, %v1206_v28 }
 0x12e   :  { %v263_v38 = vmul.f32 0.03125, %v254_v37  ;;  %v16660_v37 = vsub.f32 %v1174_v19, %v1203_v24 }
 0x12f   :  { %14659 = vmatpush3.bf16.msra.mxu1 %v16663_v12 }
 0x130   :  { %v16583_v40 = vsub.f32 %v16315_v31, %v263_v38  ;;  %14660 = vmatprep.subr.bf16.mxu1 %v16002_v18  ;;  %v14667_v16 = vpack.c.bf16 %v16660_v37, %v16655_v32 }
 0x132   :  { %v271_v41 = vmul.f32 %v16583_v40, %v16583_v40 }
 0x134   :  { %v277_v43 = vsel %vm248_vm1, %v271_v41, 0.0  ;;  %v16665_v41 = vsub.f32 %v1175_v21, %v1206_v28 }
 0x135   :  { %278 = vadd.xlane.f32.xlu0 %v277_v43  ;;  %v260_v44 = vpop.xlane.xlu1 %259  ;;  %v16667_v43 = vsub.f32 %v1176_v22, %v1209_v33 }
 0x136   :  { %v265_v26 = vmul.f32 0.03125, %v260_v44  ;;  %v451_v44 = vand.u32 4294901760, %v450_v34 }
 0x138   :  { %v16590_v45 = vsub.f32 %v16371_v42, %v265_v26 }
 0x13a   :  { %v273_v46 = vmul.f32 %v16590_v45, %v16590_v45 }
 0x13c   :  { %v283_v31 = vsel %vm248_vm1, %v273_v46, 0.0 }
 0x13d   :  { %284 = vadd.xlane.f32.xlu0 %v283_v31  ;;  %v457_v31 = vsub.f32 %v305_v13, %v335_v17  ;;  %v14670_v17 = vpack.c.bf16 %v16667_v43, %v16665_v41 }
 0x13e   :  { %v1110_v47 = vpop.xlane.xlu0 %1109 }
 0x13f   :  { %v1123_v48 = vmul.f32 0.03125, %v1110_v47 }
 0x141   :  { %v16596_v49 = vsub.f32 %v16433_v56, %v1123_v48  ;;  %v452_v48 = vsub.f32 %v450_v34, %v451_v44 }
 0x143   :  { %v1133_v52 = vmul.f32 %v16596_v49, %v16596_v49 }
 0x145   :  { %v1113_v50 = vpop.xlane.xlu1 %1112  ;;  %v1138_v42 = vsel %vm248_vm1, %v1133_v52, 0.0  ;;  %v458_v52 = vand.u32 4294901760, %v457_v31 }
 0x146   :  { %v1124_v51 = vmul.f32 0.03125, %v1113_v50  ;;  %1139 = vadd.xlane.f32.xlu1 %v1138_v42  ;;  %v16674_v42 = vpack.c.bf16 %v457_v31, %v450_v34 }
 0x147   :  { %v16695_v13 = vpack.c.bf16 %v458_v52, %v451_v44 }
 0x148   :  { %v16601_v53 = vsub.f32 %v16459_v61, %v1124_v51 }
 0x14a   :  { %v1134_v54 = vmul.f32 %v16601_v53, %v16601_v53 }
 0x14c   :  { %v1141_v55 = vsel %vm248_vm1, %v1134_v54, 0.0 }
 0x14d   :  { %1142 = vadd.xlane.f32.xlu0 %v1141_v55  ;;  %v453_v55 = vand.u32 4294901760, %v452_v48 }
 0x14e   :  { %v1116_v57 = vpop.xlane.xlu0 %1115 }
 0x14f   :  { %v1125_v56 = vmul.f32 0.03125, %v1116_v57  ;;  %v459_v57 = vsub.f32 %v457_v31, %v458_v52 }
 0x151   :  { %v16608_v58 = vsub.f32 %v16515_v8, %v1125_v56  ;;  %v303_v8 = vld [vmem:[%s18174_s4 + $0x8] sm:$0xff]  ;;  %v460_v56 = vand.u32 4294901760, %v459_v57 }
 0x152   :  { %v329_v10 = vand.u32 4294901760, %v303_v8 }
 0x153   :  { %v1135_v59 = vmul.f32 %v16608_v58, %v16608_v58 }
 0x154   :  { %v16638_v15 = vpack.c.bf16 %v329_v10, %v326_v9  ;;  %v443_v27 = vsub.f32 %v303_v8, %v329_v10 }
 0x155   :  { %v1144_v60 = vsel %vm248_vm1, %v1135_v59, 0.0  ;;  %v16681_v59 = vpack.c.bf16 %v460_v56, %v453_v55 }
 0x156   :  { %1145 = vadd.xlane.f32.xlu1 %v1144_v60  ;;  %v1119_v61 = vpop.xlane.xlu1 %1118  ;;  %14607 = vmatprep.subr.bf16.mxu0 %v16638_v15  ;;  %v444_v39 = vand.u32 4294901760, %v443_v27  ;;  %v1321_v60 = vand.u32 4294901760, %v16655_v32 }
 0x157   :  { %v1126_v62 = vmul.f32 0.03125, %v1119_v61  ;;  %14609 = vmatpush3.bf16.msra.mxu0 %v16638_v15  ;;  %v1328_v61 = vand.u32 4294901760, %v16660_v37 }
 0x158   :  { %14611 = vmatprep.subr.bf16.mxu0 %v16653_v29  ;;  %v445_v46 = vsub.f32 %v443_v27, %v444_v39 }
 0x159   :  { %v16613_v63 = vsub.f32 %v1106_v23, %v1126_v62  ;;  %v16004_v23 = vmov 0.0   ;;  %v1322_v62 = vsub.f32 %v16655_v32, %v1321_v60 }
 0x15a   :  { %13156 = vmatprep.mubr.msk.f32.mxu1 %vm16003_vm2, %v16004_v23  ;;  %v446_v51 = vand.u32 4294901760, %v445_v46 }
 0x15b   :  { %v1136_v2 = vmul.f32 %v16613_v63, %v16613_v63  ;;  %14613 = vmatpush3.bf16.msra.mxu0 %v16653_v29 }
 0x15d   :  { %v1147_v4 = vsel %vm248_vm1, %v1136_v2, 0.0 }
 0x15e   :  { %v1122_v0 = vpop.xlane.xlu0 %1121  ;;  %1148 = vadd.xlane.f32.xlu0 %v1147_v4  ;;  %v1335_v4 = vand.u32 4294901760, %v16665_v41 }
 0x15f   :  { %v1127_v1 = vmul.f32 0.03125, %v1122_v0  ;;  %v1329_v0 = vsub.f32 %v16660_v37, %v1328_v61 }
 0x160   :  { %v1336_v8 = vsub.f32 %v16665_v41, %v1335_v4 }
 0x161   :  { %v16617_v3 = vsub.f32 %v1107_v25, %v1127_v1  ;;  %v436_v25 = vsub.f32 %v302_v7, %v326_v9  ;;  %v1323_v1 = vand.u32 4294901760, %v1322_v62  ;;  %v1330_v2 = vand.u32 4294901760, %v1329_v0 }
 0x162   :  { %v1337_v10 = vand.u32 4294901760, %v1336_v8 }
 0x163   :  { %v1137_v5 = vmul.f32 %v16617_v3, %v16617_v3  ;;  %v437_v38 = vand.u32 4294901760, %v436_v25  ;;  %v16670_v47 = vpack.c.bf16 %v443_v27, %v436_v25  ;;  %v16691_v7 = vpack.c.bf16 %v1330_v2, %v1323_v1 }
 0x165   :  { %v1150_v6 = vsel %vm248_vm1, %v1137_v5, 0.0  ;;  %v438_v26 = vsub.f32 %v436_v25, %v437_v38  ;;  %v1342_v5 = vand.u32 4294901760, %v16667_v43 }
 0x166   :  { %1151 = vadd.xlane.f32.xlu1 %v1150_v6  ;;  %v16689_v6 = vpack.c.bf16 %v444_v39, %v437_v38 }
 0x167   :  { %v439_v50 = vand.u32 4294901760, %v438_v26  ;;  %v1343_v9 = vsub.f32 %v16667_v43, %v1342_v5  ;;  %v16707_v26 = vpack.c.bf16 %v1328_v61, %v1321_v60  ;;  %v16713_v48 = vpack.c.bf16 %v1342_v5, %v1335_v4  ;;  %v1866_v43 = vld [vmem:[%s18180_s10] sm:$0xff] }
 0x169   :  { %v16676_v54 = vpack.c.bf16 %v446_v51, %v439_v50  ;;  %v1344_v11 = vand.u32 4294901760, %v1343_v9 }
 0x16b   :  { %14615 = vmatprep.subr.bf16.mxu0 %v16676_v54  ;;  %v16697_v14 = vpack.c.bf16 %v1344_v11, %v1337_v10 }
 0x1b1   :  { %v276_v19 = vpop.xlane.xlu1 %275 }
 0x1b2   :  { %v286_v20 = vmul.f32 0.03125, %v276_v19 }
 0x1b4   :  { %v290_v21 = vadd.f32 1e-05, %v286_v20 }
 0x1b6   :  { %15700 = vrsqrt.f32 %v290_v21 }
 0x1ba   :  { %v282_v22 = vpop.xlane.xlu1 %281 }
 0x1bb   :  { %v288_v24 = vmul.f32 0.03125, %v282_v22 }
 0x1bd   :  { %v292_v25 = vadd.f32 1e-05, %v288_v24 }
 0x1bf   :  { %15702 = vrsqrt.f32 %v292_v25 }
 0x1c0   :  { %v15701_v27 = vpop.eup %15700 }
 0x1c1   :  { %v298_v34 = vmul.f32 %v15701_v27, %v16572_v30 }
 0x1c2   :  { %v279_v28 = vpop.xlane.xlu0 %278 }
 0x1c3   :  { %v287_v33 = vmul.f32 0.03125, %v279_v28  ;;  %v314_v39 = vsel %vm248_vm1, %v298_v34, 0 }
 0x1c4   :  { %v16705_v44 = vand.u32 4294901760, %v314_v39 }
 0x1c5   :  { %v291_v38 = vadd.f32 1e-05, %v287_v33 }
 0x1c6   :  { %v16710_v46 = vsub.f32 %v314_v39, %v16705_v44 }
 0x1c7   :  { %15704 = vrsqrt.f32 %v291_v38 }
 0x1c8   :  { %v396_v31 = vand.u32 4294901760, %v16710_v46 }
 0x1c9   :  { %v15703_v51 = vpop.eup %15702 }
 0x1ca   :  { %v285_v50 = vpop.xlane.xlu0 %284  ;;  %v397_v30 = vsub.f32 %v16710_v46, %v396_v31  ;;  %v300_v57 = vmul.f32 %v15703_v51, %v16578_v36 }
 0x1cb   :  { %v289_v52 = vmul.f32 0.03125, %v285_v50 }
 0x1cc   :  { %v398_v55 = vand.u32 4294901760, %v397_v30  ;;  %v320_v60 = vsel %vm248_vm1, %v300_v57, 0 }
 0x1cd   :  { %v293_v56 = vadd.f32 1e-05, %v289_v52  ;;  %v16720_v62 = vand.u32 4294901760, %v320_v60 }
 0x1ce   :  { %13072 = vmatprep.mubr.f32.mxu0 %v398_v55 }
 0x1cf   :  { %15706 = vrsqrt.f32 %v293_v56  ;;  %v16724_v1 = vsub.f32 %v320_v60, %v16720_v62 }
 0x1d1   :  { %v15705_v61 = vpop.eup %15704  ;;  %v416_v5 = vand.u32 4294901760, %v16724_v1 }
 0x1d2   :  { %v299_v0 = vmul.f32 %v15705_v61, %v16583_v40 }
 0x1d3   :  { %v1140_v36 = vpop.xlane.xlu1 %1139  ;;  %v417_v10 = vsub.f32 %v16724_v1, %v416_v5 }
 0x1d4   :  { %v317_v2 = vsel %vm248_vm1, %v299_v0, 0  ;;  %v1153_v8 = vmul.f32 0.03125, %v1140_v36 }
 0x1d5   :  { %v16727_v4 = vand.u32 4294901760, %v317_v2  ;;  %v418_v24 = vand.u32 4294901760, %v417_v10 }
 0x1d6   :  { %v1158_v11 = vadd.f32 1e-05, %v1153_v8 }
 0x1d7   :  { %v16731_v9 = vsub.f32 %v317_v2, %v16727_v4 }
 0x1d8   :  { %15708 = vrsqrt.f32 %v1158_v11 }
 0x1d9   :  { %v406_v40 = vand.u32 4294901760, %v16731_v9  ;;  %v15707_v20 = vpop.eup %15706 }
 0x1da   :  { %v1143_v19 = vpop.xlane.xlu0 %1142  ;;  %v301_v25 = vmul.f32 %v15707_v20, %v16590_v45 }
 0x1db   :  { %v1154_v21 = vmul.f32 0.03125, %v1143_v19  ;;  %v407_v22 = vsub.f32 %v16731_v9, %v406_v40 }
 0x1dc   :  { %v323_v33 = vsel %vm248_vm1, %v301_v25, 0 }
 0x1dd   :  { %v1159_v27 = vadd.f32 1e-05, %v1154_v21  ;;  %v408_v28 = vand.u32 4294901760, %v407_v22  ;;  %v16742_v34 = vand.u32 4294901760, %v323_v33 }
 0x1df   :  { %15710 = vrsqrt.f32 %v1159_v27  ;;  %13073 = vmatmul.mubr.f32.vlgmr.msra.gmra.mrb[0].mxu0 %v408_v28  ;;  %v16747_v38 = vsub.f32 %v323_v33, %v16742_v34 }
 0x1e0   :  { %14617 = vmatpush3.bf16.msra.mxu0 %v16676_v54  ;;  %13075 = vmatprep.mubr.f32.mxu0 %v418_v24 }
 0x1e1   :  { %14619 = vmatprep.subr.bf16.mxu0 %v16681_v59  ;;  %v426_v39 = vand.u32 4294901760, %v16747_v38 }
 0x1e2   :  { %v15709_v45 = vpop.eup %15708 }
 0x1e3   :  { %v1146_v50 = vpop.xlane.xlu1 %1145  ;;  %v427_v51 = vsub.f32 %v16747_v38, %v426_v39  ;;  %v1168_v54 = vmul.f32 %v15709_v45, %v16596_v49 }
 0x1e4   :  { %14621 = vmatpush3.bf16.msra.mxu0 %v16681_v59  ;;  %v1155_v30 = vmul.f32 0.03125, %v1146_v50  ;;  %v1862_v50 = vld [vmem:[%s18176_s6 + $0x8] sm:$0xff] }
 0x1e5   :  { %14623 = vmatprep.subr.bf16.mxu0 %v16670_v47  ;;  %v428_v55 = vand.u32 4294901760, %v427_v51  ;;  %v1185_v57 = vsel %vm248_vm1, %v1168_v54, 0  ;;  %v1885_v51 = vand.u32 4294901760, %v1862_v50  ;;  %v1863_v54 = vld [vmem:[%s18176_s6 + $0x10] sm:$0xff] }
 0x1e6   :  { %v1160_v52 = vadd.f32 1e-05, %v1155_v30  ;;  %v16757_v60 = vand.u32 4294901760, %v1185_v57 }
 0x1e7   :  { %13076 = vmatmul.mubr.f32.gmra.mrb[2].mxu0 %v428_v55 }
 0x1e8   :  { %15712 = vrsqrt.f32 %v1160_v52  ;;  %13086 = vmatprep.mubr.f32.mxu0 %v16705_v44  ;;  %v16762_v61 = vsub.f32 %v1185_v57, %v16757_v60 }
 0x1e9   :  { %v15711_v56 = vpop.eup %15710 }
 0x1ea   :  { %v1169_v59 = vmul.f32 %v15711_v56, %v16601_v53  ;;  %v1270_v49 = vand.u32 4294901760, %v16762_v61  ;;  %v16844_v56 = vsub.f32 %v1862_v50, %v1885_v51 }
 0x1eb   :  { %13087 = vmatmul.mubr.f32.vlgmr.msra.gmra.mrb[0].mxu0 %v16727_v4  ;;  %v1149_v36 = vpop.xlane.xlu0 %1148 }
 0x1ec   :  { %v1188_v0 = vsel %vm248_vm1, %v1169_v59, 0  ;;  %14625 = vmatpush3.bf16.msra.mxu0 %v16670_v47  ;;  %13089 = vmatprep.mubr.f32.mxu0 %v16720_v62  ;;  %v1156_v8 = vmul.f32 0.03125, %v1149_v36  ;;  %v1271_v53 = vsub.f32 %v16762_v61, %v1270_v49 }
 0x1ed   :  { %v16767_v2 = vand.u32 4294901760, %v1188_v0  ;;  %14627 = vmatprep.subr.bf16.mxu0 %v16674_v42 }
 0x1ee   :  { %v1161_v11 = vadd.f32 1e-05, %v1156_v8  ;;  %v1272_v19 = vand.u32 4294901760, %v1271_v53 }
 0x1ef   :  { %v16775_v10 = vsub.f32 %v1188_v0, %v16767_v2  ;;  %13090 = vmatmul.mubr.f32.gmra.mrb[2].mxu0 %v16742_v34 }
 0x1f0   :  { %14629 = vmatpush3.bf16.msra.mxu0 %v16674_v42  ;;  %13100 = vmatprep.mubr.f32.mxu0 %v16710_v46  ;;  %15714 = vrsqrt.f32 %v1161_v11 }
 0x1f1   :  { %v1280_v20 = vand.u32 4294901760, %v16775_v10  ;;  %13157 = vmatmul.mubr.f32.vlgmr.msra.gmra.mrb[0].mxu1 %v1272_v19  ;;  %14631 = vmatprep.subr.bf16.mxu0 %v16638_v15 }
 0x1f2   :  { %v15713_v47 = vpop.eup %15712  ;;  %13159 = vmatprep.mubr.msk.f32.mxu1 %vm16003_vm2, %v16004_v23  ;;  %14662 = vmatpush3.bf16.msra.mxu1 %v16691_v7 }
 0x1f3   :  { %v1152_v21 = vpop.xlane.xlu1 %1151  ;;  %v1281_v24 = vsub.f32 %v16775_v10, %v1280_v20  ;;  %v1170_v25 = vmul.f32 %v15713_v47, %v16608_v58  ;;  %13101 = vmatmul.mubr.f32.vlgmr.msra.gmra.mrb[0].mxu0 %v16731_v9  ;;  %14663 = vmatprep.subr.bf16.mxu1 %v16002_v18  ;;  %v1864_v9 = vld [vmem:[%s18176_s6 + $0x18] sm:$0xff] }
 0x1f4   :  { %v1157_v22 = vmul.f32 0.03125, %v1152_v21  ;;  %14633 = vmatpush3.bf16.msra.mxu0 %v16638_v15  ;;  %13103 = vmatprep.mubr.f32.mxu0 %v16724_v1  ;;  %v1888_v1 = vand.u32 4294901760, %v1863_v54  ;;  %v1891_v55 = vand.u32 4294901760, %v1864_v9 }
 0x1f5   :  { %v1282_v27 = vand.u32 4294901760, %v1281_v24  ;;  %v1191_v28 = vsel %vm248_vm1, %v1170_v25, 0  ;;  %14635 = vmatprep.subr.bf16.mxu0 %v16653_v29 }
 0x1f6   :  { %v1162_v42 = vadd.f32 1e-05, %v1157_v22  ;;  %v16795_v33 = vand.u32 4294901760, %v1191_v28  ;;  %14665 = vmatpush3.bf16.msra.mxu1 %v16697_v14  ;;  %v1861_v14 = vld [vmem:[%s18176_s6] sm:$0xff]  ;;  %v16860_v36 = vsub.f32 %v1863_v54, %v1888_v1  ;;  %v16862_v8 = vsub.f32 %v1864_v9, %v1891_v55 }
 0x1f7   :  { %13160 = vmatmul.mubr.f32.gmra.mrb[2].mxu1 %v1282_v27  ;;  %13104 = vmatmul.mubr.f32.gmra.mrb[2].mxu0 %v16747_v38 }
 0x1f8   :  { %15716 = vrsqrt.f32 %v1162_v42  ;;  %13162 = vmatprep.mubr.msk.f32.mxu1 %vm16003_vm2, %v16004_v23  ;;  %v16802_v58 = vsub.f32 %v1191_v28, %v16795_v33  ;;  %14666 = vmatprep.subr.bf16.mxu1 %v16002_v18  ;;  %v1977_v24 = vand.u32 4294901760, %v16860_v36  ;;  %v1984_v25 = vand.u32 4294901760, %v16862_v8 }
 0x1f9   :  { %14637 = vmatpush3.bf16.msra.mxu0 %v16653_v29  ;;  %13114 = vmatprep.mubr.f32.mxu0 %v396_v31  ;;  %v1882_v31 = vand.u32 4294901760, %v1861_v14  ;;  %v16946_v37 = vpack.c.bf16 %v16862_v8, %v16860_v36 }
 0x1fa   :  { %v1290_v7 = vand.u32 4294901760, %v16802_v58  ;;  %14639 = vmatprep.subr.bf16.mxu0 %v16689_v6  ;;  %v15715_v45 = vpop.eup %15714  ;;  %v1985_v50 = vsub.f32 %v16862_v8, %v1984_v25 }
 0x1fb   :  { %v1171_v46 = vmul.f32 %v15715_v45, %v16613_v63  ;;  %v16842_v57 = vsub.f32 %v1861_v14, %v1882_v31  ;;  %v16873_v21 = vpack.c.bf16 %v1885_v51, %v1882_v31  ;;  %v1978_v14 = vsub.f32 %v16860_v36, %v1977_v24  ;;  %v1868_v31 = vld [vmem:[%s18180_s10 + $0x10] sm:$0xff]  ;;  %v1869_v51 = vld [vmem:[%s18180_s10 + $0x18] sm:$0xff] }
 0x1fc   :  { %v1291_v30 = vsub.f32 %v16802_v58, %v1290_v7  ;;  %13115 = vmatmul.mubr.f32.vlgmr.msra.gmra.mrb[0].mxu0 %v406_v40  ;;  %v1986_v45 = vand.u32 4294901760, %v1985_v50  ;;  %v2406_v54 = vand.u32 4294901760, %v1868_v31  ;;  %v17186_v50 = vld [vmem:[#allocation15] ss:$0 sm:$0xff] }
 0x1fd   :  { %14641 = vmatpush3.bf16.msra.mxu0 %v16689_v6  ;;  %13117 = vmatprep.mubr.f32.mxu0 %v416_v5  ;;  %v1194_v63 = vsel %vm248_vm1, %v1171_v46, 0  ;;  %v16936_v32 = vpack.c.bf16 %v16844_v56, %v16842_v57 }
 0x1fe   :  { %v1292_v52 = vand.u32 4294901760, %v1291_v30  ;;  %14643 = vmatprep.subr.bf16.mxu0 %v16695_v13  ;;  %v16834_v6 = vand.u32 4294901760, %v1194_v63  ;;  %v2400_v30 = vand.u32 4294901760, %v1866_v43 }
 0x200   :  { %13163 = vmatmul.mubr.f32.gmra.mrb[4].mxu1 %v1292_v52  ;;  %13118 = vmatmul.mubr.f32.gmra.mrb[2].mxu0 %v426_v39  ;;  %v16847_v59 = vsub.f32 %v1194_v63, %v16834_v6  ;;  %v2409_v52 = vand.u32 4294901760, %v1869_v51  ;;  %v17009_v9 = vsub.f32 %v1866_v43, %v2400_v30 }
 0x201   :  { %13165 = vmatprep.mubr.msk.f32.mxu1 %vm16003_vm2, %v16004_v23  ;;  %14645 = vmatpush3.bf16.msra.mxu0 %v16695_v13  ;;  %v1970_v13 = vand.u32 4294901760, %v16844_v56 }
 0x202   :  { %v15717_v40 = vpop.eup %15716  ;;  %13128 = vmatprep.mubr.f32.mxu0 %v16705_v44  ;;  %14647 = vmatprep.subr.bf16.mxu0 %v16638_v15  ;;  %v1300_v39 = vand.u32 4294901760, %v16847_v59  ;;  %v17050_v36 = vpack.c.bf16 %v2409_v52, %v2406_v54 }
 0x203   :  { %v1172_v5 = vmul.f32 %v15717_v40, %v16617_v3  ;;  %v1963_v3 = vand.u32 4294901760, %v16842_v57  ;;  %v1971_v22 = vsub.f32 %v16844_v56, %v1970_v13  ;;  %v2481_v40 = vand.u32 4294901760, %v17009_v9 }
 0x204   :  { %13129 = vmatmul.mubr.f32.vlgmr.msra.gmra.mrb[0].mxu0 %v16727_v4  ;;  %v1301_v53 = vsub.f32 %v16847_v59, %v1300_v39 }
 0x205   :  { %v1197_v38 = vsel %vm248_vm1, %v1172_v5, 0  ;;  %14649 = vmatpush3.bf16.msra.mxu0 %v16638_v15  ;;  %13131 = vmatprep.mubr.f32.mxu0 %v16720_v62  ;;  %v1964_v47 = vsub.f32 %v16842_v57, %v1963_v3  ;;  %v1972_v28 = vand.u32 4294901760, %v1971_v22  ;;  %v16974_v41 = vpack.c.bf16 %v1970_v13, %v1963_v3  ;;  %v12340_v22 = vld [vmem:[#allocation14] ss:$0 sm:$0xff] }
 0x206   :  { %v16853_v0 = vand.u32 4294901760, %v1197_v38  ;;  %14651 = vmatprep.subr.bf16.mxu0 %v16653_v29  ;;  %v1302_v15 = vand.u32 4294901760, %v1301_v53  ;;  %v17023_v5 = vsub.f32 %v1868_v31, %v2406_v54  ;;  %v2482_v56 = vsub.f32 %v17009_v9, %v2481_v40 }
 0x207   :  { %v1965_v27 = vand.u32 4294901760, %v1964_v47 }
 0x208   :  { %v16868_v11 = vsub.f32 %v1197_v38, %v16853_v0  ;;  %13132 = vmatmul.mubr.f32.gmra.mrb[2].mxu0 %v16742_v34  ;;  %13166 = vmatmul.mubr.f32.gmra.mrb[6].mxu1 %v1302_v15  ;;  %v2495_v3 = vand.u32 4294901760, %v17023_v5 }
 0x209   :  { %14653 = vmatpush3.bf16.msra.mxu0 %v16653_v29  ;;  %13142 = vmatprep.mubr.f32.mxu0 %v16705_v44  ;;  %v16892_v44 = vpack.c.bf16 %v1891_v55, %v1888_v1  ;;  %v17025_v55 = vsub.f32 %v1869_v51, %v2409_v52 }
 0x20a   :  { %v1310_v19 = vand.u32 4294901760, %v16868_v11  ;;  %14690 = vmatprep.subr.bf16.mxu0 %v16002_v18  ;;  %13168 = vmatprep.mubr.msk.f32.mxu1 %vm16003_vm2, %v16004_v23  ;;  %v2496_v8 = vsub.f32 %v17023_v5, %v2495_v3 }
 0x20b   :  { %v2502_v13 = vand.u32 4294901760, %v17025_v55 }
 0x20c   :  { %v1311_v42 = vsub.f32 %v16868_v11, %v1310_v19  ;;  %13143 = vmatmul.mubr.f32.vlgmr.msra.gmra.mrb[0].mxu0 %v16727_v4  ;;  %v1979_v4 = vand.u32 4294901760, %v1978_v14  ;;  %v2497_v15 = vand.u32 4294901760, %v2496_v8 }
 0x20d   :  { %14692 = vmatpush3.bf16.msra.mxu0 %v16873_v21  ;;  %13145 = vmatprep.mubr.f32.mxu0 %v16720_v62  ;;  %v16909_v62 = vpack.c.bf16 %v1972_v28, %v1965_v27 }
 0x20e   :  { %v1312_v29 = vand.u32 4294901760, %v1311_v42  ;;  %14693 = vmatprep.subr.bf16.mxu0 %v16002_v18 }
 0x210   :  { %13169 = vmatmul.mubr.f32.gmra.mrb[8].mxu1 %v1312_v29  ;;  %13146 = vmatmul.mubr.f32.gmra.mrb[2].mxu0 %v16742_v34  ;;  %v16921_v34 = vpack.c.bf16 %v1986_v45, %v1979_v4 }
 0x211   :  { %13179 = vmatprep.mubr.msk.f32.mxu1 %vm16003_vm2, %v16004_v23  ;;  %14695 = vmatpush3.bf16.msra.mxu0 %v16892_v44 }
 0x212   :  { %13294 = vmatprep.mubr.msk.f32.mxu0 %vm16003_vm2, %v16004_v23  ;;  %14696 = vmatprep.subr.bf16.mxu0 %v16002_v18 }
 0x214   :  { %13180 = vmatmul.mubr.f32.vlgmr.msra.gmra.mrb[0].mxu1 %v16757_v60  ;;  %13295 = vmatmul.mubr.f32.vlgmr.msra.gmra.mrb[4].mxu0 %v16004_v23 }
 0x215   :  { %13182 = vmatprep.mubr.msk.f32.mxu1 %vm16003_vm2, %v16004_v23  ;;  %14668 = vmatpush3.bf16.msra.mxu1 %v14667_v16  ;;  %v1867_v16 = vld [vmem:[%s18180_s10 + $0x8] sm:$0xff]  ;;  %s16005_s10 = smov 64  }
 0x216   :  { %14669 = vmatprep.subr.bf16.mxu1 %v16002_v18  ;;  %14698 = vmatpush3.bf16.msra.mxu0 %v16909_v62  ;;  %v2403_v46 = vand.u32 4294901760, %v1867_v16 }
 0x217   :  { %13305 = vmatprep.mubr.msk.f32.mxu0 %vm16003_vm2, %v16004_v23  ;;  %14699 = vmatprep.subr.bf16.mxu0 %v16002_v18 }
 0x218   :  { %13183 = vmatmul.mubr.f32.gmra.mrb[2].mxu1 %v16767_v2  ;;  %v17011_v63 = vsub.f32 %v1867_v16, %v2403_v46  ;;  %v17031_v57 = vpack.c.bf16 %v2403_v46, %v2400_v30  ;;  %v17189_v46 = vld [vmem:[#allocation12] ss:$0 sm:$0xff] }
 0x219   :  { %13185 = vmatprep.mubr.msk.f32.mxu1 %vm16003_vm2, %v16004_v23  ;;  %14671 = vmatpush3.bf16.msra.mxu1 %v14670_v17  ;;  %v16994_v17 = vpack.c.bf16 %v1984_v25, %v1977_v24 }
 0x21a   :  { %14672 = vmatprep.subr.bf16.mxu1 %v16002_v18  ;;  %14701 = vmatpush3.bf16.msra.mxu0 %v16921_v34  ;;  %v2488_v1 = vand.u32 4294901760, %v17011_v63 }
 0x21b   :  { %14702 = vmatprep.subr.bf16.mxu0 %v16002_v18 }
 0x21c   :  { %13186 = vmatmul.mubr.f32.gmra.mrb[4].mxu1 %v16795_v33  ;;  %v2489_v38 = vsub.f32 %v17011_v63, %v2488_v1 }
 0x21d   :  { %13188 = vmatprep.mubr.msk.f32.mxu1 %vm16003_vm2, %v16004_v23  ;;  %13306 = vmatmul.mubr.f32.vlgmr.msra.gmra.mrb[4].mxu0 %v16004_v23 }
 0x21e   :  { %14704 = vmatpush3.bf16.msra.mxu0 %v16936_v32  ;;  %13316 = vmatprep.mubr.msk.f32.mxu0 %vm16003_vm2, %v16004_v23 }
 0x21f   :  { %14705 = vmatprep.subr.bf16.mxu0 %v16002_v18 }
 0x220   :  { %13189 = vmatmul.mubr.f32.gmra.mrb[6].mxu1 %v16834_v6 }
 0x221   :  { %13191 = vmatprep.mubr.msk.f32.mxu1 %vm16003_vm2, %v16004_v23 }
 0x222   :  { %14707 = vmatpush3.bf16.msra.mxu0 %v16946_v37 }
 0x223   :  { %14708 = vmatprep.subr.bf16.mxu0 %v16002_v18 }
 0x224   :  { %13192 = vmatmul.mubr.f32.gmra.mrb[8].mxu1 %v16853_v0 }
 0x225   :  { %13202 = vmatprep.mubr.msk.f32.mxu1 %vm16003_vm2, %v16004_v23  ;;  %13317 = vmatmul.mubr.f32.vlgmr.msra.gmra.mrb[4].mxu0 %v16004_v23 }
 0x226   :  { %14710 = vmatpush3.bf16.msra.mxu0 %v16873_v21  ;;  %13327 = vmatprep.mubr.msk.f32.mxu0 %vm16003_vm2, %v16004_v23 }
 0x227   :  { %14711 = vmatprep.subr.bf16.mxu0 %v16002_v18 }
 0x228   :  { %13203 = vmatmul.mubr.f32.vlgmr.msra.gmra.mrb[0].mxu1 %v16762_v61  ;;  %v2483_v61 = vand.u32 4294901760, %v2482_v56 }
 0x229   :  { %13205 = vmatprep.mubr.msk.f32.mxu1 %vm16003_vm2, %v16004_v23  ;;  %14674 = vmatpush3.bf16.msra.mxu1 %v16658_v35 }
 0x22a   :  { %14675 = vmatprep.subr.bf16.mxu1 %v16002_v18  ;;  %14713 = vmatpush3.bf16.msra.mxu0 %v16892_v44 }
 0x22b   :  { %14714 = vmatprep.subr.bf16.mxu0 %v16002_v18 }
 0x22c   :  { %13206 = vmatmul.mubr.f32.gmra.mrb[2].mxu1 %v16775_v10  ;;  %v17090_v10 = vpack.c.bf16 %v17011_v63, %v17009_v9 }
 0x22d   :  { %13208 = vmatprep.mubr.msk.f32.mxu1 %vm16003_vm2, %v16004_v23  ;;  %14677 = vmatpush3.bf16.msra.mxu1 %v16663_v12 }
 0x22e   :  { %13328 = vmatmul.mubr.f32.vlgmr.msra.gmra.mrb[4].mxu0 %v16004_v23  ;;  %14678 = vmatprep.subr.bf16.mxu1 %v16002_v18 }
 0x22f   :  { %14716 = vmatpush3.bf16.msra.mxu0 %v16974_v41  ;;  %13338 = vmatprep.mubr.msk.f32.mxu0 %vm16003_vm2, %v16004_v23 }
 0x230   :  { %13209 = vmatmul.mubr.f32.gmra.mrb[4].mxu1 %v16802_v58  ;;  %14717 = vmatprep.subr.bf16.mxu0 %v16002_v18 }
 0x231   :  { %13211 = vmatprep.mubr.msk.f32.mxu1 %vm16003_vm2, %v16004_v23 }
 0x233   :  { %14719 = vmatpush3.bf16.msra.mxu0 %v16994_v17 }
 0x234   :  { %13212 = vmatmul.mubr.f32.gmra.mrb[6].mxu1 %v16847_v59  ;;  %14720 = vmatprep.subr.bf16.mxu0 %v16002_v18 }
 0x235   :  { %13214 = vmatprep.mubr.msk.f32.mxu1 %vm16003_vm2, %v16004_v23 }
 0x236   :  { %13339 = vmatmul.mubr.f32.vlgmr.msra.gmra.mrb[4].mxu0 %v16004_v23 }
 0x237   :  { %14722 = vmatpush3.bf16.msra.mxu0 %v16873_v21  ;;  %13349 = vmatprep.mubr.msk.f32.mxu0 %vm16003_vm2, %v16004_v23 }
 0x238   :  { %13215 = vmatmul.mubr.f32.gmra.mrb[8].mxu1 %v16868_v11  ;;  %14723 = vmatprep.subr.bf16.mxu0 %v16002_v18 }
 0x239   :  { %13225 = vmatprep.mubr.msk.f32.mxu1 %vm16003_vm2, %v16004_v23 }
 0x23b   :  { %14725 = vmatpush3.bf16.msra.mxu0 %v16892_v44 }
 0x23c   :  { %13226 = vmatmul.mubr.f32.vlgmr.msra.gmra.mrb[0].mxu1 %v1270_v49  ;;  %14726 = vmatprep.subr.bf16.mxu0 %v16002_v18  ;;  %v2490_v49 = vand.u32 4294901760, %v2489_v38 }
 0x23d   :  { %13228 = vmatprep.mubr.msk.f32.mxu1 %vm16003_vm2, %v16004_v23  ;;  %14680 = vmatpush3.bf16.msra.mxu1 %v16707_v26  ;;  %v2503_v26 = vsub.f32 %v17025_v55, %v2502_v13 }
 0x23e   :  { %14681 = vmatprep.subr.bf16.mxu1 %v16002_v18  ;;  %13350 = vmatmul.mubr.f32.vlgmr.msra.gmra.mrb[4].mxu0 %v16004_v23  ;;  %v17069_v53 = vpack.c.bf16 %v2490_v49, %v2483_v61 }
 0x23f   :  { %14728 = vmatpush3.bf16.msra.mxu0 %v17031_v57  ;;  %13360 = vmatprep.mubr.msk.f32.mxu0 %vm16003_vm2, %v16004_v23  ;;  %v2504_v47 = vand.u32 4294901760, %v2503_v26 }
 0x240   :  { %13229 = vmatmul.mubr.f32.gmra.mrb[2].mxu1 %v1280_v20  ;;  %14729 = vmatprep.subr.bf16.mxu0 %v16002_v18  ;;  %v17101_v20 = vpack.c.bf16 %v17025_v55, %v17023_v5 }
 0x241   :  { %13231 = vmatprep.mubr.msk.f32.mxu1 %vm16003_vm2, %v16004_v23  ;;  %14683 = vmatpush3.bf16.msra.mxu1 %v16713_v48  ;;  %v17078_v48 = vpack.c.bf16 %v2504_v47, %v2497_v15 }
 0x242   :  { %14684 = vmatprep.subr.bf16.mxu1 %v16002_v18 }
 0x243   :  { %14731 = vmatpush3.bf16.msra.mxu0 %v17050_v36 }
 0x244   :  { %13232 = vmatmul.mubr.f32.gmra.mrb[4].mxu1 %v1290_v7  ;;  %14732 = vmatprep.subr.bf16.mxu0 %v16002_v18 }
 0x245   :  { %13234 = vmatprep.mubr.msk.f32.mxu1 %vm16003_vm2, %v16004_v23 }
 0x246   :  { %13361 = vmatmul.mubr.f32.vlgmr.msra.gmra.mrb[6].mxu0 %v16004_v23 }
 0x247   :  { %14734 = vmatpush3.bf16.msra.mxu0 %v17069_v53  ;;  %13371 = vmatprep.mubr.msk.f32.mxu0 %vm16003_vm2, %v16004_v23 }
 0x248   :  { %13235 = vmatmul.mubr.f32.gmra.mrb[6].mxu1 %v1300_v39  ;;  %14735 = vmatprep.subr.bf16.mxu0 %v16002_v18 }
 0x249   :  { %13237 = vmatprep.mubr.msk.f32.mxu1 %vm16003_vm2, %v16004_v23 }
 0x24b   :  { %14737 = vmatpush3.bf16.msra.mxu0 %v17078_v48 }
 0x24c   :  { %13238 = vmatmul.mubr.f32.gmra.mrb[8].mxu1 %v1310_v19  ;;  %14738 = vmatprep.subr.bf16.mxu0 %v16002_v18 }
 0x24d   :  { %13248 = vmatprep.mubr.msk.f32.mxu1 %vm16003_vm2, %v16004_v23 }
 0x24e   :  { %13372 = vmatmul.mubr.f32.vlgmr.msra.gmra.mrb[6].mxu0 %v16004_v23 }
 0x24f   :  { %14740 = vmatpush3.bf16.msra.mxu0 %v17090_v10  ;;  %13382 = vmatprep.mubr.msk.f32.mxu0 %vm16003_vm2, %v16004_v23 }
 0x250   :  { %13249 = vmatmul.mubr.f32.vlgmr.msra.gmra.mrb[0].mxu1 %v16757_v60  ;;  %14741 = vmatprep.subr.bf16.mxu0 %v16002_v18 }
 0x251   :  { %13251 = vmatprep.mubr.msk.f32.mxu1 %vm16003_vm2, %v16004_v23  ;;  %14686 = vmatpush3.bf16.msra.mxu1 %v16658_v35  ;;  %v17131_v35 = vpack.c.bf16 %v2488_v1, %v2481_v40 }
 0x252   :  { %14687 = vmatprep.subr.bf16.mxu1 %v16002_v18 }
 0x253   :  { %14743 = vmatpush3.bf16.msra.mxu0 %v17101_v20 }
 0x254   :  { %13252 = vmatmul.mubr.f32.gmra.mrb[2].mxu1 %v16767_v2  ;;  %14744 = vmatprep.subr.bf16.mxu0 %v16002_v18 }
 0x255   :  { %13254 = vmatprep.mubr.msk.f32.mxu1 %vm16003_vm2, %v16004_v23  ;;  %14689 = vmatpush3.bf16.msra.mxu1 %v16663_v12  ;;  %v17143_v12 = vpack.c.bf16 %v2502_v13, %v2495_v3 }
 0x256   :  { %13383 = vmatmul.mubr.f32.vlgmr.msra.gmra.mrb[6].mxu0 %v16004_v23  ;;  %14762 = vmatprep.subr.bf16.mxu1 %v16002_v18 }
 0x257   :  { %14746 = vmatpush3.bf16.msra.mxu0 %v17031_v57  ;;  %13393 = vmatprep.mubr.msk.f32.mxu0 %vm16003_vm2, %v16004_v23 }
 0x258   :  { %13255 = vmatmul.mubr.f32.gmra.mrb[4].mxu1 %v16795_v33  ;;  %14747 = vmatprep.subr.bf16.mxu0 %v16002_v18 }
 0x259   :  { %13257 = vmatprep.mubr.msk.f32.mxu1 %vm16003_vm2, %v16004_v23 }
 0x25b   :  { %14749 = vmatpush3.bf16.msra.mxu0 %v17050_v36 }
 0x25c   :  { %13258 = vmatmul.mubr.f32.gmra.mrb[6].mxu1 %v16834_v6  ;;  %14750 = vmatprep.subr.bf16.mxu0 %v16002_v18 }
 0x25d   :  { %13260 = vmatprep.mubr.msk.f32.mxu1 %vm16003_vm2, %v16004_v23 }
 0x25e   :  { %13394 = vmatmul.mubr.f32.vlgmr.msra.gmra.mrb[6].mxu0 %v16004_v23 }
 0x25f   :  { %14752 = vmatpush3.bf16.msra.mxu0 %v17131_v35  ;;  %13404 = vmatprep.mubr.msk.f32.mxu0 %vm16003_vm2, %v16004_v23 }
 0x260   :  { %13261 = vmatmul.mubr.f32.gmra.mrb[8].mxu1 %v16853_v0  ;;  %14753 = vmatprep.subr.bf16.mxu0 %v16002_v18 }
 0x261   :  { %13271 = vmatprep.mubr.msk.f32.mxu1 %vm16003_vm2, %v16004_v23 }
 0x263   :  { %14755 = vmatpush3.bf16.msra.mxu0 %v17143_v12 }
 0x264   :  { %13272 = vmatmul.mubr.f32.vlgmr.msra.gmra.mrb[0].mxu1 %v16757_v60  ;;  %14756 = vmatprep.subr.bf16.mxu0 %v16002_v18  ;;  %v12300_v60 = vld [vmem:[#allocation9] ss:$0 sm:$0xff] }
 0x265   :  { %13274 = vmatprep.mubr.msk.f32.mxu1 %vm16003_vm2, %v16004_v23  ;;  %14764 = vmatpush3.bf16.msra.mxu1 %v16873_v21 }
 0x266   :  { %13405 = vmatmul.mubr.f32.vlgmr.msra.gmra.mrb[6].mxu0 %v16004_v23  ;;  %14765 = vmatprep.subr.bf16.mxu1 %v16002_v18 }
 0x267   :  { %14758 = vmatpush3.bf16.msra.mxu0 %v17031_v57  ;;  %13415 = vmatprep.mubr.msk.f32.mxu0 %vm16003_vm2, %v16004_v23 }
 0x268   :  { %13275 = vmatmul.mubr.f32.gmra.mrb[2].mxu1 %v16767_v2  ;;  %14759 = vmatprep.subr.bf16.mxu0 %v16002_v18 }
 0x269   :  { %13277 = vmatprep.mubr.msk.f32.mxu1 %vm16003_vm2, %v16004_v23  ;;  %14767 = vmatpush3.bf16.msra.mxu1 %v16892_v44 }
 0x26a   :  { %14768 = vmatprep.subr.bf16.mxu1 %v16002_v18 }
 0x26b   :  { %14761 = vmatpush3.bf16.msra.mxu0 %v17050_v36 }
 0x26c   :  { %13278 = vmatmul.mubr.f32.gmra.mrb[4].mxu1 %v16795_v33  ;;  %14798 = vmatprep.subr.bf16.mxu0 %v16002_v18 }
 0x26d   :  { %13280 = vmatprep.mubr.msk.f32.mxu1 %vm16003_vm2, %v16004_v23 }
 0x26e   :  { %13416 = vmatmul.mubr.f32.vlgmr.msra.gmra.mrb[6].mxu0 %v16004_v23 }
 0x26f   :  { %14800 = vmatpush3.bf16.msra.mxu0 %v17031_v57  ;;  %13492 = vmatprep.mubr.msk.f32.mxu0 %vm16003_vm2, %v16004_v23 }
 0x270   :  { %13281 = vmatmul.mubr.f32.gmra.mrb[6].mxu1 %v16834_v6  ;;  %14801 = vmatprep.subr.bf16.mxu0 %v16002_v18 }
 0x271   :  { %13283 = vmatprep.mubr.msk.f32.mxu1 %vm16003_vm2, %v16004_v23 }
 0x273   :  { %14803 = vmatpush3.bf16.msra.mxu0 %v17050_v36 }
 0x274   :  { %13284 = vmatmul.mubr.f32.gmra.mrb[8].mxu1 %v16853_v0  ;;  %14804 = vmatprep.subr.bf16.mxu0 %v16002_v18 }
 0x275   :  { %13426 = vmatprep.mubr.msk.f32.mxu1 %vm16003_vm2, %v16004_v23 }
 0x2df   :  { %v13144_v2 = vpop.f32.mrb[0].mxu0 }
 0x2e0   :  { %v15410_v33 = vadd.f32 %v13144_v2, %v12300_v60  ;;  %v917_v58 = vpop.f32.mrb[1].mxu0 }
 0x2e1   :  { %v15411_v7 = vadd.f32 %v12300_v60, %v917_v58 }
 0x2e2   :  { %940 = vst [vmem:[#allocation4 + $0x8] sm:$0xff] %v15410_v33 }
 0x2e3   :  { %939 = vst [vmem:[#allocation4] sm:$0xff] %v15411_v7  ;;  %v13147_v6 = vpop.f32.mrb[2].mxu0 }
 0x2e4   :  { %v15412_v59 = vadd.f32 %v13147_v6, %v12300_v60  ;;  %v929_v39 = vpop.f32.mrb[3].mxu0 }
 0x2e5   :  { %v15413_v11 = vadd.f32 %v12300_v60, %v929_v39 }
 0x2e6   :  { %942 = vst [vmem:[#allocation4 + $0x18] sm:$0xff] %v15412_v59 }
 0x2e7   :  { %941 = vst [vmem:[#allocation4 + $0x10] sm:$0xff] %v15413_v11 }
 0x2ea   :  { %v1871_v55 = vld [vmem:[#allocation4] sm:$0xf] }
 0x311   :  { %v2362_v19 = vpop.f32.mrb[4].mxu0 }
 0x312   :  { %v13351_v0 = vpop.f32.mrb[5].mxu0  ;;  %v15419_v52 = vadd.f32 %v17189_v46, %v2362_v19 }
 0x314   :  { %v2366_v56 = vadd.f32 %v15419_v52, %v1871_v55 }
 0x316   :  { %v12342_v3 = vmul.f32 -1.442695, %v2366_v56 }
 0x337   :  { %v1828_v24 = vpop.f32.mrb[0].mxu1 }
 0x338   :  { %v15414_v25 = vadd.f32 %v12340_v22, %v1828_v24  ;;  %v13273_v42 = vpop.f32.mrb[1].mxu1 }
 0x33a   :  { %1856 = vst [vmem:[#allocation5] sm:$0xff] %v15414_v25 }
 0x33b   :  { %v1834_v29 = vpop.f32.mrb[2].mxu1 }
 0x33c   :  { %v15415_v27 = vadd.f32 %v12340_v22, %v1834_v29  ;;  %v13276_v28 = vpop.f32.mrb[3].mxu1 }
 0x33e   :  { %1857 = vst [vmem:[#allocation5 + $0x8] sm:$0xff] %v15415_v27 }
 0x33f   :  { %v1840_v14 = vpop.f32.mrb[4].mxu1 }
 0x340   :  { %v15416_v4 = vadd.f32 %v12340_v22, %v1840_v14  ;;  %v13279_v45 = vpop.f32.mrb[5].mxu1 }
 0x341   :  { %v2880_v43 = vpop.f32.mrb[6].mxu0  ;;  %v2392_v1 = vld [vmem:[#allocation5] sm:$0xf] }
 0x342   :  { %1858 = vst [vmem:[#allocation5 + $0x10] sm:$0xff] %v15416_v4  ;;  %v15420_v16 = vadd.f32 %v17186_v50, %v2880_v43  ;;  %v13417_v30 = vpop.f32.mrb[7].mxu0 }
 0x343   :  { %v1846_v31 = vpop.f32.mrb[6].mxu1 }
 0x344   :  { %v15417_v51 = vadd.f32 %v12340_v22, %v1846_v31  ;;  %v13282_v54 = vpop.f32.mrb[7].mxu1  ;;  %2892 = vrot.lane.b32.xlu0 %v15420_v16, %s16005_s10  ;;  %v2884_v5 = vadd.f32 %v15420_v16, %v2392_v1 }
 0x346   :  { %1859 = vst [vmem:[#allocation5 + $0x18] sm:$0xff] %v15417_v51  ;;  %v12344_v38 = vmul.f32 -1.442695, %v2884_v5 }
 0x347   :  { %v1852_v9 = vpop.f32.mrb[8].mxu1 }
 0x348   :  { %v15418_v63 = vadd.f32 %v12340_v22, %v1852_v9  ;;  %v13285_v40 = vpop.f32.mrb[9].mxu1  ;;  %2374 = vrot.lane.b32.xlu0 %v15419_v52, %s16005_s10  ;;  %15718 = vpow2.f32 %v12344_v38 }
 0x349   :  { %15720 = vpow2.f32 %v12342_v3 }
 0x34a   :  { %1860 = vst [vmem:[#allocation5 + $0x20] sm:$0xff] %v15418_v63 }
 0x352   :  { %v15719_v13 = vpop.eup %15718 }
 0x353   :  { %v2888_v61 = vadd.f32 1.0, %v15719_v13  ;;  %v15721_v49 = vpop.eup %15720 }
 0x354   :  { %v2370_v8 = vadd.f32 1.0, %v15721_v49  ;;  %v3427_v49 = vld [vmem:[#allocation5 + $0x4] sm:$0xf] }
 0x355   :  { %15722 = vrcp.f32 %v2888_v61 }
 0x356   :  { %15724 = vrcp.f32 %v2370_v8 }
 0x35f   :  { %v15723_v26 = vpop.eup %15722 }
 0x360   :  { %v15725_v60 = vpop.eup %15724  ;;  %v2902_v19 = vsub.f32 1.0, %v15723_v26  ;;  %v2908_v22 = vmul.f32 0.0, %v15723_v26 }
 0x361   :  { %v2384_v42 = vsub.f32 1.0, %v15725_v60  ;;  %v2390_v27 = vmul.f32 0.0, %v15725_v60 }
 0x3b6   :  { %v2893_v15 = vpop.permute.xlu0 %2892 }
 0x3b7   :  { %v2895_v47 = vmul.f32 %v15723_v26, %v2893_v15  ;;  %v2910_v26 = vld [vmem:[#allocation4 + $0x4] sm:$0xf] }
 0x3b9   :  { %2897 = vrot.lane.b32.xlu1 %v2895_v47, %s16005_s10 }
 0x3ba   :  { %v2375_v2 = vpop.permute.xlu0 %2374 }
 0x3bb   :  { %v2377_v33 = vmul.f32 %v15725_v60, %v2375_v2 }
 0x3bd   :  { %2379 = vrot.lane.b32.xlu0 %v2377_v33, %s16005_s10 }
 0x42b   :  { %v2898_v58 = vpop.permute.xlu1 %2897 }
 0x42c   :  { %v2900_v7 = vadd.f32 %v2898_v58, %v2392_v1 }
 0x42e   :  { %15726 = vtanh.f32 %v2900_v7 }
 0x42f   :  { %v2380_v6 = vpop.permute.xlu0 %2379 }
 0x430   :  { %v2382_v59 = vadd.f32 %v2380_v6, %v1871_v55 }
 0x432   :  { %15728 = vtanh.f32 %v2382_v59 }
 0x438   :  { %v15727_v39 = vpop.eup %15726 }
 0x439   :  { %2904 = vrot.lane.b32.xlu1 %v15727_v39, %s16006_s11 }
 0x43c   :  { %v15729_v11 = vpop.eup %15728 }
 0x43d   :  { %2386 = vrot.lane.b32.xlu0 %v15729_v11, %s16006_s11 }
 0x4ab   :  { %v2905_v0 = vpop.permute.xlu1 %2904 }
 0x4ac   :  { %v2907_v24 = vmul.f32 %v2905_v0, %v2902_v19 }
 0x4ae   :  { %v17198_v25 = vadd.f32 %v2908_v22, %v2907_v24 }
 0x4af   :  { %v2387_v29 = vpop.permute.xlu0 %2386 }
 0x4b0   :  { %v2389_v28 = vmul.f32 %v2387_v29, %v2384_v42  ;;  %3429 = vrot.lane.b32.xlu1 %v17198_v25, %s16006_s11 }
 0x4b2   :  { %v17202_v14 = vadd.f32 %v2390_v27, %v2389_v28 }
 0x4b4   :  { %2912 = vrot.lane.b32.xlu0 %v17202_v14, %s16006_s11 }
 0x522   :  { %v3430_v4 = vpop.permute.xlu1 %3429 }
 0x523   :  { %v3431_v45 = vsel %vm248_vm1, %v3430_v4, 0 }
 0x524   :  { %v17207_v43 = vand.u32 4294901760, %v3431_v45 }
 0x526   :  { %v3503_v16 = vsub.f32 %v3431_v45, %v17207_v43  ;;  %v2913_v30 = vpop.permute.xlu0 %2912 }
 0x527   :  { %v2914_v31 = vsel %vm248_vm1, %v2913_v30, 0 }
 0x528   :  { %v3504_v51 = vand.u32 4294901760, %v3503_v16  ;;  %v17211_v54 = vand.u32 4294901760, %v2914_v31 }
 0x52a   :  { %v3505_v52 = vsub.f32 %v3503_v16, %v3504_v51  ;;  %v2986_v9 = vsub.f32 %v2914_v31, %v17211_v54 }
 0x52c   :  { %v3506_v63 = vand.u32 4294901760, %v3505_v52  ;;  %v2987_v40 = vand.u32 4294901760, %v2986_v9 }
 0x52e   :  { %v2988_v1 = vsub.f32 %v2986_v9, %v2987_v40  ;;  %13493 = vmatmul.mubr.f32.vlgmr.msra.gmra.mrb[8].mxu0 %v3506_v63 }
 0x52f   :  { %14806 = vmatpush3.bf16.msra.mxu0 %v17069_v53  ;;  %13503 = vmatprep.mubr.msk.f32.mxu0 %vm16003_vm2, %v16004_v23 }
 0x530   :  { %v2989_v5 = vand.u32 4294901760, %v2988_v1  ;;  %14807 = vmatprep.subr.bf16.mxu0 %v16002_v18 }
 0x532   :  { %13427 = vmatmul.mubr.f32.vlgmr.msra.gmra.mrb[10].mxu1 %v2989_v5 }
 0x533   :  { %14770 = vmatpush3.bf16.msra.mxu1 %v16909_v62  ;;  %14809 = vmatpush3.bf16.msra.mxu0 %v17078_v48 }
 0x534   :  { %14771 = vmatprep.subr.bf16.mxu1 %v16002_v18  ;;  %14810 = vmatprep.subr.bf16.mxu0 %v16002_v18 }
 0x535   :  { %13437 = vmatprep.mubr.msk.f32.mxu1 %vm16003_vm2, %v16004_v23 }
 0x536   :  { %13504 = vmatmul.mubr.f32.vlgmr.msra.gmra.mrb[8].mxu0 %v17207_v43 }
 0x537   :  { %14773 = vmatpush3.bf16.msra.mxu1 %v16921_v34  ;;  %14812 = vmatpush3.bf16.msra.mxu0 %v17090_v10 }
 0x538   :  { %14774 = vmatprep.subr.bf16.mxu1 %v16002_v18  ;;  %14813 = vmatprep.subr.bf16.mxu0 %v16002_v18 }
 0x539   :  { %13514 = vmatprep.mubr.msk.f32.mxu0 %vm16003_vm2, %v16004_v23 }
 0x53a   :  { %13438 = vmatmul.mubr.f32.vlgmr.msra.gmra.mrb[10].mxu1 %v17211_v54 }
 0x53b   :  { %14776 = vmatpush3.bf16.msra.mxu1 %v16936_v32  ;;  %14815 = vmatpush3.bf16.msra.mxu0 %v17101_v20 }
 0x53c   :  { %14777 = vmatprep.subr.bf16.mxu1 %v16002_v18  ;;  %14816 = vmatprep.subr.bf16.mxu0 %v16002_v18 }
 0x53d   :  { %13448 = vmatprep.mubr.msk.f32.mxu1 %vm16003_vm2, %v16004_v23 }
 0x53e   :  { %13515 = vmatmul.mubr.f32.vlgmr.msra.gmra.mrb[8].mxu0 %v3503_v16 }
 0x53f   :  { %14779 = vmatpush3.bf16.msra.mxu1 %v16946_v37  ;;  %14818 = vmatpush3.bf16.msra.mxu0 %v17031_v57 }
 0x540   :  { %14780 = vmatprep.subr.bf16.mxu1 %v16002_v18  ;;  %14819 = vmatprep.subr.bf16.mxu0 %v16002_v18 }
 0x541   :  { %13525 = vmatprep.mubr.msk.f32.mxu0 %vm16003_vm2, %v16004_v23 }
 0x542   :  { %13449 = vmatmul.mubr.f32.vlgmr.msra.gmra.mrb[10].mxu1 %v2986_v9 }
 0x543   :  { %14782 = vmatpush3.bf16.msra.mxu1 %v16873_v21  ;;  %14821 = vmatpush3.bf16.msra.mxu0 %v17050_v36 }
 0x544   :  { %14783 = vmatprep.subr.bf16.mxu1 %v16002_v18  ;;  %14822 = vmatprep.subr.bf16.mxu0 %v16002_v18 }
 0x545   :  { %13459 = vmatprep.mubr.msk.f32.mxu1 %vm16003_vm2, %v16004_v23 }
 0x546   :  { %13526 = vmatmul.mubr.f32.vlgmr.msra.gmra.mrb[8].mxu0 %v3504_v51 }
 0x547   :  { %14785 = vmatpush3.bf16.msra.mxu1 %v16892_v44  ;;  %14824 = vmatpush3.bf16.msra.mxu0 %v17131_v35 }
 0x548   :  { %14786 = vmatprep.subr.bf16.mxu1 %v16002_v18  ;;  %14825 = vmatprep.subr.bf16.mxu0 %v16002_v18 }
 0x549   :  { %13536 = vmatprep.mubr.msk.f32.mxu0 %vm16003_vm2, %v16004_v23 }
 0x54a   :  { %13460 = vmatmul.mubr.f32.vlgmr.msra.gmra.mrb[10].mxu1 %v2987_v40 }
 0x54b   :  { %14788 = vmatpush3.bf16.msra.mxu1 %v16974_v41  ;;  %14827 = vmatpush3.bf16.msra.mxu0 %v17143_v12 }
 0x54c   :  { %14789 = vmatprep.subr.bf16.mxu1 %v16002_v18  ;;  %14828 = vmatprep.subr.bf16.mxu0 %v16002_v18 }
 0x54d   :  { %13470 = vmatprep.mubr.msk.f32.mxu1 %vm16003_vm2, %v16004_v23 }
 0x54e   :  { %13537 = vmatmul.mubr.f32.vlgmr.msra.gmra.mrb[8].mxu0 %v17207_v43 }
 0x54f   :  { %14791 = vmatpush3.bf16.msra.mxu1 %v16994_v17  ;;  %14830 = vmatpush3.bf16.msra.mxu0 %v17031_v57 }
 0x550   :  { %14792 = vmatprep.subr.bf16.mxu1 %v16002_v18  ;;  %14831 = vmatprep.subr.bf16.mxu0 %v16002_v18 }
 0x551   :  { %13547 = vmatprep.mubr.msk.f32.mxu0 %vm16003_vm2, %v16004_v23 }
 0x552   :  { %13471 = vmatmul.mubr.f32.vlgmr.msra.gmra.mrb[10].mxu1 %v17211_v54 }
 0x553   :  { %14794 = vmatpush3.bf16.msra.mxu1 %v16873_v21  ;;  %14833 = vmatpush3.bf16.msra.mxu0 %v17050_v36 }
 0x554   :  { %14795 = vmatprep.subr.bf16.mxu1 %v16002_v18  ;;  %13481 = vmatprep.mubr.msk.f32.mxu1 %vm16003_vm2, %v16004_v23 }
 0x555   :  { %14870 = vmatprep.subr.bf16.mxu0 %v16002_v18 }
 0x556   :  { %13548 = vmatmul.mubr.f32.vlgmr.msra.gmra.mrb[8].mxu0 %v17207_v43 }
 0x557   :  { %14797 = vmatpush3.bf16.msra.mxu1 %v16892_v44  ;;  %14872 = vmatpush3.bf16.msra.mxu0 %v17031_v57 }
 0x558   :  { %14834 = vmatprep.subr.bf16.mxu1 %v16002_v18  ;;  %14873 = vmatprep.subr.bf16.mxu0 %v16002_v18 }
 0x559   :  { %13624 = vmatprep.mubr.msk.f32.mxu0 %vm16003_vm2, %v16004_v23 }
 0x55a   :  { %13482 = vmatmul.mubr.f32.vlgmr.msra.gmra.mrb[10].mxu1 %v17211_v54 }
 0x55b   :  { %14836 = vmatpush3.bf16.msra.mxu1 %v16873_v21  ;;  %14875 = vmatpush3.bf16.msra.mxu0 %v17050_v36 }
 0x55c   :  { %14837 = vmatprep.subr.bf16.mxu1 %v16002_v18  ;;  %14876 = vmatprep.subr.bf16.mxu0 %v16002_v18 }
 0x55d   :  { %13558 = vmatprep.mubr.msk.f32.mxu1 %vm16003_vm2, %v16004_v23 }
 0x55f   :  { %14839 = vmatpush3.bf16.msra.mxu1 %v16892_v44 }
 0x560   :  { %14840 = vmatprep.subr.bf16.mxu1 %v16002_v18 }
 0x629   :  { %v3914_v55 = vpop.f32.mrb[8].mxu0 }
 0x62a   :  { %v15422_v56 = vadd.f32 %v17186_v50, %v3914_v55  ;;  %v13549_v38 = vpop.f32.mrb[9].mxu0 }
 0x62c   :  { %3926 = vrot.lane.b32.xlu1 %v15422_v56, %s16005_s10  ;;  %v3918_v8 = vadd.f32 %v15422_v56, %v3427_v49 }
 0x62d   :  { %v3397_v3 = vpop.f32.mrb[10].mxu1 }
 0x62e   :  { %v15421_v13 = vadd.f32 %v17189_v46, %v3397_v3  ;;  %v13483_v61 = vpop.f32.mrb[11].mxu1  ;;  %v12346_v15 = vmul.f32 -1.442695, %v3918_v8 }
 0x630   :  { %3409 = vrot.lane.b32.xlu0 %v15421_v13, %s16005_s10  ;;  %v3401_v47 = vadd.f32 %v15421_v13, %v2910_v26  ;;  %15730 = vpow2.f32 %v12346_v15 }
 0x632   :  { %v12345_v60 = vmul.f32 -1.442695, %v3401_v47 }
 0x634   :  { %15732 = vpow2.f32 %v12345_v60 }
 0x63a   :  { %v15731_v2 = vpop.eup %15730 }
 0x63b   :  { %v3922_v33 = vadd.f32 1.0, %v15731_v2 }
 0x63d   :  { %15734 = vrcp.f32 %v3922_v33 }
 0x63e   :  { %v15733_v58 = vpop.eup %15732 }
 0x63f   :  { %v3405_v7 = vadd.f32 1.0, %v15733_v58  ;;  %v4461_v58 = vld [vmem:[#allocation5 + $0x8] sm:$0xf] }
 0x641   :  { %15736 = vrcp.f32 %v3405_v7 }
 0x647   :  { %v15735_v6 = vpop.eup %15734 }
 0x648   :  { %v3936_v4 = vsub.f32 1.0, %v15735_v6  ;;  %v3942_v43 = vmul.f32 %v15735_v6, %v17198_v25 }
 0x64b   :  { %v15737_v11 = vpop.eup %15736 }
 0x64c   :  { %v3419_v31 = vsub.f32 1.0, %v15737_v11  ;;  %v3425_v54 = vmul.f32 %v15737_v11, %v17202_v14 }
 0x69e   :  { %v3927_v59 = vpop.permute.xlu1 %3926 }
 0x69f   :  { %v3929_v39 = vmul.f32 %v15735_v6, %v3927_v59  ;;  %v3944_v6 = vld [vmem:[#allocation4 + $0x8] sm:$0xf] }
 0x6a1   :  { %3931 = vrot.lane.b32.xlu1 %v3929_v39, %s16005_s10 }
 0x6a2   :  { %v3410_v19 = vpop.permute.xlu0 %3409 }
 0x6a3   :  { %v3412_v0 = vmul.f32 %v15737_v11, %v3410_v19 }
 0x6a5   :  { %3414 = vrot.lane.b32.xlu0 %v3412_v0, %s16005_s10 }
 0x713   :  { %v3932_v22 = vpop.permute.xlu1 %3931 }
 0x714   :  { %v3934_v24 = vadd.f32 %v3932_v22, %v3427_v49 }
 0x716   :  { %15738 = vtanh.f32 %v3934_v24 }
 0x717   :  { %v3415_v42 = vpop.permute.xlu0 %3414 }
 0x718   :  { %v3417_v29 = vadd.f32 %v3415_v42, %v2910_v26 }
 0x71a   :  { %15740 = vtanh.f32 %v3417_v29 }
 0x720   :  { %v15739_v27 = vpop.eup %15738 }
 0x721   :  { %3938 = vrot.lane.b32.xlu1 %v15739_v27, %s16006_s11 }
 0x724   :  { %v15741_v28 = vpop.eup %15740 }
 0x725   :  { %3421 = vrot.lane.b32.xlu0 %v15741_v28, %s16006_s11 }
 0x793   :  { %v3939_v45 = vpop.permute.xlu1 %3938 }
 0x794   :  { %v3941_v16 = vmul.f32 %v3939_v45, %v3936_v4 }
 0x796   :  { %v17301_v30 = vadd.f32 %v3942_v43, %v3941_v16 }
 0x797   :  { %v3422_v51 = vpop.permute.xlu0 %3421 }
 0x798   :  { %v3424_v52 = vmul.f32 %v3422_v51, %v3419_v31  ;;  %4463 = vrot.lane.b32.xlu1 %v17301_v30, %s16006_s11 }
 0x79a   :  { %v17306_v9 = vadd.f32 %v3425_v54, %v3424_v52 }
 0x79c   :  { %3946 = vrot.lane.b32.xlu0 %v17306_v9, %s16006_s11 }
 0x80a   :  { %v4464_v63 = vpop.permute.xlu1 %4463 }
 0x80b   :  { %v4465_v40 = vsel %vm248_vm1, %v4464_v63, 0 }
 0x80c   :  { %v17311_v25 = vand.u32 4294901760, %v4465_v40 }
 0x80e   :  { %v4537_v1 = vsub.f32 %v4465_v40, %v17311_v25  ;;  %v3947_v5 = vpop.permute.xlu0 %3946 }
 0x80f   :  { %v3948_v55 = vsel %vm248_vm1, %v3947_v5, 0 }
 0x810   :  { %v4538_v14 = vand.u32 4294901760, %v4537_v1  ;;  %v17315_v56 = vand.u32 4294901760, %v3948_v55 }
 0x812   :  { %v4539_v38 = vsub.f32 %v4537_v1, %v4538_v14  ;;  %v4020_v3 = vsub.f32 %v3948_v55, %v17315_v56 }
 0x814   :  { %v4540_v13 = vand.u32 4294901760, %v4539_v38  ;;  %v4021_v61 = vand.u32 4294901760, %v4020_v3 }
 0x816   :  { %v4022_v49 = vsub.f32 %v4020_v3, %v4021_v61  ;;  %13625 = vmatmul.mubr.f32.vlgmr.msra.gmra.mrb[10].mxu0 %v4540_v13 }
 0x817   :  { %14878 = vmatpush3.bf16.msra.mxu0 %v17069_v53  ;;  %13635 = vmatprep.mubr.msk.f32.mxu0 %vm16003_vm2, %v16004_v23 }
 0x818   :  { %v4023_v8 = vand.u32 4294901760, %v4022_v49  ;;  %14879 = vmatprep.subr.bf16.mxu0 %v16002_v18 }
 0x81a   :  { %13559 = vmatmul.mubr.f32.vlgmr.msra.gmra.mrb[12].mxu1 %v4023_v8 }
 0x81b   :  { %14842 = vmatpush3.bf16.msra.mxu1 %v16909_v62  ;;  %14881 = vmatpush3.bf16.msra.mxu0 %v17078_v48 }
 0x81c   :  { %14843 = vmatprep.subr.bf16.mxu1 %v16002_v18  ;;  %14882 = vmatprep.subr.bf16.mxu0 %v16002_v18 }
 0x81d   :  { %13569 = vmatprep.mubr.msk.f32.mxu1 %vm16003_vm2, %v16004_v23 }
 0x81e   :  { %13636 = vmatmul.mubr.f32.vlgmr.msra.gmra.mrb[10].mxu0 %v17311_v25 }
 0x81f   :  { %14845 = vmatpush3.bf16.msra.mxu1 %v16921_v34  ;;  %14884 = vmatpush3.bf16.msra.mxu0 %v17090_v10 }
 0x820   :  { %14846 = vmatprep.subr.bf16.mxu1 %v16002_v18  ;;  %14885 = vmatprep.subr.bf16.mxu0 %v16002_v18 }
 0x821   :  { %13646 = vmatprep.mubr.msk.f32.mxu0 %vm16003_vm2, %v16004_v23 }
 0x822   :  { %13570 = vmatmul.mubr.f32.vlgmr.msra.gmra.mrb[12].mxu1 %v17315_v56 }
 0x823   :  { %14848 = vmatpush3.bf16.msra.mxu1 %v16936_v32  ;;  %14887 = vmatpush3.bf16.msra.mxu0 %v17101_v20 }
 0x824   :  { %14849 = vmatprep.subr.bf16.mxu1 %v16002_v18  ;;  %14888 = vmatprep.subr.bf16.mxu0 %v16002_v18 }
 0x825   :  { %13580 = vmatprep.mubr.msk.f32.mxu1 %vm16003_vm2, %v16004_v23 }
 0x826   :  { %13647 = vmatmul.mubr.f32.vlgmr.msra.gmra.mrb[10].mxu0 %v4537_v1 }
 0x827   :  { %14851 = vmatpush3.bf16.msra.mxu1 %v16946_v37  ;;  %14890 = vmatpush3.bf16.msra.mxu0 %v17031_v57 }
 0x828   :  { %14852 = vmatprep.subr.bf16.mxu1 %v16002_v18  ;;  %14891 = vmatprep.subr.bf16.mxu0 %v16002_v18 }
 0x829   :  { %13657 = vmatprep.mubr.msk.f32.mxu0 %vm16003_vm2, %v16004_v23 }
 0x82a   :  { %13581 = vmatmul.mubr.f32.vlgmr.msra.gmra.mrb[12].mxu1 %v4020_v3 }
 0x82b   :  { %14854 = vmatpush3.bf16.msra.mxu1 %v16873_v21  ;;  %14893 = vmatpush3.bf16.msra.mxu0 %v17050_v36 }
 0x82c   :  { %14855 = vmatprep.subr.bf16.mxu1 %v16002_v18  ;;  %14894 = vmatprep.subr.bf16.mxu0 %v16002_v18 }
 0x82d   :  { %13591 = vmatprep.mubr.msk.f32.mxu1 %vm16003_vm2, %v16004_v23 }
 0x82e   :  { %13658 = vmatmul.mubr.f32.vlgmr.msra.gmra.mrb[10].mxu0 %v4538_v14 }
 0x82f   :  { %14857 = vmatpush3.bf16.msra.mxu1 %v16892_v44  ;;  %14896 = vmatpush3.bf16.msra.mxu0 %v17131_v35 }
 0x830   :  { %14858 = vmatprep.subr.bf16.mxu1 %v16002_v18  ;;  %14897 = vmatprep.subr.bf16.mxu0 %v16002_v18 }
 0x831   :  { %13668 = vmatprep.mubr.msk.f32.mxu0 %vm16003_vm2, %v16004_v23 }
 0x832   :  { %13592 = vmatmul.mubr.f32.vlgmr.msra.gmra.mrb[12].mxu1 %v4021_v61 }
 0x833   :  { %14860 = vmatpush3.bf16.msra.mxu1 %v16974_v41  ;;  %14899 = vmatpush3.bf16.msra.mxu0 %v17143_v12 }
 0x834   :  { %14861 = vmatprep.subr.bf16.mxu1 %v16002_v18  ;;  %14900 = vmatprep.subr.bf16.mxu0 %v16002_v18 }
 0x835   :  { %13602 = vmatprep.mubr.msk.f32.mxu1 %vm16003_vm2, %v16004_v23 }
 0x836   :  { %13669 = vmatmul.mubr.f32.vlgmr.msra.gmra.mrb[10].mxu0 %v17311_v25 }
 0x837   :  { %14863 = vmatpush3.bf16.msra.mxu1 %v16994_v17  ;;  %14902 = vmatpush3.bf16.msra.mxu0 %v17031_v57 }
 0x838   :  { %14864 = vmatprep.subr.bf16.mxu1 %v16002_v18  ;;  %14903 = vmatprep.subr.bf16.mxu0 %v16002_v18 }
 0x839   :  { %13679 = vmatprep.mubr.msk.f32.mxu0 %vm16003_vm2, %v16004_v23 }
 0x83a   :  { %13603 = vmatmul.mubr.f32.vlgmr.msra.gmra.mrb[12].mxu1 %v17315_v56 }
 0x83b   :  { %14866 = vmatpush3.bf16.msra.mxu1 %v16873_v21  ;;  %14905 = vmatpush3.bf16.msra.mxu0 %v17050_v36 }
 0x83c   :  { %14867 = vmatprep.subr.bf16.mxu1 %v16002_v18  ;;  %13613 = vmatprep.mubr.msk.f32.mxu1 %vm16003_vm2, %v16004_v23 }
 0x83d   :  { %14942 = vmatprep.subr.bf16.mxu0 %v16002_v18 }
 0x83e   :  { %13680 = vmatmul.mubr.f32.vlgmr.msra.gmra.mrb[10].mxu0 %v17311_v25 }
 0x83f   :  { %14869 = vmatpush3.bf16.msra.mxu1 %v16892_v44  ;;  %14944 = vmatpush3.bf16.msra.mxu0 %v17031_v57 }
 0x840   :  { %14906 = vmatprep.subr.bf16.mxu1 %v16002_v18  ;;  %14945 = vmatprep.subr.bf16.mxu0 %v16002_v18 }
 0x841   :  { %13756 = vmatprep.mubr.msk.f32.mxu0 %vm16003_vm2, %v16004_v23 }
 0x842   :  { %13614 = vmatmul.mubr.f32.vlgmr.msra.gmra.mrb[12].mxu1 %v17315_v56 }
 0x843   :  { %14908 = vmatpush3.bf16.msra.mxu1 %v16873_v21  ;;  %14947 = vmatpush3.bf16.msra.mxu0 %v17050_v36 }
 0x844   :  { %14909 = vmatprep.subr.bf16.mxu1 %v16002_v18  ;;  %14948 = vmatprep.subr.bf16.mxu0 %v16002_v18 }
 0x845   :  { %13690 = vmatprep.mubr.msk.f32.mxu1 %vm16003_vm2, %v16004_v23 }
 0x847   :  { %14911 = vmatpush3.bf16.msra.mxu1 %v16892_v44 }
 0x848   :  { %14912 = vmatprep.subr.bf16.mxu1 %v16002_v18 }
 0x911   :  { %v4948_v26 = vpop.f32.mrb[10].mxu0 }
 0x912   :  { %v15424_v15 = vadd.f32 %v17186_v50, %v4948_v26  ;;  %v13681_v47 = vpop.f32.mrb[11].mxu0 }
 0x914   :  { %4960 = vrot.lane.b32.xlu1 %v15424_v15, %s16005_s10  ;;  %v4952_v7 = vadd.f32 %v15424_v15, %v4461_v58 }
 0x915   :  { %v4431_v60 = vpop.f32.mrb[12].mxu1 }
 0x916   :  { %v15423_v2 = vadd.f32 %v17189_v46, %v4431_v60  ;;  %v13615_v33 = vpop.f32.mrb[13].mxu1  ;;  %v12348_v59 = vmul.f32 -1.442695, %v4952_v7 }
 0x918   :  { %4443 = vrot.lane.b32.xlu0 %v15423_v2, %s16005_s10  ;;  %v4435_v39 = vadd.f32 %v15423_v2, %v3944_v6  ;;  %15742 = vpow2.f32 %v12348_v59 }
 0x91a   :  { %v12347_v11 = vmul.f32 -1.442695, %v4435_v39 }
 0x91c   :  { %15744 = vpow2.f32 %v12347_v11 }
 0x922   :  { %v15743_v19 = vpop.eup %15742 }
 0x923   :  { %v4956_v0 = vadd.f32 1.0, %v15743_v19 }
 0x925   :  { %15746 = vrcp.f32 %v4956_v0 }
 0x926   :  { %v15745_v22 = vpop.eup %15744 }
 0x927   :  { %v4439_v24 = vadd.f32 1.0, %v15745_v22  ;;  %v5495_v22 = vld [vmem:[#allocation5 + $0xc] sm:$0xf] }
 0x929   :  { %15748 = vrcp.f32 %v4439_v24 }
 0x92f   :  { %v15747_v42 = vpop.eup %15746 }
 0x930   :  { %v4970_v63 = vsub.f32 1.0, %v15747_v42  ;;  %v4976_v25 = vmul.f32 %v15747_v42, %v17301_v30 }
 0x933   :  { %v15749_v28 = vpop.eup %15748 }
 0x934   :  { %v4453_v55 = vsub.f32 1.0, %v15749_v28  ;;  %v4459_v56 = vmul.f32 %v15749_v28, %v17306_v9 }
 0x986   :  { %v4961_v29 = vpop.permute.xlu1 %4960 }
 0x987   :  { %v4963_v27 = vmul.f32 %v15747_v42, %v4961_v29  ;;  %v4978_v42 = vld [vmem:[#allocation4 + $0xc] sm:$0xf] }
 0x989   :  { %4965 = vrot.lane.b32.xlu1 %v4963_v27, %s16005_s10 }
 0x98a   :  { %v4444_v4 = vpop.permute.xlu0 %4443 }
 0x98b   :  { %v4446_v45 = vmul.f32 %v15749_v28, %v4444_v4 }
 0x98d   :  { %4448 = vrot.lane.b32.xlu0 %v4446_v45, %s16005_s10 }
 0x9fb   :  { %v4966_v43 = vpop.permute.xlu1 %4965 }
 0x9fc   :  { %v4968_v16 = vadd.f32 %v4966_v43, %v4461_v58 }
 0x9fe   :  { %15750 = vtanh.f32 %v4968_v16 }
 0x9ff   :  { %v4449_v31 = vpop.permute.xlu0 %4448 }
 0xa00   :  { %v4451_v51 = vadd.f32 %v4449_v31, %v3944_v6 }
 0xa02   :  { %15752 = vtanh.f32 %v4451_v51 }
 0xa08   :  { %v15751_v54 = vpop.eup %15750 }
 0xa09   :  { %4972 = vrot.lane.b32.xlu1 %v15751_v54, %s16006_s11 }
 0xa0c   :  { %v15753_v52 = vpop.eup %15752 }
 0xa0d   :  { %4455 = vrot.lane.b32.xlu0 %v15753_v52, %s16006_s11 }
 0xa7b   :  { %v4973_v40 = vpop.permute.xlu1 %4972 }
 0xa7c   :  { %v4975_v1 = vmul.f32 %v4973_v40, %v4970_v63 }
 0xa7e   :  { %v17405_v5 = vadd.f32 %v4976_v25, %v4975_v1 }
 0xa7f   :  { %v4456_v14 = vpop.permute.xlu0 %4455 }
 0xa80   :  { %v4458_v38 = vmul.f32 %v4456_v14, %v4453_v55  ;;  %5497 = vrot.lane.b32.xlu1 %v17405_v5, %s16006_s11 }
 0xa82   :  { %v17410_v3 = vadd.f32 %v4459_v56, %v4458_v38 }
 0xa84   :  { %4980 = vrot.lane.b32.xlu0 %v17410_v3, %s16006_s11 }
 0xaf2   :  { %v5498_v13 = vpop.permute.xlu1 %5497 }
 0xaf3   :  { %v5499_v61 = vsel %vm248_vm1, %v5498_v13, 0 }
 0xaf4   :  { %v17415_v30 = vand.u32 4294901760, %v5499_v61 }
 0xaf6   :  { %v5571_v49 = vsub.f32 %v5499_v61, %v17415_v30  ;;  %v4981_v8 = vpop.permute.xlu0 %4980 }
 0xaf7   :  { %v4982_v26 = vsel %vm248_vm1, %v4981_v8, 0 }
 0xaf8   :  { %v5572_v9 = vand.u32 4294901760, %v5571_v49  ;;  %v17419_v15 = vand.u32 4294901760, %v4982_v26 }
 0xafa   :  { %v5573_v47 = vsub.f32 %v5571_v49, %v5572_v9  ;;  %v5054_v60 = vsub.f32 %v4982_v26, %v17419_v15 }
 0xafc   :  { %v5574_v2 = vand.u32 4294901760, %v5573_v47  ;;  %v5055_v33 = vand.u32 4294901760, %v5054_v60 }
 0xafe   :  { %v5056_v58 = vsub.f32 %v5054_v60, %v5055_v33  ;;  %13757 = vmatmul.mubr.f32.vlgmr.msra.gmra.mrb[12].mxu0 %v5574_v2 }
 0xaff   :  { %14950 = vmatpush3.bf16.msra.mxu0 %v17069_v53  ;;  %13767 = vmatprep.mubr.msk.f32.mxu0 %vm16003_vm2, %v16004_v23 }
 0xb00   :  { %v5057_v7 = vand.u32 4294901760, %v5056_v58  ;;  %14951 = vmatprep.subr.bf16.mxu0 %v16002_v18 }
 0xb02   :  { %13691 = vmatmul.mubr.f32.vlgmr.msra.gmra.mrb[14].mxu1 %v5057_v7 }
 0xb03   :  { %14914 = vmatpush3.bf16.msra.mxu1 %v16909_v62  ;;  %14953 = vmatpush3.bf16.msra.mxu0 %v17078_v48 }
 0xb04   :  { %14915 = vmatprep.subr.bf16.mxu1 %v16002_v18  ;;  %14954 = vmatprep.subr.bf16.mxu0 %v16002_v18 }
 0xb05   :  { %13701 = vmatprep.mubr.msk.f32.mxu1 %vm16003_vm2, %v16004_v23 }
 0xb06   :  { %13768 = vmatmul.mubr.f32.vlgmr.msra.gmra.mrb[12].mxu0 %v17415_v30 }
 0xb07   :  { %14917 = vmatpush3.bf16.msra.mxu1 %v16921_v34  ;;  %14956 = vmatpush3.bf16.msra.mxu0 %v17090_v10 }
 0xb08   :  { %14918 = vmatprep.subr.bf16.mxu1 %v16002_v18  ;;  %14957 = vmatprep.subr.bf16.mxu0 %v16002_v18 }
 0xb09   :  { %13778 = vmatprep.mubr.msk.f32.mxu0 %vm16003_vm2, %v16004_v23 }
 0xb0a   :  { %13702 = vmatmul.mubr.f32.vlgmr.msra.gmra.mrb[14].mxu1 %v17419_v15 }
 0xb0b   :  { %14920 = vmatpush3.bf16.msra.mxu1 %v16936_v32  ;;  %14959 = vmatpush3.bf16.msra.mxu0 %v17101_v20 }
 0xb0c   :  { %14921 = vmatprep.subr.bf16.mxu1 %v16002_v18  ;;  %14960 = vmatprep.subr.bf16.mxu0 %v16002_v18 }
 0xb0d   :  { %13712 = vmatprep.mubr.msk.f32.mxu1 %vm16003_vm2, %v16004_v23 }
 0xb0e   :  { %13779 = vmatmul.mubr.f32.vlgmr.msra.gmra.mrb[12].mxu0 %v5571_v49 }
 0xb0f   :  { %14923 = vmatpush3.bf16.msra.mxu1 %v16946_v37  ;;  %14962 = vmatpush3.bf16.msra.mxu0 %v17031_v57 }
 0xb10   :  { %14924 = vmatprep.subr.bf16.mxu1 %v16002_v18  ;;  %14963 = vmatprep.subr.bf16.mxu0 %v16002_v18 }
 0xb11   :  { %13789 = vmatprep.mubr.msk.f32.mxu0 %vm16003_vm2, %v16004_v23 }
 0xb12   :  { %13713 = vmatmul.mubr.f32.vlgmr.msra.gmra.mrb[14].mxu1 %v5054_v60 }
 0xb13   :  { %14926 = vmatpush3.bf16.msra.mxu1 %v16873_v21  ;;  %14965 = vmatpush3.bf16.msra.mxu0 %v17050_v36 }
 0xb14   :  { %14927 = vmatprep.subr.bf16.mxu1 %v16002_v18  ;;  %14966 = vmatprep.subr.bf16.mxu0 %v16002_v18 }
 0xb15   :  { %13723 = vmatprep.mubr.msk.f32.mxu1 %vm16003_vm2, %v16004_v23 }
 0xb16   :  { %13790 = vmatmul.mubr.f32.vlgmr.msra.gmra.mrb[12].mxu0 %v5572_v9 }
 0xb17   :  { %14929 = vmatpush3.bf16.msra.mxu1 %v16892_v44  ;;  %14968 = vmatpush3.bf16.msra.mxu0 %v17131_v35 }
 0xb18   :  { %14930 = vmatprep.subr.bf16.mxu1 %v16002_v18  ;;  %14969 = vmatprep.subr.bf16.mxu0 %v16002_v18 }
 0xb19   :  { %13800 = vmatprep.mubr.msk.f32.mxu0 %vm16003_vm2, %v16004_v23 }
 0xb1a   :  { %13724 = vmatmul.mubr.f32.vlgmr.msra.gmra.mrb[14].mxu1 %v5055_v33 }
 0xb1b   :  { %14932 = vmatpush3.bf16.msra.mxu1 %v16974_v41  ;;  %14971 = vmatpush3.bf16.msra.mxu0 %v17143_v12 }
 0xb1c   :  { %14933 = vmatprep.subr.bf16.mxu1 %v16002_v18  ;;  %14972 = vmatprep.subr.bf16.mxu0 %v16002_v18 }
 0xb1d   :  { %13734 = vmatprep.mubr.msk.f32.mxu1 %vm16003_vm2, %v16004_v23 }
 0xb1e   :  { %13801 = vmatmul.mubr.f32.vlgmr.msra.gmra.mrb[12].mxu0 %v17415_v30 }
 0xb1f   :  { %14935 = vmatpush3.bf16.msra.mxu1 %v16994_v17  ;;  %14974 = vmatpush3.bf16.msra.mxu0 %v17031_v57 }
 0xb20   :  { %14936 = vmatprep.subr.bf16.mxu1 %v16002_v18  ;;  %14975 = vmatprep.subr.bf16.mxu0 %v16002_v18 }
 0xb21   :  { %13811 = vmatprep.mubr.msk.f32.mxu0 %vm16003_vm2, %v16004_v23 }
 0xb22   :  { %13735 = vmatmul.mubr.f32.vlgmr.msra.gmra.mrb[14].mxu1 %v17419_v15 }
 0xb23   :  { %14938 = vmatpush3.bf16.msra.mxu1 %v16873_v21  ;;  %14977 = vmatpush3.bf16.msra.mxu0 %v17050_v36 }
 0xb24   :  { %14939 = vmatprep.subr.bf16.mxu1 %v16002_v18  ;;  %13745 = vmatprep.mubr.msk.f32.mxu1 %vm16003_vm2, %v16004_v23 }
 0xb25   :  { %15014 = vmatprep.subr.bf16.mxu0 %v16002_v18 }
 0xb26   :  { %13812 = vmatmul.mubr.f32.vlgmr.msra.gmra.mrb[12].mxu0 %v17415_v30 }
 0xb27   :  { %14941 = vmatpush3.bf16.msra.mxu1 %v16892_v44  ;;  %15016 = vmatpush3.bf16.msra.mxu0 %v17031_v57 }
 0xb28   :  { %14978 = vmatprep.subr.bf16.mxu1 %v16002_v18  ;;  %15017 = vmatprep.subr.bf16.mxu0 %v16002_v18 }
 0xb29   :  { %13888 = vmatprep.mubr.msk.f32.mxu0 %vm16003_vm2, %v16004_v23 }
 0xb2a   :  { %13746 = vmatmul.mubr.f32.vlgmr.msra.gmra.mrb[14].mxu1 %v17419_v15 }
 0xb2b   :  { %14980 = vmatpush3.bf16.msra.mxu1 %v16873_v21  ;;  %15019 = vmatpush3.bf16.msra.mxu0 %v17050_v36 }
 0xb2c   :  { %14981 = vmatprep.subr.bf16.mxu1 %v16002_v18  ;;  %15020 = vmatprep.subr.bf16.mxu0 %v16002_v18 }
 0xb2d   :  { %13822 = vmatprep.mubr.msk.f32.mxu1 %vm16003_vm2, %v16004_v23 }
 0xb2f   :  { %14983 = vmatpush3.bf16.msra.mxu1 %v16892_v44 }
 0xb30   :  { %14984 = vmatprep.subr.bf16.mxu1 %v16002_v18 }
 0xbf9   :  { %v5982_v6 = vpop.f32.mrb[12].mxu0 }
 0xbfa   :  { %v15426_v59 = vadd.f32 %v17186_v50, %v5982_v6  ;;  %v13813_v39 = vpop.f32.mrb[13].mxu0 }
 0xbfc   :  { %5994 = vrot.lane.b32.xlu1 %v15426_v59, %s16005_s10  ;;  %v5986_v24 = vadd.f32 %v15426_v59, %v5495_v22 }
 0xbfd   :  { %v5465_v11 = vpop.f32.mrb[14].mxu1 }
 0xbfe   :  { %v15425_v19 = vadd.f32 %v17189_v46, %v5465_v11  ;;  %v13747_v0 = vpop.f32.mrb[15].mxu1  ;;  %v12350_v29 = vmul.f32 -1.442695, %v5986_v24  ;;  %v17604_v24 = vld [vmem:[#allocation15] ss:$0 sm:$0xff] }
 0xc00   :  { %5477 = vrot.lane.b32.xlu0 %v15425_v19, %s16005_s10  ;;  %v5469_v27 = vadd.f32 %v15425_v19, %v4978_v42  ;;  %15754 = vpow2.f32 %v12350_v29 }
 0xc02   :  { %v12349_v28 = vmul.f32 -1.442695, %v5469_v27 }
 0xc04   :  { %15756 = vpow2.f32 %v12349_v28  ;;  %v17608_v28 = vld [vmem:[#allocation12] ss:$0 sm:$0xff] }
 0xc0a   :  { %v15755_v4 = vpop.eup %15754 }
 0xc0b   :  { %v5990_v45 = vadd.f32 1.0, %v15755_v4 }
 0xc0d   :  { %15758 = vrcp.f32 %v5990_v45 }
 0xc0e   :  { %v15757_v50 = vpop.eup %15756 }
 0xc0f   :  { %v5473_v43 = vadd.f32 1.0, %v15757_v50  ;;  %v6529_v50 = vld [vmem:[#allocation5 + $0x10] sm:$0xf] }
 0xc11   :  { %15760 = vrcp.f32 %v5473_v43 }
 0xc17   :  { %v15759_v16 = vpop.eup %15758 }
 0xc18   :  { %v6004_v56 = vsub.f32 1.0, %v15759_v16  ;;  %v6010_v13 = vmul.f32 %v15759_v16, %v17405_v5 }
 0xc1b   :  { %v15761_v51 = vpop.eup %15760 }
 0xc1c   :  { %v5487_v49 = vsub.f32 1.0, %v15761_v51  ;;  %v5493_v26 = vmul.f32 %v15761_v51, %v17410_v3 }
 0xc6e   :  { %v5995_v31 = vpop.permute.xlu1 %5994 }
 0xc6f   :  { %v5997_v46 = vmul.f32 %v15759_v16, %v5995_v31  ;;  %v6012_v16 = vld [vmem:[#allocation4 + $0x10] sm:$0xf] }
 0xc71   :  { %5999 = vrot.lane.b32.xlu1 %v5997_v46, %s16005_s10 }
 0xc72   :  { %v5478_v54 = vpop.permute.xlu0 %5477 }
 0xc73   :  { %v5480_v52 = vmul.f32 %v15761_v51, %v5478_v54 }
 0xc75   :  { %5482 = vrot.lane.b32.xlu0 %v5480_v52, %s16005_s10 }
 0xce3   :  { %v6000_v63 = vpop.permute.xlu1 %5999 }
 0xce4   :  { %v6002_v40 = vadd.f32 %v6000_v63, %v5495_v22 }
 0xce6   :  { %15762 = vtanh.f32 %v6002_v40 }
 0xce7   :  { %v5483_v25 = vpop.permute.xlu0 %5482 }
 0xce8   :  { %v5485_v1 = vadd.f32 %v5483_v25, %v4978_v42 }
 0xcea   :  { %15764 = vtanh.f32 %v5485_v1 }
 0xcf0   :  { %v15763_v55 = vpop.eup %15762 }
 0xcf1   :  { %6006 = vrot.lane.b32.xlu1 %v15763_v55, %s16006_s11 }
 0xcf4   :  { %v15765_v14 = vpop.eup %15764 }
 0xcf5   :  { %5489 = vrot.lane.b32.xlu0 %v15765_v14, %s16006_s11 }
 0xd63   :  { %v6007_v38 = vpop.permute.xlu1 %6006 }
 0xd64   :  { %v6009_v61 = vmul.f32 %v6007_v38, %v6004_v56 }
 0xd66   :  { %v17509_v30 = vadd.f32 %v6010_v13, %v6009_v61 }
 0xd67   :  { %v5490_v8 = vpop.permute.xlu0 %5489 }
 0xd68   :  { %v5492_v9 = vmul.f32 %v5490_v8, %v5487_v49  ;;  %6531 = vrot.lane.b32.xlu1 %v17509_v30, %s16006_s11 }
 0xd6a   :  { %v17514_v15 = vadd.f32 %v5493_v26, %v5492_v9 }
 0xd6c   :  { %6014 = vrot.lane.b32.xlu0 %v17514_v15, %s16006_s11 }
 0xdda   :  { %v6532_v47 = vpop.permute.xlu1 %6531 }
 0xddb   :  { %v6533_v60 = vsel %vm248_vm1, %v6532_v47, 0 }
 0xddc   :  { %v17519_v5 = vand.u32 4294901760, %v6533_v60 }
 0xdde   :  { %v6605_v2 = vsub.f32 %v6533_v60, %v17519_v5  ;;  %v6015_v33 = vpop.permute.xlu0 %6014 }
 0xddf   :  { %v6016_v58 = vsel %vm248_vm1, %v6015_v33, 0 }
 0xde0   :  { %v6606_v3 = vand.u32 4294901760, %v6605_v2  ;;  %v17523_v7 = vand.u32 4294901760, %v6016_v58 }
 0xde2   :  { %v6607_v6 = vsub.f32 %v6605_v2, %v6606_v3  ;;  %v6088_v59 = vsub.f32 %v6016_v58, %v17523_v7 }
 0xde4   :  { %v6608_v39 = vand.u32 4294901760, %v6607_v6  ;;  %v6089_v11 = vand.u32 4294901760, %v6088_v59 }
 0xde6   :  { %v6090_v19 = vsub.f32 %v6088_v59, %v6089_v11  ;;  %13889 = vmatmul.mubr.f32.vlgmr.msra.gmra.mrb[14].mxu0 %v6608_v39 }
 0xde7   :  { %15022 = vmatpush3.bf16.msra.mxu0 %v17069_v53  ;;  %13899 = vmatprep.mubr.msk.f32.mxu0 %vm16003_vm2, %v16004_v23 }
 0xde8   :  { %v6091_v0 = vand.u32 4294901760, %v6090_v19  ;;  %15023 = vmatprep.subr.bf16.mxu0 %v16002_v18 }
 0xdea   :  { %13823 = vmatmul.mubr.f32.vlgmr.msra.gmra.mrb[16].mxu1 %v6091_v0 }
 0xdeb   :  { %14986 = vmatpush3.bf16.msra.mxu1 %v16909_v62  ;;  %15025 = vmatpush3.bf16.msra.mxu0 %v17078_v48 }
 0xdec   :  { %14987 = vmatprep.subr.bf16.mxu1 %v16002_v18  ;;  %15026 = vmatprep.subr.bf16.mxu0 %v16002_v18 }
 0xded   :  { %13833 = vmatprep.mubr.msk.f32.mxu1 %vm16003_vm2, %v16004_v23 }
 0xdee   :  { %13900 = vmatmul.mubr.f32.vlgmr.msra.gmra.mrb[14].mxu0 %v17519_v5 }
 0xdef   :  { %14989 = vmatpush3.bf16.msra.mxu1 %v16921_v34  ;;  %15028 = vmatpush3.bf16.msra.mxu0 %v17090_v10 }
 0xdf0   :  { %14990 = vmatprep.subr.bf16.mxu1 %v16002_v18  ;;  %15029 = vmatprep.subr.bf16.mxu0 %v16002_v18 }
 0xdf1   :  { %13910 = vmatprep.mubr.msk.f32.mxu0 %vm16003_vm2, %v16004_v23 }
 0xdf2   :  { %13834 = vmatmul.mubr.f32.vlgmr.msra.gmra.mrb[16].mxu1 %v17523_v7 }
 0xdf3   :  { %14992 = vmatpush3.bf16.msra.mxu1 %v16936_v32  ;;  %15031 = vmatpush3.bf16.msra.mxu0 %v17101_v20 }
 0xdf4   :  { %14993 = vmatprep.subr.bf16.mxu1 %v16002_v18  ;;  %15032 = vmatprep.subr.bf16.mxu0 %v16002_v18 }
 0xdf5   :  { %13844 = vmatprep.mubr.msk.f32.mxu1 %vm16003_vm2, %v16004_v23 }
 0xdf6   :  { %13911 = vmatmul.mubr.f32.vlgmr.msra.gmra.mrb[14].mxu0 %v6605_v2 }
 0xdf7   :  { %14995 = vmatpush3.bf16.msra.mxu1 %v16946_v37  ;;  %15034 = vmatpush3.bf16.msra.mxu0 %v17031_v57 }
 0xdf8   :  { %14996 = vmatprep.subr.bf16.mxu1 %v16002_v18  ;;  %15035 = vmatprep.subr.bf16.mxu0 %v16002_v18 }
 0xdf9   :  { %13921 = vmatprep.mubr.msk.f32.mxu0 %vm16003_vm2, %v16004_v23 }
 0xdfa   :  { %13845 = vmatmul.mubr.f32.vlgmr.msra.gmra.mrb[16].mxu1 %v6088_v59 }
 0xdfb   :  { %14998 = vmatpush3.bf16.msra.mxu1 %v16873_v21  ;;  %15037 = vmatpush3.bf16.msra.mxu0 %v17050_v36 }
 0xdfc   :  { %14999 = vmatprep.subr.bf16.mxu1 %v16002_v18  ;;  %15038 = vmatprep.subr.bf16.mxu0 %v16002_v18 }
 0xdfd   :  { %13855 = vmatprep.mubr.msk.f32.mxu1 %vm16003_vm2, %v16004_v23 }
 0xdfe   :  { %13922 = vmatmul.mubr.f32.vlgmr.msra.gmra.mrb[14].mxu0 %v6606_v3 }
 0xdff   :  { %15001 = vmatpush3.bf16.msra.mxu1 %v16892_v44  ;;  %15040 = vmatpush3.bf16.msra.mxu0 %v17131_v35 }
 0xe00   :  { %15002 = vmatprep.subr.bf16.mxu1 %v16002_v18  ;;  %15041 = vmatprep.subr.bf16.mxu0 %v16002_v18 }
 0xe01   :  { %13932 = vmatprep.mubr.msk.f32.mxu0 %vm16003_vm2, %v16004_v23 }
 0xe02   :  { %13856 = vmatmul.mubr.f32.vlgmr.msra.gmra.mrb[16].mxu1 %v6089_v11 }
 0xe03   :  { %15004 = vmatpush3.bf16.msra.mxu1 %v16974_v41  ;;  %15043 = vmatpush3.bf16.msra.mxu0 %v17143_v12 }
 0xe04   :  { %15005 = vmatprep.subr.bf16.mxu1 %v16002_v18  ;;  %15044 = vmatprep.subr.bf16.mxu0 %v16002_v18 }
 0xe05   :  { %13866 = vmatprep.mubr.msk.f32.mxu1 %vm16003_vm2, %v16004_v23 }
 0xe06   :  { %13933 = vmatmul.mubr.f32.vlgmr.msra.gmra.mrb[14].mxu0 %v17519_v5 }
 0xe07   :  { %15007 = vmatpush3.bf16.msra.mxu1 %v16994_v17  ;;  %15046 = vmatpush3.bf16.msra.mxu0 %v17031_v57 }
 0xe08   :  { %15008 = vmatprep.subr.bf16.mxu1 %v16002_v18  ;;  %15047 = vmatprep.subr.bf16.mxu0 %v16002_v18 }
 0xe09   :  { %13943 = vmatprep.mubr.msk.f32.mxu0 %vm16003_vm2, %v16004_v23 }
 0xe0a   :  { %13867 = vmatmul.mubr.f32.vlgmr.msra.gmra.mrb[16].mxu1 %v17523_v7 }
 0xe0b   :  { %15010 = vmatpush3.bf16.msra.mxu1 %v16873_v21  ;;  %15049 = vmatpush3.bf16.msra.mxu0 %v17050_v36 }
 0xe0c   :  { %15011 = vmatprep.subr.bf16.mxu1 %v16002_v18  ;;  %13877 = vmatprep.mubr.msk.f32.mxu1 %vm16003_vm2, %v16004_v23 }
 0xe0d   :  { %15086 = vmatprep.subr.bf16.mxu0 %v16002_v18 }
 0xe0e   :  { %13944 = vmatmul.mubr.f32.vlgmr.msra.gmra.mrb[14].mxu0 %v17519_v5 }
 0xe0f   :  { %15013 = vmatpush3.bf16.msra.mxu1 %v16892_v44  ;;  %15088 = vmatpush3.bf16.msra.mxu0 %v17031_v57 }
 0xe10   :  { %15050 = vmatprep.subr.bf16.mxu1 %v16002_v18  ;;  %15089 = vmatprep.subr.bf16.mxu0 %v16002_v18 }
 0xe11   :  { %14020 = vmatprep.mubr.msk.f32.mxu0 %vm16003_vm2, %v16004_v23 }
 0xe12   :  { %13878 = vmatmul.mubr.f32.vlgmr.msra.gmra.mrb[16].mxu1 %v17523_v7 }
 0xe13   :  { %15052 = vmatpush3.bf16.msra.mxu1 %v16873_v21  ;;  %15091 = vmatpush3.bf16.msra.mxu0 %v17050_v36 }
 0xe14   :  { %15053 = vmatprep.subr.bf16.mxu1 %v16002_v18  ;;  %15092 = vmatprep.subr.bf16.mxu0 %v16002_v18 }
 0xe15   :  { %13954 = vmatprep.mubr.msk.f32.mxu1 %vm16003_vm2, %v16004_v23 }
 0xe17   :  { %15055 = vmatpush3.bf16.msra.mxu1 %v16892_v44 }
 0xe18   :  { %15056 = vmatprep.subr.bf16.mxu1 %v16002_v18 }
 0xee1   :  { %v7016_v22 = vpop.f32.mrb[14].mxu0 }
 0xee2   :  { %v15428_v42 = vadd.f32 %v17604_v24, %v7016_v22  ;;  %v13945_v29 = vpop.f32.mrb[15].mxu0 }
 0xee4   :  { %7028 = vrot.lane.b32.xlu1 %v15428_v42, %s16005_s10  ;;  %v7020_v43 = vadd.f32 %v15428_v42, %v6529_v50 }
 0xee5   :  { %v6499_v27 = vpop.f32.mrb[16].mxu1 }
 0xee6   :  { %v15427_v4 = vadd.f32 %v17608_v28, %v6499_v27  ;;  %v13879_v45 = vpop.f32.mrb[17].mxu1  ;;  %v12352_v31 = vmul.f32 -1.442695, %v7020_v43 }
 0xee8   :  { %6511 = vrot.lane.b32.xlu0 %v15427_v4, %s16005_s10  ;;  %v6503_v46 = vadd.f32 %v15427_v4, %v6012_v16  ;;  %15766 = vpow2.f32 %v12352_v31 }
 0xeea   :  { %v12351_v51 = vmul.f32 -1.442695, %v6503_v46 }
 0xeec   :  { %15768 = vpow2.f32 %v12351_v51 }
 0xef2   :  { %v15767_v54 = vpop.eup %15766 }
 0xef3   :  { %v7024_v52 = vadd.f32 1.0, %v15767_v54 }
 0xef5   :  { %15770 = vrcp.f32 %v7024_v52 }
 0xef6   :  { %v15769_v63 = vpop.eup %15768 }
 0xef7   :  { %v6507_v40 = vadd.f32 1.0, %v15769_v63  ;;  %v7563_v63 = vld [vmem:[#allocation5 + $0x14] sm:$0xf] }
 0xef9   :  { %15772 = vrcp.f32 %v6507_v40 }
 0xeff   :  { %v15771_v25 = vpop.eup %15770 }
 0xf00   :  { %v7038_v47 = vsub.f32 1.0, %v15771_v25  ;;  %v7044_v5 = vmul.f32 %v15771_v25, %v17509_v30 }
 0xf03   :  { %v15773_v14 = vpop.eup %15772 }
 0xf04   :  { %v6521_v58 = vsub.f32 1.0, %v15773_v14  ;;  %v6527_v7 = vmul.f32 %v15773_v14, %v17514_v15 }
 0xf56   :  { %v7029_v1 = vpop.permute.xlu1 %7028 }
 0xf57   :  { %v7031_v55 = vmul.f32 %v15771_v25, %v7029_v1  ;;  %v7046_v25 = vld [vmem:[#allocation4 + $0x14] sm:$0xf] }
 0xf59   :  { %7033 = vrot.lane.b32.xlu1 %v7031_v55, %s16005_s10 }
 0xf5a   :  { %v6512_v56 = vpop.permute.xlu0 %6511 }
 0xf5b   :  { %v6514_v38 = vmul.f32 %v15773_v14, %v6512_v56 }
 0xf5d   :  { %6516 = vrot.lane.b32.xlu0 %v6514_v38, %s16005_s10 }
 0xfcb   :  { %v7034_v13 = vpop.permute.xlu1 %7033 }
 0xfcc   :  { %v7036_v61 = vadd.f32 %v7034_v13, %v6529_v50 }
 0xfce   :  { %15774 = vtanh.f32 %v7036_v61 }
 0xfcf   :  { %v6517_v49 = vpop.permute.xlu0 %6516 }
 0xfd0   :  { %v6519_v8 = vadd.f32 %v6517_v49, %v6012_v16 }
 0xfd2   :  { %15776 = vtanh.f32 %v6519_v8 }
 0xfd8   :  { %v15775_v26 = vpop.eup %15774 }
 0xfd9   :  { %7040 = vrot.lane.b32.xlu1 %v15775_v26, %s16006_s11 }
 0xfdc   :  { %v15777_v9 = vpop.eup %15776 }
 0xfdd   :  { %6523 = vrot.lane.b32.xlu0 %v15777_v9, %s16006_s11 }
0x104b   :  { %v7041_v60 = vpop.permute.xlu1 %7040 }
0x104c   :  { %v7043_v2 = vmul.f32 %v7041_v60, %v7038_v47 }
0x104e   :  { %v17617_v33 = vadd.f32 %v7044_v5, %v7043_v2 }
0x104f   :  { %v6524_v3 = vpop.permute.xlu0 %6523 }
0x1050   :  { %v6526_v6 = vmul.f32 %v6524_v3, %v6521_v58  ;;  %7565 = vrot.lane.b32.xlu1 %v17617_v33, %s16006_s11 }
0x1052   :  { %v17622_v59 = vadd.f32 %v6527_v7, %v6526_v6 }
0x1054   :  { %7048 = vrot.lane.b32.xlu0 %v17622_v59, %s16006_s11 }
0x10c2   :  { %v7566_v39 = vpop.permute.xlu1 %7565 }
0x10c3   :  { %v7567_v11 = vsel %vm248_vm1, %v7566_v39, 0 }
0x10c4   :  { %v17627_v30 = vand.u32 4294901760, %v7567_v11 }
0x10c6   :  { %v7639_v19 = vsub.f32 %v7567_v11, %v17627_v30  ;;  %v7049_v0 = vpop.permute.xlu0 %7048 }
0x10c7   :  { %v7050_v22 = vsel %vm248_vm1, %v7049_v0, 0 }
0x10c8   :  { %v7640_v15 = vand.u32 4294901760, %v7639_v19  ;;  %v17631_v42 = vand.u32 4294901760, %v7050_v22 }
0x10ca   :  { %v7641_v29 = vsub.f32 %v7639_v19, %v7640_v15  ;;  %v7122_v27 = vsub.f32 %v7050_v22, %v17631_v42 }
0x10cc   :  { %v7642_v4 = vand.u32 4294901760, %v7641_v29  ;;  %v7123_v45 = vand.u32 4294901760, %v7122_v27 }
0x10ce   :  { %v7124_v50 = vsub.f32 %v7122_v27, %v7123_v45  ;;  %14021 = vmatmul.mubr.f32.vlgmr.msra.gmra.mrb[16].mxu0 %v7642_v4 }
0x10cf   :  { %15094 = vmatpush3.bf16.msra.mxu0 %v17069_v53  ;;  %14031 = vmatprep.mubr.msk.f32.mxu0 %vm16003_vm2, %v16004_v23 }
0x10d0   :  { %v7125_v43 = vand.u32 4294901760, %v7124_v50  ;;  %15095 = vmatprep.subr.bf16.mxu0 %v16002_v18 }
0x10d2   :  { %13955 = vmatmul.mubr.f32.vlgmr.msra.gmra.mrb[18].mxu1 %v7125_v43 }
0x10d3   :  { %15058 = vmatpush3.bf16.msra.mxu1 %v16909_v62  ;;  %15097 = vmatpush3.bf16.msra.mxu0 %v17078_v48 }
0x10d4   :  { %15059 = vmatprep.subr.bf16.mxu1 %v16002_v18  ;;  %15098 = vmatprep.subr.bf16.mxu0 %v16002_v18 }
0x10d5   :  { %13965 = vmatprep.mubr.msk.f32.mxu1 %vm16003_vm2, %v16004_v23 }
0x10d6   :  { %14032 = vmatmul.mubr.f32.vlgmr.msra.gmra.mrb[16].mxu0 %v17627_v30 }
0x10d7   :  { %15061 = vmatpush3.bf16.msra.mxu1 %v16921_v34  ;;  %15100 = vmatpush3.bf16.msra.mxu0 %v17090_v10 }
0x10d8   :  { %15062 = vmatprep.subr.bf16.mxu1 %v16002_v18  ;;  %15101 = vmatprep.subr.bf16.mxu0 %v16002_v18 }
0x10d9   :  { %14042 = vmatprep.mubr.msk.f32.mxu0 %vm16003_vm2, %v16004_v23 }
0x10da   :  { %13966 = vmatmul.mubr.f32.vlgmr.msra.gmra.mrb[18].mxu1 %v17631_v42 }
0x10db   :  { %15064 = vmatpush3.bf16.msra.mxu1 %v16936_v32  ;;  %15103 = vmatpush3.bf16.msra.mxu0 %v17101_v20 }
0x10dc   :  { %15065 = vmatprep.subr.bf16.mxu1 %v16002_v18  ;;  %15104 = vmatprep.subr.bf16.mxu0 %v16002_v18 }
0x10dd   :  { %13976 = vmatprep.mubr.msk.f32.mxu1 %vm16003_vm2, %v16004_v23 }
0x10de   :  { %14043 = vmatmul.mubr.f32.vlgmr.msra.gmra.mrb[16].mxu0 %v7639_v19 }
0x10df   :  { %15067 = vmatpush3.bf16.msra.mxu1 %v16946_v37  ;;  %15106 = vmatpush3.bf16.msra.mxu0 %v17031_v57 }
0x10e0   :  { %15068 = vmatprep.subr.bf16.mxu1 %v16002_v18  ;;  %15107 = vmatprep.subr.bf16.mxu0 %v16002_v18 }
0x10e1   :  { %14053 = vmatprep.mubr.msk.f32.mxu0 %vm16003_vm2, %v16004_v23 }
0x10e2   :  { %13977 = vmatmul.mubr.f32.vlgmr.msra.gmra.mrb[18].mxu1 %v7122_v27 }
0x10e3   :  { %15070 = vmatpush3.bf16.msra.mxu1 %v16873_v21  ;;  %15109 = vmatpush3.bf16.msra.mxu0 %v17050_v36 }
0x10e4   :  { %15071 = vmatprep.subr.bf16.mxu1 %v16002_v18  ;;  %15110 = vmatprep.subr.bf16.mxu0 %v16002_v18 }
0x10e5   :  { %13987 = vmatprep.mubr.msk.f32.mxu1 %vm16003_vm2, %v16004_v23 }
0x10e6   :  { %14054 = vmatmul.mubr.f32.vlgmr.msra.gmra.mrb[16].mxu0 %v7640_v15 }
0x10e7   :  { %15073 = vmatpush3.bf16.msra.mxu1 %v16892_v44  ;;  %15112 = vmatpush3.bf16.msra.mxu0 %v17131_v35 }
0x10e8   :  { %15074 = vmatprep.subr.bf16.mxu1 %v16002_v18  ;;  %15113 = vmatprep.subr.bf16.mxu0 %v16002_v18 }
0x10e9   :  { %14064 = vmatprep.mubr.msk.f32.mxu0 %vm16003_vm2, %v16004_v23 }
0x10ea   :  { %13988 = vmatmul.mubr.f32.vlgmr.msra.gmra.mrb[18].mxu1 %v7123_v45 }
0x10eb   :  { %15076 = vmatpush3.bf16.msra.mxu1 %v16974_v41  ;;  %15115 = vmatpush3.bf16.msra.mxu0 %v17143_v12 }
0x10ec   :  { %15077 = vmatprep.subr.bf16.mxu1 %v16002_v18  ;;  %15116 = vmatprep.subr.bf16.mxu0 %v16002_v18 }
0x10ed   :  { %13998 = vmatprep.mubr.msk.f32.mxu1 %vm16003_vm2, %v16004_v23 }
0x10ee   :  { %14065 = vmatmul.mubr.f32.vlgmr.msra.gmra.mrb[16].mxu0 %v17627_v30 }
0x10ef   :  { %15079 = vmatpush3.bf16.msra.mxu1 %v16994_v17  ;;  %15118 = vmatpush3.bf16.msra.mxu0 %v17031_v57 }
0x10f0   :  { %15080 = vmatprep.subr.bf16.mxu1 %v16002_v18  ;;  %15119 = vmatprep.subr.bf16.mxu0 %v16002_v18 }
0x10f1   :  { %14075 = vmatprep.mubr.msk.f32.mxu0 %vm16003_vm2, %v16004_v23 }
0x10f2   :  { %13999 = vmatmul.mubr.f32.vlgmr.msra.gmra.mrb[18].mxu1 %v17631_v42 }
0x10f3   :  { %15082 = vmatpush3.bf16.msra.mxu1 %v16873_v21  ;;  %15121 = vmatpush3.bf16.msra.mxu0 %v17050_v36 }
0x10f4   :  { %15083 = vmatprep.subr.bf16.mxu1 %v16002_v18  ;;  %14009 = vmatprep.mubr.msk.f32.mxu1 %vm16003_vm2, %v16004_v23 }
0x10f5   :  { %15158 = vmatprep.subr.bf16.mxu0 %v16002_v18 }
0x10f6   :  { %14076 = vmatmul.mubr.f32.vlgmr.msra.gmra.mrb[16].mxu0 %v17627_v30 }
0x10f7   :  { %15085 = vmatpush3.bf16.msra.mxu1 %v16892_v44  ;;  %15160 = vmatpush3.bf16.msra.mxu0 %v17031_v57 }
0x10f8   :  { %15122 = vmatprep.subr.bf16.mxu1 %v16002_v18  ;;  %15161 = vmatprep.subr.bf16.mxu0 %v16002_v18 }
0x10f9   :  { %14152 = vmatprep.mubr.msk.f32.mxu0 %vm16003_vm2, %v16004_v23 }
0x10fa   :  { %14010 = vmatmul.mubr.f32.vlgmr.msra.gmra.mrb[18].mxu1 %v17631_v42 }
0x10fb   :  { %15124 = vmatpush3.bf16.msra.mxu1 %v16873_v21  ;;  %15163 = vmatpush3.bf16.msra.mxu0 %v17050_v36 }
0x10fc   :  { %15125 = vmatprep.subr.bf16.mxu1 %v16002_v18  ;;  %15164 = vmatprep.subr.bf16.mxu0 %v16002_v18 }
0x10fd   :  { %14086 = vmatprep.mubr.msk.f32.mxu1 %vm16003_vm2, %v16004_v23 }
0x10ff   :  { %15127 = vmatpush3.bf16.msra.mxu1 %v16892_v44 }
0x1100   :  { %15128 = vmatprep.subr.bf16.mxu1 %v16002_v18 }
0x11c9   :  { %v8050_v16 = vpop.f32.mrb[16].mxu0 }
0x11ca   :  { %v15430_v31 = vadd.f32 %v17604_v24, %v8050_v16  ;;  %v14077_v46 = vpop.f32.mrb[17].mxu0 }
0x11cc   :  { %8062 = vrot.lane.b32.xlu1 %v15430_v31, %s16005_s10  ;;  %v8054_v40 = vadd.f32 %v15430_v31, %v7563_v63 }
0x11cd   :  { %v7533_v51 = vpop.f32.mrb[18].mxu1 }
0x11ce   :  { %v15429_v54 = vadd.f32 %v17608_v28, %v7533_v51  ;;  %v14011_v52 = vpop.f32.mrb[19].mxu1  ;;  %v12354_v1 = vmul.f32 -1.442695, %v8054_v40 }
0x11d0   :  { %7545 = vrot.lane.b32.xlu0 %v15429_v54, %s16005_s10  ;;  %v7537_v55 = vadd.f32 %v15429_v54, %v7046_v25  ;;  %15778 = vpow2.f32 %v12354_v1 }
0x11d2   :  { %v12353_v14 = vmul.f32 -1.442695, %v7537_v55 }
0x11d4   :  { %15780 = vpow2.f32 %v12353_v14 }
0x11da   :  { %v15779_v56 = vpop.eup %15778 }
0x11db   :  { %v8058_v38 = vadd.f32 1.0, %v15779_v56 }
0x11dd   :  { %15782 = vrcp.f32 %v8058_v38 }
0x11de   :  { %v15781_v13 = vpop.eup %15780 }
0x11df   :  { %v7541_v61 = vadd.f32 1.0, %v15781_v13  ;;  %v8597_v13 = vld [vmem:[#allocation5 + $0x18] sm:$0xf] }
0x11e1   :  { %15784 = vrcp.f32 %v7541_v61 }
0x11e7   :  { %v15783_v49 = vpop.eup %15782 }
0x11e8   :  { %v8072_v39 = vsub.f32 1.0, %v15783_v49  ;;  %v8078_v30 = vmul.f32 %v15783_v49, %v17617_v33 }
0x11eb   :  { %v15785_v9 = vpop.eup %15784 }
0x11ec   :  { %v7555_v22 = vsub.f32 1.0, %v15785_v9  ;;  %v7561_v42 = vmul.f32 %v15785_v9, %v17622_v59 }
0x123e   :  { %v8063_v8 = vpop.permute.xlu1 %8062 }
0x123f   :  { %v8065_v26 = vmul.f32 %v15783_v49, %v8063_v8  ;;  %v8080_v49 = vld [vmem:[#allocation4 + $0x18] sm:$0xf] }
0x1241   :  { %8067 = vrot.lane.b32.xlu1 %v8065_v26, %s16005_s10 }
0x1242   :  { %v7546_v47 = vpop.permute.xlu0 %7545 }
0x1243   :  { %v7548_v60 = vmul.f32 %v15785_v9, %v7546_v47 }
0x1245   :  { %7550 = vrot.lane.b32.xlu0 %v7548_v60, %s16005_s10 }
0x12b3   :  { %v8068_v5 = vpop.permute.xlu1 %8067 }
0x12b4   :  { %v8070_v2 = vadd.f32 %v8068_v5, %v7563_v63 }
0x12b6   :  { %15786 = vtanh.f32 %v8070_v2 }
0x12b7   :  { %v7551_v58 = vpop.permute.xlu0 %7550 }
0x12b8   :  { %v7553_v3 = vadd.f32 %v7551_v58, %v7046_v25 }
0x12ba   :  { %15788 = vtanh.f32 %v7553_v3 }
0x12c0   :  { %v15787_v7 = vpop.eup %15786 }
0x12c1   :  { %8074 = vrot.lane.b32.xlu1 %v15787_v7, %s16006_s11 }
0x12c4   :  { %v15789_v6 = vpop.eup %15788 }
0x12c5   :  { %7557 = vrot.lane.b32.xlu0 %v15789_v6, %s16006_s11 }
0x1333   :  { %v8075_v11 = vpop.permute.xlu1 %8074 }
0x1334   :  { %v8077_v19 = vmul.f32 %v8075_v11, %v8072_v39 }
0x1336   :  { %v17721_v0 = vadd.f32 %v8078_v30, %v8077_v19 }
0x1337   :  { %v7558_v15 = vpop.permute.xlu0 %7557 }
0x1338   :  { %v7560_v29 = vmul.f32 %v7558_v15, %v7555_v22  ;;  %8599 = vrot.lane.b32.xlu1 %v17721_v0, %s16006_s11 }
0x133a   :  { %v17726_v27 = vadd.f32 %v7561_v42, %v7560_v29 }
0x133c   :  { %8082 = vrot.lane.b32.xlu0 %v17726_v27, %s16006_s11 }
0x13aa   :  { %v8600_v4 = vpop.permute.xlu1 %8599 }
0x13ab   :  { %v8601_v45 = vsel %vm248_vm1, %v8600_v4, 0 }
0x13ac   :  { %v17731_v33 = vand.u32 4294901760, %v8601_v45 }
0x13ae   :  { %v8673_v50 = vsub.f32 %v8601_v45, %v17731_v33  ;;  %v8083_v43 = vpop.permute.xlu0 %8082 }
0x13af   :  { %v8084_v16 = vsel %vm248_vm1, %v8083_v43, 0 }
0x13b0   :  { %v8674_v59 = vand.u32 4294901760, %v8673_v50  ;;  %v17735_v31 = vand.u32 4294901760, %v8084_v16 }
0x13b2   :  { %v8675_v46 = vsub.f32 %v8673_v50, %v8674_v59  ;;  %v8156_v51 = vsub.f32 %v8084_v16, %v17735_v31 }
0x13b4   :  { %v8676_v54 = vand.u32 4294901760, %v8675_v46  ;;  %v8157_v52 = vand.u32 4294901760, %v8156_v51 }
0x13b6   :  { %v8158_v63 = vsub.f32 %v8156_v51, %v8157_v52  ;;  %14153 = vmatmul.mubr.f32.vlgmr.msra.gmra.mrb[18].mxu0 %v8676_v54 }
0x13b7   :  { %15166 = vmatpush3.bf16.msra.mxu0 %v17069_v53  ;;  %14163 = vmatprep.mubr.msk.f32.mxu0 %vm16003_vm2, %v16004_v23 }
0x13b8   :  { %v8159_v40 = vand.u32 4294901760, %v8158_v63  ;;  %15167 = vmatprep.subr.bf16.mxu0 %v16002_v18 }
0x13ba   :  { %14087 = vmatmul.mubr.f32.vlgmr.msra.gmra.mrb[20].mxu1 %v8159_v40 }
0x13bb   :  { %15130 = vmatpush3.bf16.msra.mxu1 %v16909_v62  ;;  %15169 = vmatpush3.bf16.msra.mxu0 %v17078_v48 }
0x13bc   :  { %15131 = vmatprep.subr.bf16.mxu1 %v16002_v18  ;;  %15170 = vmatprep.subr.bf16.mxu0 %v16002_v18 }
0x13bd   :  { %14097 = vmatprep.mubr.msk.f32.mxu1 %vm16003_vm2, %v16004_v23 }
0x13be   :  { %14164 = vmatmul.mubr.f32.vlgmr.msra.gmra.mrb[18].mxu0 %v17731_v33 }
0x13bf   :  { %15133 = vmatpush3.bf16.msra.mxu1 %v16921_v34  ;;  %15172 = vmatpush3.bf16.msra.mxu0 %v17090_v10 }
0x13c0   :  { %15134 = vmatprep.subr.bf16.mxu1 %v16002_v18  ;;  %15173 = vmatprep.subr.bf16.mxu0 %v16002_v18 }
0x13c1   :  { %14174 = vmatprep.mubr.msk.f32.mxu0 %vm16003_vm2, %v16004_v23 }
0x13c2   :  { %14098 = vmatmul.mubr.f32.vlgmr.msra.gmra.mrb[20].mxu1 %v17735_v31 }
0x13c3   :  { %15136 = vmatpush3.bf16.msra.mxu1 %v16936_v32  ;;  %15175 = vmatpush3.bf16.msra.mxu0 %v17101_v20 }
0x13c4   :  { %15137 = vmatprep.subr.bf16.mxu1 %v16002_v18  ;;  %15176 = vmatprep.subr.bf16.mxu0 %v16002_v18 }
0x13c5   :  { %14108 = vmatprep.mubr.msk.f32.mxu1 %vm16003_vm2, %v16004_v23 }
0x13c6   :  { %14175 = vmatmul.mubr.f32.vlgmr.msra.gmra.mrb[18].mxu0 %v8673_v50 }
0x13c7   :  { %15139 = vmatpush3.bf16.msra.mxu1 %v16946_v37  ;;  %15178 = vmatpush3.bf16.msra.mxu0 %v17031_v57 }
0x13c8   :  { %15140 = vmatprep.subr.bf16.mxu1 %v16002_v18  ;;  %15179 = vmatprep.subr.bf16.mxu0 %v16002_v18 }
0x13c9   :  { %14185 = vmatprep.mubr.msk.f32.mxu0 %vm16003_vm2, %v16004_v23 }
0x13ca   :  { %14109 = vmatmul.mubr.f32.vlgmr.msra.gmra.mrb[20].mxu1 %v8156_v51 }
0x13cb   :  { %15142 = vmatpush3.bf16.msra.mxu1 %v16873_v21  ;;  %15181 = vmatpush3.bf16.msra.mxu0 %v17050_v36 }
0x13cc   :  { %15143 = vmatprep.subr.bf16.mxu1 %v16002_v18  ;;  %15182 = vmatprep.subr.bf16.mxu0 %v16002_v18 }
0x13cd   :  { %14119 = vmatprep.mubr.msk.f32.mxu1 %vm16003_vm2, %v16004_v23 }
0x13ce   :  { %14186 = vmatmul.mubr.f32.vlgmr.msra.gmra.mrb[18].mxu0 %v8674_v59 }
0x13cf   :  { %15145 = vmatpush3.bf16.msra.mxu1 %v16892_v44  ;;  %15184 = vmatpush3.bf16.msra.mxu0 %v17131_v35 }
0x13d0   :  { %15146 = vmatprep.subr.bf16.mxu1 %v16002_v18  ;;  %15185 = vmatprep.subr.bf16.mxu0 %v16002_v18 }
0x13d1   :  { %14196 = vmatprep.mubr.msk.f32.mxu0 %vm16003_vm2, %v16004_v23 }
0x13d2   :  { %14120 = vmatmul.mubr.f32.vlgmr.msra.gmra.mrb[20].mxu1 %v8157_v52 }
0x13d3   :  { %15148 = vmatpush3.bf16.msra.mxu1 %v16974_v41  ;;  %15187 = vmatpush3.bf16.msra.mxu0 %v17143_v12 }
0x13d4   :  { %15149 = vmatprep.subr.bf16.mxu1 %v16002_v18  ;;  %15188 = vmatprep.subr.bf16.mxu0 %v16002_v18 }
0x13d5   :  { %14130 = vmatprep.mubr.msk.f32.mxu1 %vm16003_vm2, %v16004_v23 }
0x13d6   :  { %14197 = vmatmul.mubr.f32.vlgmr.msra.gmra.mrb[18].mxu0 %v17731_v33 }
0x13d7   :  { %15151 = vmatpush3.bf16.msra.mxu1 %v16994_v17  ;;  %15190 = vmatpush3.bf16.msra.mxu0 %v17031_v57 }
0x13d8   :  { %15152 = vmatprep.subr.bf16.mxu1 %v16002_v18  ;;  %15191 = vmatprep.subr.bf16.mxu0 %v16002_v18 }
0x13d9   :  { %14207 = vmatprep.mubr.msk.f32.mxu0 %vm16003_vm2, %v16004_v23 }
0x13da   :  { %14131 = vmatmul.mubr.f32.vlgmr.msra.gmra.mrb[20].mxu1 %v17735_v31 }
0x13db   :  { %15154 = vmatpush3.bf16.msra.mxu1 %v16873_v21  ;;  %15193 = vmatpush3.bf16.msra.mxu0 %v17050_v36 }
0x13dc   :  { %15155 = vmatprep.subr.bf16.mxu1 %v16002_v18  ;;  %14141 = vmatprep.mubr.msk.f32.mxu1 %vm16003_vm2, %v16004_v23 }
0x13dd   :  { %15230 = vmatprep.subr.bf16.mxu0 %v16002_v18 }
0x13de   :  { %14208 = vmatmul.mubr.f32.vlgmr.msra.gmra.mrb[18].mxu0 %v17731_v33 }
0x13df   :  { %15157 = vmatpush3.bf16.msra.mxu1 %v16892_v44  ;;  %15232 = vmatpush3.bf16.msra.mxu0 %v17031_v57 }
0x13e0   :  { %15194 = vmatprep.subr.bf16.mxu1 %v16002_v18  ;;  %15233 = vmatprep.subr.bf16.mxu0 %v16002_v18 }
0x13e1   :  { %14284 = vmatprep.mubr.msk.f32.mxu0 %vm16003_vm2, %v16004_v23 }
0x13e2   :  { %14142 = vmatmul.mubr.f32.vlgmr.msra.gmra.mrb[20].mxu1 %v17735_v31 }
0x13e3   :  { %15196 = vmatpush3.bf16.msra.mxu1 %v16873_v21  ;;  %15235 = vmatpush3.bf16.msra.mxu0 %v17050_v36 }
0x13e4   :  { %15197 = vmatprep.subr.bf16.mxu1 %v16002_v18  ;;  %15236 = vmatprep.subr.bf16.mxu0 %v16002_v18 }
0x13e5   :  { %14218 = vmatprep.mubr.msk.f32.mxu1 %vm16003_vm2, %v16004_v23 }
0x13e7   :  { %15199 = vmatpush3.bf16.msra.mxu1 %v16892_v44 }
0x13e8   :  { %15200 = vmatprep.subr.bf16.mxu1 %v16002_v18 }
0x14b1   :  { %v9084_v25 = vpop.f32.mrb[18].mxu0 }
0x14b2   :  { %v15432_v1 = vadd.f32 %v17604_v24, %v9084_v25  ;;  %v14209_v55 = vpop.f32.mrb[19].mxu0 }
0x14b4   :  { %9096 = vrot.lane.b32.xlu1 %v15432_v1, %s16005_s10  ;;  %v9088_v61 = vadd.f32 %v15432_v1, %v8597_v13 }
0x14b5   :  { %v8567_v14 = vpop.f32.mrb[20].mxu1 }
0x14b6   :  { %v15431_v56 = vadd.f32 %v17608_v28, %v8567_v14  ;;  %v14143_v38 = vpop.f32.mrb[21].mxu1  ;;  %v12356_v8 = vmul.f32 -1.442695, %v9088_v61 }
0x14b8   :  { %8579 = vrot.lane.b32.xlu0 %v15431_v56, %s16005_s10  ;;  %v8571_v26 = vadd.f32 %v15431_v56, %v8080_v49  ;;  %15790 = vpow2.f32 %v12356_v8 }
0x14ba   :  { %v12355_v9 = vmul.f32 -1.442695, %v8571_v26 }
0x14bc   :  { %15792 = vpow2.f32 %v12355_v9 }
0x14c2   :  { %v15791_v47 = vpop.eup %15790 }
0x14c3   :  { %v9092_v60 = vadd.f32 1.0, %v15791_v47 }
0x14c5   :  { %15794 = vrcp.f32 %v9092_v60 }
0x14c6   :  { %v15793_v5 = vpop.eup %15792 }
0x14c7   :  { %v8575_v2 = vadd.f32 1.0, %v15793_v5 }
0x14c9   :  { %15796 = vrcp.f32 %v8575_v2 }
0x14cf   :  { %v15795_v58 = vpop.eup %15794 }
0x14d0   :  { %v9106_v4 = vsub.f32 1.0, %v15795_v58  ;;  %v9112_v33 = vmul.f32 %v15795_v58, %v17721_v0 }
0x14d3   :  { %v15797_v6 = vpop.eup %15796 }
0x14d4   :  { %v8589_v16 = vsub.f32 1.0, %v15797_v6  ;;  %v8595_v31 = vmul.f32 %v15797_v6, %v17726_v27 }
0x1526   :  { %v9097_v3 = vpop.permute.xlu1 %9096 }
0x1527   :  { %v9099_v7 = vmul.f32 %v15795_v58, %v9097_v3 }
0x1529   :  { %9101 = vrot.lane.b32.xlu1 %v9099_v7, %s16005_s10 }
0x152a   :  { %v8580_v39 = vpop.permute.xlu0 %8579 }
0x152b   :  { %v8582_v11 = vmul.f32 %v15797_v6, %v8580_v39 }
0x152d   :  { %8584 = vrot.lane.b32.xlu0 %v8582_v11, %s16005_s10 }
0x159b   :  { %v9102_v30 = vpop.permute.xlu1 %9101 }
0x159c   :  { %v9104_v19 = vadd.f32 %v9102_v30, %v8597_v13 }
0x159e   :  { %15798 = vtanh.f32 %v9104_v19 }
0x159f   :  { %v8585_v22 = vpop.permute.xlu0 %8584 }
0x15a0   :  { %v8587_v15 = vadd.f32 %v8585_v22, %v8080_v49 }
0x15a2   :  { %15800 = vtanh.f32 %v8587_v15 }
0x15a8   :  { %v15799_v42 = vpop.eup %15798 }
0x15a9   :  { %9108 = vrot.lane.b32.xlu1 %v15799_v42, %s16006_s11 }
0x15ac   :  { %v15801_v29 = vpop.eup %15800 }
0x15ad   :  { %8591 = vrot.lane.b32.xlu0 %v15801_v29, %s16006_s11 }
0x161b   :  { %v9109_v45 = vpop.permute.xlu1 %9108 }
0x161c   :  { %v9111_v50 = vmul.f32 %v9109_v45, %v9106_v4 }
0x161e   :  { %v17825_v43 = vadd.f32 %v9112_v33, %v9111_v50  ;;  %v10148_v50 = vld [vmem:[#allocation5 + $0x20] sm:$0xf] }
0x161f   :  { %v8592_v59 = vpop.permute.xlu0 %8591 }
0x1620   :  { %v8594_v46 = vmul.f32 %v8592_v59, %v8589_v16  ;;  %9633 = vrot.lane.b32.xlu1 %v17825_v43, %s16006_s11 }
0x1622   :  { %v17830_v51 = vadd.f32 %v8595_v31, %v8594_v46 }
0x1624   :  { %9116 = vrot.lane.b32.xlu0 %v17830_v51, %s16006_s11 }
0x1692   :  { %v9634_v54 = vpop.permute.xlu1 %9633 }
0x1693   :  { %v9635_v52 = vsel %vm248_vm1, %v9634_v54, 0 }
0x1694   :  { %v17835_v0 = vand.u32 4294901760, %v9635_v52 }
0x1696   :  { %v9707_v63 = vsub.f32 %v9635_v52, %v17835_v0  ;;  %v9117_v40 = vpop.permute.xlu0 %9116 }
0x1697   :  { %v9118_v25 = vsel %vm248_vm1, %v9117_v40, 0 }
0x1698   :  { %v9708_v27 = vand.u32 4294901760, %v9707_v63  ;;  %v17839_v1 = vand.u32 4294901760, %v9118_v25 }
0x169a   :  { %v9709_v55 = vsub.f32 %v9707_v63, %v9708_v27  ;;  %v9190_v14 = vsub.f32 %v9118_v25, %v17839_v1 }
0x169c   :  { %v9710_v56 = vand.u32 4294901760, %v9709_v55  ;;  %v9191_v38 = vand.u32 4294901760, %v9190_v14 }
0x169e   :  { %v9192_v13 = vsub.f32 %v9190_v14, %v9191_v38  ;;  %14285 = vmatmul.mubr.f32.vlgmr.msra.gmra.mrb[20].mxu0 %v9710_v56  ;;  %v9114_v56 = vld [vmem:[#allocation4 + $0x1c] sm:$0xf] }
0x169f   :  { %15238 = vmatpush3.bf16.msra.mxu0 %v17069_v53  ;;  %14295 = vmatprep.mubr.msk.f32.mxu0 %vm16003_vm2, %v16004_v23 }
0x16a0   :  { %v9193_v61 = vand.u32 4294901760, %v9192_v13  ;;  %15239 = vmatprep.subr.bf16.mxu0 %v16002_v18 }
0x16a2   :  { %14219 = vmatmul.mubr.f32.vlgmr.msra.gmra.mrb[22].mxu1 %v9193_v61 }
0x16a3   :  { %15202 = vmatpush3.bf16.msra.mxu1 %v16909_v62  ;;  %15241 = vmatpush3.bf16.msra.mxu0 %v17078_v48 }
0x16a4   :  { %15203 = vmatprep.subr.bf16.mxu1 %v16002_v18  ;;  %15242 = vmatprep.subr.bf16.mxu0 %v16002_v18 }
0x16a5   :  { %14229 = vmatprep.mubr.msk.f32.mxu1 %vm16003_vm2, %v16004_v23 }
0x16a6   :  { %14296 = vmatmul.mubr.f32.vlgmr.msra.gmra.mrb[20].mxu0 %v17835_v0 }
0x16a7   :  { %15205 = vmatpush3.bf16.msra.mxu1 %v16921_v34  ;;  %15244 = vmatpush3.bf16.msra.mxu0 %v17090_v10 }
0x16a8   :  { %15206 = vmatprep.subr.bf16.mxu1 %v16002_v18  ;;  %15245 = vmatprep.subr.bf16.mxu0 %v16002_v18 }
0x16a9   :  { %14306 = vmatprep.mubr.msk.f32.mxu0 %vm16003_vm2, %v16004_v23 }
0x16aa   :  { %14230 = vmatmul.mubr.f32.vlgmr.msra.gmra.mrb[22].mxu1 %v17839_v1 }
0x16ab   :  { %15208 = vmatpush3.bf16.msra.mxu1 %v16936_v32  ;;  %15247 = vmatpush3.bf16.msra.mxu0 %v17101_v20 }
0x16ac   :  { %15209 = vmatprep.subr.bf16.mxu1 %v16002_v18  ;;  %15248 = vmatprep.subr.bf16.mxu0 %v16002_v18 }
0x16ad   :  { %14240 = vmatprep.mubr.msk.f32.mxu1 %vm16003_vm2, %v16004_v23 }
0x16ae   :  { %14307 = vmatmul.mubr.f32.vlgmr.msra.gmra.mrb[20].mxu0 %v9707_v63 }
0x16af   :  { %15211 = vmatpush3.bf16.msra.mxu1 %v16946_v37  ;;  %15250 = vmatpush3.bf16.msra.mxu0 %v17031_v57  ;;  %v9631_v37 = vld [vmem:[#allocation5 + $0x1c] sm:$0xf] }
0x16b0   :  { %15212 = vmatprep.subr.bf16.mxu1 %v16002_v18  ;;  %15251 = vmatprep.subr.bf16.mxu0 %v16002_v18 }
0x16b1   :  { %14317 = vmatprep.mubr.msk.f32.mxu0 %vm16003_vm2, %v16004_v23 }
0x16b2   :  { %14241 = vmatmul.mubr.f32.vlgmr.msra.gmra.mrb[22].mxu1 %v9190_v14 }
0x16b3   :  { %15214 = vmatpush3.bf16.msra.mxu1 %v16873_v21  ;;  %15253 = vmatpush3.bf16.msra.mxu0 %v17050_v36 }
0x16b4   :  { %15215 = vmatprep.subr.bf16.mxu1 %v16002_v18  ;;  %15254 = vmatprep.subr.bf16.mxu0 %v16002_v18 }
0x16b5   :  { %14251 = vmatprep.mubr.msk.f32.mxu1 %vm16003_vm2, %v16004_v23 }
0x16b6   :  { %14318 = vmatmul.mubr.f32.vlgmr.msra.gmra.mrb[20].mxu0 %v9708_v27 }
0x16b7   :  { %15217 = vmatpush3.bf16.msra.mxu1 %v16892_v44  ;;  %15256 = vmatpush3.bf16.msra.mxu0 %v17131_v35 }
0x16b8   :  { %15218 = vmatprep.subr.bf16.mxu1 %v16002_v18  ;;  %15257 = vmatprep.subr.bf16.mxu0 %v16002_v18 }
0x16b9   :  { %14328 = vmatprep.mubr.msk.f32.mxu0 %vm16003_vm2, %v16004_v23 }
0x16ba   :  { %14252 = vmatmul.mubr.f32.vlgmr.msra.gmra.mrb[22].mxu1 %v9191_v38 }
0x16bb   :  { %15220 = vmatpush3.bf16.msra.mxu1 %v16974_v41  ;;  %15259 = vmatpush3.bf16.msra.mxu0 %v17143_v12 }
0x16bc   :  { %15221 = vmatprep.subr.bf16.mxu1 %v16002_v18  ;;  %15260 = vmatprep.subr.bf16.mxu0 %v16002_v18 }
0x16bd   :  { %14262 = vmatprep.mubr.msk.f32.mxu1 %vm16003_vm2, %v16004_v23 }
0x16be   :  { %14329 = vmatmul.mubr.f32.vlgmr.msra.gmra.mrb[20].mxu0 %v17835_v0 }
0x16bf   :  { %15223 = vmatpush3.bf16.msra.mxu1 %v16994_v17  ;;  %15262 = vmatpush3.bf16.msra.mxu0 %v17031_v57 }
0x16c0   :  { %15224 = vmatprep.subr.bf16.mxu1 %v16002_v18  ;;  %15263 = vmatprep.subr.bf16.mxu0 %v16002_v18 }
0x16c1   :  { %14339 = vmatprep.mubr.msk.f32.mxu0 %vm16003_vm2, %v16004_v23 }
0x16c2   :  { %14263 = vmatmul.mubr.f32.vlgmr.msra.gmra.mrb[22].mxu1 %v17839_v1 }
0x16c3   :  { %15226 = vmatpush3.bf16.msra.mxu1 %v16873_v21  ;;  %15265 = vmatpush3.bf16.msra.mxu0 %v17050_v36 }
0x16c4   :  { %15227 = vmatprep.subr.bf16.mxu1 %v16002_v18  ;;  %14273 = vmatprep.mubr.msk.f32.mxu1 %vm16003_vm2, %v16004_v23 }
0x16c5   :  { %15302 = vmatprep.subr.bf16.mxu0 %v16002_v18 }
0x16c6   :  { %14340 = vmatmul.mubr.f32.vlgmr.msra.gmra.mrb[20].mxu0 %v17835_v0 }
0x16c7   :  { %15229 = vmatpush3.bf16.msra.mxu1 %v16892_v44  ;;  %15304 = vmatpush3.bf16.msra.mxu0 %v17031_v57 }
0x16c8   :  { %15266 = vmatprep.subr.bf16.mxu1 %v16002_v18  ;;  %15305 = vmatprep.subr.bf16.mxu0 %v16002_v18 }
0x16c9   :  { %14416 = vmatprep.mubr.msk.f32.mxu0 %vm16003_vm2, %v16004_v23 }
0x16ca   :  { %14274 = vmatmul.mubr.f32.vlgmr.msra.gmra.mrb[22].mxu1 %v17839_v1 }
0x16cb   :  { %15268 = vmatpush3.bf16.msra.mxu1 %v17031_v57  ;;  %14350 = vmatprep.mubr.msk.f32.mxu1 %vm16003_vm2, %v16004_v23 }
0x16cc   :  { %15269 = vmatprep.subr.bf16.mxu1 %v16002_v18  ;;  %15307 = vmatpush3.bf16.msra.mxu0 %v17050_v36 }
0x16cd   :  { %15308 = vmatprep.subr.bf16.mxu0 %v16002_v18 }
0x16cf   :  { %15271 = vmatpush3.bf16.msra.mxu1 %v17050_v36 }
0x16d0   :  { %15272 = vmatprep.subr.bf16.mxu1 %v16002_v18 }
0x1799   :  { %v10118_v21 = vpop.f32.mrb[20].mxu0 }
0x179a   :  { %v15434_v44 = vadd.f32 %v17604_v24, %v10118_v21  ;;  %v14341_v62 = vpop.f32.mrb[21].mxu0 }
0x179c   :  { %10130 = vrot.lane.b32.xlu1 %v15434_v44, %s16005_s10  ;;  %v10122_v41 = vadd.f32 %v15434_v44, %v9631_v37 }
0x179d   :  { %v17922_v34 = vpop.f32.mrb[22].mxu1 }
0x179e   :  { %v14275_v32 = vpop.f32.mrb[23].mxu1  ;;  %v12358_v17 = vmul.f32 -1.442695, %v10122_v41  ;;  %v15433_v14 = vadd.f32 %v17608_v28, %v17922_v34 }
0x17a0   :  { %15802 = vpow2.f32 %v12358_v17  ;;  %v9605_v38 = vadd.f32 %v15433_v14, %v9114_v56 }
0x17a2   :  { %v12357_v13 = vmul.f32 -1.442695, %v9605_v38 }
0x17aa   :  { %v15803_v49 = vpop.eup %15802 }
0x17ab   :  { %v10126_v8 = vadd.f32 1.0, %v15803_v49 }
0x17ad   :  { %15804 = vrcp.f32 %v10126_v8 }
0x17b7   :  { %v15805_v26 = vpop.eup %15804 }
0x17b8   :  { %v10140_v58 = vsub.f32 1.0, %v15805_v26  ;;  %v10146_v7 = vmul.f32 %v15805_v26, %v17825_v43 }
0x180e   :  { %v10131_v9 = vpop.permute.xlu1 %10130 }
0x180f   :  { %v10133_v47 = vmul.f32 %v15805_v26, %v10131_v9  ;;  %v15828_v9 = vld [vmem:[#allocation15] ss:$0 sm:$0xff] }
0x1811   :  { %10135 = vrot.lane.b32.xlu1 %v10133_v47, %s16005_s10 }
0x1883   :  { %v10136_v60 = vpop.permute.xlu1 %10135 }
0x1884   :  { %v10138_v5 = vadd.f32 %v10136_v60, %v9631_v37 }
0x1886   :  { %15806 = vtanh.f32 %v10138_v5  ;;  %v10665_v5 = vld [vmem:[#allocation5 + $0x24] sm:$0xf] }
0x1890   :  { %v15807_v2 = vpop.eup %15806 }
0x1891   :  { %10142 = vrot.lane.b32.xlu1 %v15807_v2, %s16006_s11 }
0x1903   :  { %v10143_v3 = vpop.permute.xlu1 %10142 }
0x1904   :  { %v10145_v6 = vmul.f32 %v10143_v3, %v10140_v58 }
0x1906   :  { %v17927_v39 = vadd.f32 %v10146_v7, %v10145_v6 }
0x1908   :  { %10150 = vrot.lane.b32.xlu1 %v17927_v39, %s16006_s11 }
0x197a   :  { %v10151_v11 = vpop.permute.xlu1 %10150 }
0x197b   :  { %v10152_v30 = vsel %vm248_vm1, %v10151_v11, 0 }
0x197c   :  { %v10223_v19 = vand.u32 4294901760, %v10152_v30 }
0x197e   :  { %v10224_v22 = vsub.f32 %v10152_v30, %v10223_v19 }
0x1980   :  { %v10225_v15 = vand.u32 4294901760, %v10224_v22 }
0x1982   :  { %v10226_v42 = vsub.f32 %v10224_v22, %v10225_v15 }
0x1984   :  { %v10227_v29 = vand.u32 4294901760, %v10226_v42 }
0x1986   :  { %14351 = vmatmul.mubr.f32.vlgmr.msra.gmra.mrb[24].mxu1 %v10227_v29 }
0x1987   :  { %15274 = vmatpush3.bf16.msra.mxu1 %v17069_v53  ;;  %14361 = vmatprep.mubr.msk.f32.mxu1 %vm16003_vm2, %v16004_v23 }
0x1988   :  { %15275 = vmatprep.subr.bf16.mxu1 %v16002_v18 }
0x198b   :  { %15277 = vmatpush3.bf16.msra.mxu1 %v17078_v48 }
0x198c   :  { %15278 = vmatprep.subr.bf16.mxu1 %v16002_v18 }
0x198e   :  { %14362 = vmatmul.mubr.f32.vlgmr.msra.gmra.mrb[24].mxu1 %v10223_v19 }
0x198f   :  { %15280 = vmatpush3.bf16.msra.mxu1 %v17090_v10  ;;  %14372 = vmatprep.mubr.msk.f32.mxu1 %vm16003_vm2, %v16004_v23 }
0x1990   :  { %15281 = vmatprep.subr.bf16.mxu1 %v16002_v18 }
0x1993   :  { %15283 = vmatpush3.bf16.msra.mxu1 %v17101_v20 }
0x1994   :  { %15284 = vmatprep.subr.bf16.mxu1 %v16002_v18 }
0x1996   :  { %14373 = vmatmul.mubr.f32.vlgmr.msra.gmra.mrb[24].mxu1 %v10224_v22  ;;  %v11187_v22 = vld [vmem:[%s18183_s13 + $0x8] sm:$0xff] }
0x1997   :  { %15286 = vmatpush3.bf16.msra.mxu1 %v17031_v57  ;;  %14383 = vmatprep.mubr.msk.f32.mxu1 %vm16003_vm2, %v16004_v23  ;;  %v11199_v42 = vand.u32 4294901760, %v11187_v22 }
0x1998   :  { %15287 = vmatprep.subr.bf16.mxu1 %v16002_v18 }
0x199b   :  { %15289 = vmatpush3.bf16.msra.mxu1 %v17050_v36 }
0x199c   :  { %15290 = vmatprep.subr.bf16.mxu1 %v16002_v18 }
0x199e   :  { %14384 = vmatmul.mubr.f32.vlgmr.msra.gmra.mrb[24].mxu1 %v10225_v15 }
0x199f   :  { %15292 = vmatpush3.bf16.msra.mxu1 %v17131_v35  ;;  %14394 = vmatprep.mubr.msk.f32.mxu1 %vm16003_vm2, %v16004_v23 }
0x19a0   :  { %15293 = vmatprep.subr.bf16.mxu1 %v16002_v18 }
0x19a3   :  { %15295 = vmatpush3.bf16.msra.mxu1 %v17143_v12 }
0x19a4   :  { %15296 = vmatprep.subr.bf16.mxu1 %v16002_v18 }
0x19a6   :  { %14395 = vmatmul.mubr.f32.vlgmr.msra.gmra.mrb[24].mxu1 %v10223_v19 }
0x19a7   :  { %15298 = vmatpush3.bf16.msra.mxu1 %v17031_v57  ;;  %14405 = vmatprep.mubr.msk.f32.mxu1 %vm16003_vm2, %v16004_v23 }
0x19a8   :  { %15299 = vmatprep.subr.bf16.mxu1 %v16002_v18 }
0x19ab   :  { %15301 = vmatpush3.bf16.msra.mxu1 %v17050_v36 }
0x19ac   :  { %15338 = vmatprep.subr.bf16.mxu1 %v16002_v18 }
0x19ae   :  { %14406 = vmatmul.mubr.f32.vlgmr.msra.gmra.mrb[24].mxu1 %v10223_v19  ;;  %v11186_v19 = vld [vmem:[%s18183_s13] sm:$0xff] }
0x19af   :  { %14482 = vmatprep.mubr.msk.f32.mxu1 %vm16003_vm2, %v16004_v23  ;;  %v11196_v15 = vand.u32 4294901760, %v11186_v19 }
0x19b1   :  { %v18021_v29 = vpack.c.bf16 %v11199_v42, %v11196_v15 }
0x19b3   :  { %15340 = vmatpush3.bf16.msra.mxu1 %v18021_v29 }
0x19b4   :  { %15341 = vmatprep.subr.bf16.mxu1 %v16002_v18 }
0x1a81   :  { %v10635_v4 = vpop.f32.mrb[24].mxu1 }
0x1a82   :  { %v15435_v45 = vadd.f32 %v17604_v24, %v10635_v4  ;;  %v14407_v33 = vpop.f32.mrb[25].mxu1  ;;  %v18023_v4 = vsub.f32 %v11186_v19, %v11196_v15 }
0x1a84   :  { %10647 = vrot.lane.b32.xlu0 %v15435_v45, %s16005_s10  ;;  %v10639_v43 = vadd.f32 %v15435_v45, %v10148_v50  ;;  %v18025_v45 = vsub.f32 %v11187_v22, %v11199_v42 }
0x1a86   :  { %v12359_v16 = vmul.f32 -1.442695, %v10639_v43 }
0x1a88   :  { %15808 = vpow2.f32 %v12359_v16 }
0x1a92   :  { %v15809_v59 = vpop.eup %15808 }
0x1a93   :  { %v10643_v31 = vadd.f32 1.0, %v15809_v59 }
0x1a95   :  { %15810 = vrcp.f32 %v10643_v31  ;;  %v11188_v31 = vld [vmem:[%s18183_s13 + $0x10] sm:$0xff] }
0x1a9f   :  { %v15811_v46 = vpop.eup %15810 }
0x1aa0   :  { %v10657_v24 = vsub.f32 1.0, %v15811_v46  ;;  %v10663_v27 = vmul.f32 %v15811_v46, %v17927_v39 }
0x1af6   :  { %v10648_v54 = vpop.permute.xlu0 %10647 }
0x1af7   :  { %v10650_v52 = vmul.f32 %v15811_v46, %v10648_v54  ;;  %v11189_v46 = vld [vmem:[%s18183_s13 + $0x18] sm:$0xff]  ;;  %v11202_v54 = vand.u32 4294901760, %v11188_v31 }
0x1af9   :  { %10652 = vrot.lane.b32.xlu1 %v10650_v52, %s16005_s10  ;;  %v11205_v52 = vand.u32 4294901760, %v11189_v46 }
0x1b6b   :  { %v10653_v0 = vpop.permute.xlu1 %10652 }
0x1b6c   :  { %v10655_v63 = vadd.f32 %v10653_v0, %v10148_v50 }
0x1b6e   :  { %15812 = vtanh.f32 %v10655_v63  ;;  %v11277_v63 = vand.u32 4294901760, %v18023_v4 }
0x1b6f   :  { %15814 = vpow2.f32 %v12357_v13 }
0x1b78   :  { %v15813_v40 = vpop.eup %15812 }
0x1b79   :  { %10659 = vrot.lane.b32.xlu0 %v15813_v40, %s16006_s11  ;;  %v15815_v61 = vpop.eup %15814  ;;  %v11284_v40 = vand.u32 4294901760, %v18025_v45 }
0x1b7a   :  { %v9609_v21 = vadd.f32 1.0, %v15815_v61 }
0x1b7c   :  { %15816 = vrcp.f32 %v9609_v21 }
0x1b86   :  { %v15817_v37 = vpop.eup %15816 }
0x1beb   :  { %v10660_v25 = vpop.permute.xlu0 %10659 }
0x1bec   :  { %v10662_v1 = vmul.f32 %v10660_v25, %v10657_v24  ;;  %v15342_v24 = vpack.c.bf16 %v11205_v52, %v11202_v54  ;;  %v18041_v25 = vsub.f32 %v11188_v31, %v11202_v54 }
0x1bee   :  { %v17969_v55 = vadd.f32 %v10663_v27, %v10662_v1  ;;  %v18043_v27 = vsub.f32 %v11189_v46, %v11205_v52  ;;  %v11278_v1 = vsub.f32 %v18023_v4, %v11277_v63  ;;  %15343 = vmatpush3.bf16.msra.mxu1 %v15342_v24  ;;  %v11291_v38 = vand.u32 4294901760, %v18041_v25 }
0x1bef   :  { %15344 = vmatprep.subr.bf16.mxu1 %v16002_v18 }
0x1bf0   :  { %10667 = vrot.lane.b32.xlu1 %v17969_v55, %s16006_s11  ;;  %v11298_v13 = vand.u32 4294901760, %v18043_v27  ;;  %v11292_v21 = vsub.f32 %v18041_v25, %v11291_v38 }
0x1bf4   :  { %9613 = vrot.lane.b32.xlu1 %v15433_v14, %s16005_s10  ;;  %v11279_v14 = vand.u32 4294901760, %v11278_v1 }
0x1c62   :  { %v10668_v44 = vpop.permute.xlu1 %10667 }
0x1c63   :  { %v10669_v62 = vsel %vm248_vm1, %v10668_v44, 0  ;;  %v11299_v44 = vsub.f32 %v18043_v27, %v11298_v13 }
0x1c64   :  { %v10740_v32 = vand.u32 4294901760, %v10669_v62 }
0x1c66   :  { %v10741_v41 = vsub.f32 %v10669_v62, %v10740_v32  ;;  %v9614_v17 = vpop.permute.xlu1 %9613  ;;  %v11293_v62 = vand.u32 4294901760, %v11292_v21 }
0x1c67   :  { %v9616_v49 = vmul.f32 %v15817_v37, %v9614_v17  ;;  %v15354_v17 = vpack.c.bf16 %v18043_v27, %v18041_v25 }
0x1c68   :  { %v10742_v8 = vand.u32 4294901760, %v10741_v41 }
0x1c69   :  { %9618 = vrot.lane.b32.xlu1 %v9616_v49, %s16005_s10  ;;  %v18058_v49 = vpack.c.bf16 %v11284_v40, %v11277_v63 }
0x1c6a   :  { %v10743_v28 = vsub.f32 %v10741_v41, %v10742_v8 }
0x1c6c   :  { %v10744_v34 = vand.u32 4294901760, %v10743_v28  ;;  %v11182_v28 = vld [vmem:[%s18191_s22] sm:$0xff] }
0x1c6e   :  { %14417 = vmatmul.mubr.f32.vlgmr.msra.gmra.mrb[22].mxu0 %v10744_v34  ;;  %v11183_v34 = vld [vmem:[%s18191_s22 + $0x8] sm:$0xff] }
0x1c6f   :  { %15310 = vmatpush3.bf16.msra.mxu0 %v17069_v53  ;;  %14427 = vmatprep.mubr.msk.f32.mxu0 %vm16003_vm2, %v16004_v23 }
0x1c70   :  { %15311 = vmatprep.subr.bf16.mxu0 %v16002_v18 }
0x1c73   :  { %15313 = vmatpush3.bf16.msra.mxu0 %v17078_v48 }
0x1c74   :  { %15314 = vmatprep.subr.bf16.mxu0 %v16002_v18 }
0x1c76   :  { %14428 = vmatmul.mubr.f32.vlgmr.msra.gmra.mrb[22].mxu0 %v10740_v32 }
0x1c77   :  { %15316 = vmatpush3.bf16.msra.mxu0 %v17090_v10  ;;  %14438 = vmatprep.mubr.msk.f32.mxu0 %vm16003_vm2, %v16004_v23 }
0x1c78   :  { %15317 = vmatprep.subr.bf16.mxu0 %v16002_v18 }
0x1c7b   :  { %15319 = vmatpush3.bf16.msra.mxu0 %v17101_v20 }
0x1c7c   :  { %15320 = vmatprep.subr.bf16.mxu0 %v16002_v18 }
0x1c7e   :  { %14439 = vmatmul.mubr.f32.vlgmr.msra.gmra.mrb[22].mxu0 %v10741_v41 }
0x1c7f   :  { %15322 = vmatpush3.bf16.msra.mxu0 %v17031_v57  ;;  %14449 = vmatprep.mubr.msk.f32.mxu0 %vm16003_vm2, %v16004_v23 }
0x1c80   :  { %15323 = vmatprep.subr.bf16.mxu0 %v16002_v18 }
0x1c83   :  { %15325 = vmatpush3.bf16.msra.mxu0 %v17050_v36 }
0x1c84   :  { %15326 = vmatprep.subr.bf16.mxu0 %v16002_v18 }
0x1c86   :  { %14450 = vmatmul.mubr.f32.vlgmr.msra.gmra.mrb[22].mxu0 %v10742_v8  ;;  %v18060_v8 = vpack.c.bf16 %v11298_v13, %v11291_v38 }
0x1c87   :  { %15328 = vmatpush3.bf16.msra.mxu0 %v17131_v35  ;;  %14460 = vmatprep.mubr.msk.f32.mxu0 %vm16003_vm2, %v16004_v23  ;;  %v9629_v35 = vmul.f32 %v15817_v37, %v17830_v51 }
0x1c88   :  { %15329 = vmatprep.subr.bf16.mxu0 %v16002_v18 }
0x1c8b   :  { %15331 = vmatpush3.bf16.msra.mxu0 %v17143_v12 }
0x1c8c   :  { %15332 = vmatprep.subr.bf16.mxu0 %v16002_v18 }
0x1c8e   :  { %14461 = vmatmul.mubr.f32.vlgmr.msra.gmra.mrb[22].mxu0 %v10740_v32 }
0x1c8f   :  { %15334 = vmatpush3.bf16.msra.mxu0 %v17031_v57  ;;  %14471 = vmatprep.mubr.msk.f32.mxu0 %vm16003_vm2, %v16004_v23  ;;  %v9623_v57 = vsub.f32 1.0, %v15817_v37  ;;  %v15351_v37 = vpack.c.bf16 %v18025_v45, %v18023_v4 }
0x1c90   :  { %15335 = vmatprep.subr.bf16.mxu0 %v16002_v18 }
0x1c93   :  { %15337 = vmatpush3.bf16.msra.mxu0 %v17050_v36 }
0x1c94   :  { %15356 = vmatprep.subr.bf16.mxu0 %v16002_v18 }
0x1c96   :  { %14472 = vmatmul.mubr.f32.vlgmr.msra.gmra.mrb[22].mxu0 %v10740_v32  ;;  %v11300_v32 = vand.u32 4294901760, %v11299_v44 }
0x1c97   :  { %14515 = vmatprep.mubr.msk.f32.mxu0 %vm16003_vm2, %v16004_v23  ;;  %15358 = vmatpush3.bf16.msra.mxu0 %v18021_v29 }
0x1c98   :  { %15359 = vmatprep.subr.bf16.mxu0 %v16002_v18  ;;  %v15348_v41 = vpack.c.bf16 %v11300_v32, %v11293_v62 }
0x1c9b   :  { %15361 = vmatpush3.bf16.msra.mxu0 %v15342_v24 }
0x1c9c   :  { %15368 = vmatprep.subr.bf16.mxu0 %v16002_v18 }
0x1cdb   :  { %v9619_v53 = vpop.permute.xlu1 %9618 }
0x1cdc   :  { %v9621_v48 = vadd.f32 %v9619_v53, %v9114_v56  ;;  %v11686_v53 = vand.u32 4294901760, %v11182_v28 }
0x1cde   :  { %15818 = vtanh.f32 %v9621_v48  ;;  %v11689_v48 = vand.u32 4294901760, %v11183_v34 }
0x1ce8   :  { %v15819_v10 = vpop.eup %15818 }
0x1ce9   :  { %9625 = vrot.lane.b32.xlu1 %v15819_v10, %s16006_s11  ;;  %v11184_v10 = vld [vmem:[%s18191_s22 + $0x10] sm:$0xff] }
0x1d5b   :  { %v9626_v20 = vpop.permute.xlu1 %9625 }
0x1d5c   :  { %v9628_v12 = vmul.f32 %v9626_v20, %v9623_v57  ;;  %v11185_v57 = vld [vmem:[%s18191_s22 + $0x18] sm:$0xff]  ;;  %v18074_v20 = vsub.f32 %v11182_v28, %v11686_v53 }
0x1d5e   :  { %v9630_v26 = vadd.f32 %v9629_v35, %v9628_v12  ;;  %v18076_v35 = vsub.f32 %v11183_v34, %v11689_v48  ;;  %v11692_v12 = vand.u32 4294901760, %v11184_v10 }
0x1d60   :  { %11681 = vrot.lane.b32.xlu1 %v9630_v26, %s16006_s11  ;;  %v11695_v26 = vand.u32 4294901760, %v11185_v57  ;;  %v15387_v63 = vpack.c.bf16 %v18076_v35, %v18074_v20 }
0x1d62   :  { %v15378_v46 = vpack.c.bf16 %v11695_v26, %v11692_v12 }
0x1d69   :  { %v11152_v36 = vpop.f32.mrb[22].mxu0 }
0x1d6a   :  { %v15436_v47 = vadd.f32 %v15828_v9, %v11152_v36  ;;  %v14473_v60 = vpop.f32.mrb[23].mxu0  ;;  %v11767_v9 = vand.u32 4294901760, %v18074_v20 }
0x1d6b   :  { %v11774_v60 = vand.u32 4294901760, %v18076_v35 }
0x1d6c   :  { %11164 = vrot.lane.b32.xlu0 %v15436_v47, %s16005_s10  ;;  %v11156_v2 = vadd.f32 %v15436_v47, %v10665_v5 }
0x1d6d   :  { %v15399_v25 = vpack.c.bf16 %v11774_v60, %v11767_v9 }
0x1d6e   :  { %v12360_v58 = vmul.f32 -1.442695, %v11156_v2  ;;  %v18083_v2 = vsub.f32 %v11185_v57, %v11695_v26 }
0x1d70   :  { %15820 = vpow2.f32 %v12360_v58 }
0x1d7a   :  { %v15821_v3 = vpop.eup %15820 }
0x1d7b   :  { %v11160_v7 = vadd.f32 1.0, %v15821_v3 }
0x1d7d   :  { %15822 = vrcp.f32 %v11160_v7  ;;  %v11768_v7 = vsub.f32 %v18074_v20, %v11767_v9 }
0x1d7f   :  { %v11769_v19 = vand.u32 4294901760, %v11768_v7 }
0x1d87   :  { %v15823_v6 = vpop.eup %15822 }
0x1d88   :  { %v11174_v50 = vsub.f32 1.0, %v15823_v6  ;;  %v11180_v16 = vmul.f32 %v15823_v6, %v17969_v55  ;;  %v11285_v55 = vsub.f32 %v18025_v45, %v11284_v40 }
0x1d8a   :  { %v11286_v56 = vand.u32 4294901760, %v11285_v55 }
0x1d8c   :  { %v15345_v61 = vpack.c.bf16 %v11286_v56, %v11279_v14 }
0x1dde   :  { %v11165_v39 = vpop.permute.xlu0 %11164 }
0x1ddf   :  { %v11167_v51 = vmul.f32 %v15823_v6, %v11165_v39  ;;  %v11775_v6 = vsub.f32 %v18076_v35, %v11774_v60 }
0x1de1   :  { %11169 = vrot.lane.b32.xlu0 %v11167_v51, %s16005_s10  ;;  %v11788_v51 = vand.u32 4294901760, %v18083_v2  ;;  %v11776_v22 = vand.u32 4294901760, %v11775_v6 }
0x1de3   :  { %v11789_v42 = vsub.f32 %v18083_v2, %v11788_v51 }
0x1e53   :  { %v11170_v11 = vpop.permute.xlu0 %11169 }
0x1e54   :  { %v11172_v30 = vadd.f32 %v11170_v11, %v10665_v5  ;;  %v18081_v5 = vsub.f32 %v11184_v10, %v11692_v12 }
0x1e56   :  { %15824 = vtanh.f32 %v11172_v30  ;;  %v11781_v39 = vand.u32 4294901760, %v18081_v5 }
0x1e58   :  { %v11782_v15 = vsub.f32 %v18081_v5, %v11781_v39  ;;  %v15402_v27 = vpack.c.bf16 %v11788_v51, %v11781_v39 }
0x1e5a   :  { %v11783_v45 = vand.u32 4294901760, %v11782_v15 }
0x1e60   :  { %v15825_v33 = vpop.eup %15824 }
0x1e61   :  { %11176 = vrot.lane.b32.xlu0 %v15825_v33, %s16006_s11  ;;  %v11790_v33 = vand.u32 4294901760, %v11789_v42 }
0x1ed3   :  { %v11177_v43 = vpop.permute.xlu0 %11176 }
0x1ed4   :  { %v11179_v59 = vmul.f32 %v11177_v43, %v11174_v50  ;;  %v11682_v50 = vpop.permute.xlu1 %11681  ;;  %v15384_v43 = vpack.c.bf16 %v11790_v33, %v11783_v45 }
0x1ed6   :  { %v11181_v0 = vadd.f32 %v11180_v16, %v11179_v59  ;;  %v11683_v16 = vsel %vm248_vm1, %v11682_v50, 0  ;;  %v15375_v59 = vpack.c.bf16 %v11689_v48, %v11686_v53 }
0x1ed7   :  { %v11754_v31 = vand.u32 4294901760, %v11683_v16 }
0x1ed8   :  { %11191 = vrot.lane.b32.xlu0 %v11181_v0, %s16006_s11 }
0x1ed9   :  { %v11755_v54 = vsub.f32 %v11683_v16, %v11754_v31 }
0x1edb   :  { %v11756_v52 = vand.u32 4294901760, %v11755_v54 }
0x1edd   :  { %v11757_v0 = vsub.f32 %v11755_v54, %v11756_v52 }
0x1edf   :  { %v11758_v40 = vand.u32 4294901760, %v11757_v0 }
0x1f4a   :  { %v11192_v36 = vpop.permute.xlu0 %11191 }
0x1f4b   :  { %v11193_v47 = vsel %vm248_vm1, %v11192_v36, 0 }
0x1f4c   :  { %v18085_v58 = vand.u32 4294901760, %v11193_v47 }
0x1f4e   :  { %v11265_v3 = vsub.f32 %v11193_v47, %v18085_v58 }
0x1f50   :  { %v11266_v11 = vand.u32 4294901760, %v11265_v3 }
0x1f52   :  { %v11267_v30 = vsub.f32 %v11265_v3, %v11266_v11  ;;  %14516 = vmatmul.mubr.f32.vlgmr.msra.gmra.mrb[24].mxu0 %v11266_v11 }
0x1f53   :  { %15370 = vmatpush3.bf16.msra.mxu0 %v18021_v29  ;;  %14537 = vmatprep.mubr.msk.f32.mxu0 %vm16003_vm2, %v16004_v23  ;;  %v15381_v29 = vpack.c.bf16 %v11776_v22, %v11769_v19 }
0x1f54   :  { %v11268_v4 = vand.u32 4294901760, %v11267_v30  ;;  %15371 = vmatprep.subr.bf16.mxu0 %v16002_v18 }
0x1f56   :  { %14483 = vmatmul.mubr.f32.vlgmr.msra.gmra.mrb[26].mxu1 %v11268_v4 }
0x1f57   :  { %15346 = vmatpush3.bf16.msra.mxu1 %v15345_v61  ;;  %15373 = vmatpush3.bf16.msra.mxu0 %v15342_v24  ;;  %v15390_v24 = vpack.c.bf16 %v18083_v2, %v18081_v5 }
0x1f58   :  { %15347 = vmatprep.subr.bf16.mxu1 %v16002_v18  ;;  %15380 = vmatprep.subr.bf16.mxu0 %v16002_v18 }
0x1f59   :  { %14493 = vmatprep.mubr.msk.f32.mxu1 %vm16003_vm2, %v16004_v23 }
0x1f5a   :  { %14538 = vmatmul.mubr.f32.vlgmr.msra.gmra.mrb[26].mxu0 %v18085_v58 }
0x1f5b   :  { %15349 = vmatpush3.bf16.msra.mxu1 %v15348_v41  ;;  %15382 = vmatpush3.bf16.msra.mxu0 %v15381_v29 }
0x1f5c   :  { %15350 = vmatprep.subr.bf16.mxu1 %v16002_v18  ;;  %15383 = vmatprep.subr.bf16.mxu0 %v16002_v18 }
0x1f5d   :  { %14559 = vmatprep.mubr.msk.f32.mxu0 %vm16003_vm2, %v16004_v23 }
0x1f5e   :  { %14494 = vmatmul.mubr.f32.vlgmr.msra.gmra.mrb[28].mxu1 %v18085_v58 }
0x1f5f   :  { %15352 = vmatpush3.bf16.msra.mxu1 %v15351_v37  ;;  %15385 = vmatpush3.bf16.msra.mxu0 %v15384_v43 }
0x1f60   :  { %15353 = vmatprep.subr.bf16.mxu1 %v16002_v18  ;;  %15392 = vmatprep.subr.bf16.mxu0 %v16002_v18 }
0x1f61   :  { %14504 = vmatprep.mubr.msk.f32.mxu1 %vm16003_vm2, %v16004_v23 }
0x1f62   :  { %14560 = vmatmul.mubr.f32.vlgmr.msra.gmra.mrb[28].mxu0 %v11754_v31 }
0x1f63   :  { %15355 = vmatpush3.bf16.msra.mxu1 %v15354_v17  ;;  %15394 = vmatpush3.bf16.msra.mxu0 %v15375_v59 }
0x1f64   :  { %15362 = vmatprep.subr.bf16.mxu1 %v16002_v18  ;;  %15395 = vmatprep.subr.bf16.mxu0 %v16002_v18 }
0x1f65   :  { %14581 = vmatprep.mubr.msk.f32.mxu0 %vm16003_vm2, %v16004_v23 }
0x1f66   :  { %14505 = vmatmul.mubr.f32.vlgmr.msra.gmra.mrb[30].mxu1 %v11265_v3 }
0x1f67   :  { %15364 = vmatpush3.bf16.msra.mxu1 %v18058_v49  ;;  %15397 = vmatpush3.bf16.msra.mxu0 %v15378_v46 }
0x1f68   :  { %15365 = vmatprep.subr.bf16.mxu1 %v16002_v18  ;;  %15404 = vmatprep.subr.bf16.mxu0 %v16002_v18 }
0x1f69   :  { %14526 = vmatprep.mubr.msk.f32.mxu1 %vm16003_vm2, %v16004_v23 }
0x1f6a   :  { %14582 = vmatmul.mubr.f32.vlgmr.msra.gmra.mrb[30].mxu0 %v11756_v52 }
0x1f6b   :  { %15367 = vmatpush3.bf16.msra.mxu1 %v18060_v8  ;;  %15406 = vmatpush3.bf16.msra.mxu0 %v15375_v59 }
0x1f6c   :  { %15374 = vmatprep.subr.bf16.mxu1 %v16002_v18  ;;  %15407 = vmatprep.subr.bf16.mxu0 %v16002_v18 }
0x1f6d   :  { %14603 = vmatprep.mubr.msk.f32.mxu0 %vm16003_vm2, %v16004_v23 }
0x1f6e   :  { %14527 = vmatmul.mubr.f32.vlgmr.msra.gmra.mrb[32].mxu1 %v18085_v58  ;;  %v12361_v58 = vld [vmem:[#allocation17] ss:$0 sm:$0xff] }
0x1f6f   :  { %15376 = vmatpush3.bf16.msra.mxu1 %v15375_v59  ;;  %15409 = vmatpush3.bf16.msra.mxu0 %v15378_v46 }
0x1f70   :  { %15377 = vmatprep.subr.bf16.mxu1 %v16002_v18  ;;  %14548 = vmatprep.mubr.msk.f32.mxu1 %vm16003_vm2, %v16004_v23 }
0x1f72   :  { %14604 = vmatmul.mubr.f32.vlgmr.msra.gmra.mrb[32].mxu0 %v11754_v31 }
0x1f73   :  { %15379 = vmatpush3.bf16.msra.mxu1 %v15378_v46 }
0x1f74   :  { %15386 = vmatprep.subr.bf16.mxu1 %v16002_v18 }
0x1f76   :  { %14549 = vmatmul.mubr.f32.vlgmr.msra.gmra.mrb[34].mxu1 %v11758_v40 }
0x1f77   :  { %15388 = vmatpush3.bf16.msra.mxu1 %v15387_v63  ;;  %14570 = vmatprep.mubr.msk.f32.mxu1 %vm16003_vm2, %v16004_v23 }
0x1f78   :  { %15389 = vmatprep.subr.bf16.mxu1 %v16002_v18 }
0x1f7b   :  { %15391 = vmatpush3.bf16.msra.mxu1 %v15390_v24 }
0x1f7c   :  { %15398 = vmatprep.subr.bf16.mxu1 %v16002_v18 }
0x1f7e   :  { %14571 = vmatmul.mubr.f32.vlgmr.msra.gmra.mrb[36].mxu1 %v11755_v54 }
0x1f7f   :  { %15400 = vmatpush3.bf16.msra.mxu1 %v15399_v25  ;;  %14592 = vmatprep.mubr.msk.f32.mxu1 %vm16003_vm2, %v16004_v23 }
0x1f80   :  { %15401 = vmatprep.subr.bf16.mxu1 %v16002_v18 }
0x1f83   :  { %15403 = vmatpush3.bf16.msra.mxu1 %v15402_v27 }
0x1f86   :  { %14593 = vmatmul.mubr.f32.vlgmr.msra.gmra.mrb[38].mxu1 %v11754_v31 }
0x2025   :  { %v11518_v1 = vpop.f32.mrb[24].mxu0 }
0x2026   :  { %v14517_v55 = vpop.f32.mrb[25].mxu0 }
0x2029   :  { %v11270_v14 = vpop.f32.mrb[26].mxu1 }
0x202a   :  { %v14484_v56 = vpop.f32.mrb[27].mxu1 }
0x202d   :  { %v11676_v38 = vpop.f32.mrb[26].mxu0 }
0x202e   :  { %v14539_v13 = vpop.f32.mrb[27].mxu0 }
0x2031   :  { %v11361_v61 = vpop.f32.mrb[28].mxu1 }
0x2032   :  { %v11362_v21 = vadd.f32 %v11361_v61, %v11270_v14  ;;  %v14495_v44 = vpop.f32.mrb[29].mxu1 }
0x2035   :  { %v11851_v62 = vpop.f32.mrb[28].mxu0 }
0x2036   :  { %v14561_v32 = vpop.f32.mrb[29].mxu0 }
0x2039   :  { %v11441_v37 = vpop.f32.mrb[30].mxu1 }
0x203a   :  { %v11442_v41 = vadd.f32 %v11441_v37, %v11362_v21  ;;  %v14506_v17 = vpop.f32.mrb[31].mxu1 }
0x203c   :  { %v11519_v49 = vadd.f32 %v11518_v1, %v11442_v41 }
0x203d   :  { %v12008_v23 = vpop.f32.mrb[30].mxu0 }
0x203e   :  { %v14583_v8 = vpop.f32.mrb[31].mxu0 }
0x2041   :  { %v11601_v18 = vpop.f32.mrb[32].mxu1 }
0x2042   :  { %v11602_v28 = vadd.f32 %v11601_v18, %v11519_v49  ;;  %v14528_v34 = vpop.f32.mrb[33].mxu1 }
0x2044   :  { %v11677_v53 = vadd.f32 %v11676_v38, %v11602_v28 }
0x2045   :  { %v12166_v48 = vpop.f32.mrb[32].mxu0 }
0x2046   :  { %v14605_v10 = vpop.f32.mrb[33].mxu0 }
0x2049   :  { %v11760_v57 = vpop.f32.mrb[34].mxu1 }
0x204a   :  { %v11761_v20 = vadd.f32 %v11760_v57, %v11677_v53  ;;  %v14550_v35 = vpop.f32.mrb[35].mxu1 }
0x204c   :  { %v11852_v12 = vadd.f32 %v11851_v62, %v11761_v20 }
0x2051   :  { %v11931_v26 = vpop.f32.mrb[36].mxu1 }
0x2052   :  { %v11932_v36 = vadd.f32 %v11931_v26, %v11852_v12  ;;  %v14572_v9 = vpop.f32.mrb[37].mxu1 }
0x2054   :  { %v12009_v47 = vadd.f32 %v12008_v23, %v11932_v36 }
0x2059   :  { %v12091_v60 = vpop.f32.mrb[38].mxu1 }
0x205a   :  { %v12092_v5 = vadd.f32 %v12091_v60, %v12009_v47  ;;  %v14594_v2 = vpop.f32.mrb[39].mxu1 }
0x205c   :  { %v12167_v3 = vadd.f32 %v12166_v48, %v12092_v5 }
0x205e   :  { %v12177_v7 = vadd.f32 %v12361_v58, %v12167_v3 }
0x2060   :  { %12179 = vst.msk [vmem:[#allocation18] sm:$0xf] %vm12178_vm3, %v12177_v7 }
0x2061   :  { %15974 = shalt.err (!%p15971_p12)
}
0x2062   :  { %s18192_s19 = sld [smem:[#allocation25_spill]] }
0x2068   :  { %s15975_s20 = scalar_lea.hbm %s18192_s19, 64 }
0x2069   :  { %p15976_p13 = scmp.ne.s32.totalorder %s18192_s19, %s15975_s20  ;;  %p15979_p0 = scmp.lt.u32.totalorder %s15975_s20, %s18192_s19 }
0x206b   :  { %p15981_p1 = pnand %p15979_p0, %p15976_p13 }
0x206d   :  { %15984 = shalt.err (!%p15981_p1)
}
0x206e   :  { %12189 = dma.vmem_to_hbm [thread:$0]  %s12187_s21, 64, %s18192_s19, [#allocation11]  }
0x206f   :  { %15993 = dma.done.wait [#allocation11], 64  }
0x2070   :  { %15994 = vsyncadd [#allocation11], 4294967232 }
0x2071   :  { %12193 = vsyncpa [#allocation10], 1 }
0x2072   :  { %12194 = vsyncpa [#allocation13], 1 }
0x2073   :  { %12195 = vsyncpa [#allocation16], 1 }
0x2074   :  { %12196 = vsyncpa [#allocation11], 1 }

</bundles_post_ra>
